<compile_context>
chip_gen: v5e
topology: v5e:2x2
jax: 0.10.0
libtpu: 0.0.40
codegen_flags: <defaults>
</compile_context>

<pallas_src>
import functools
import math

import jax
import jax.numpy as jnp
from jax.experimental import pallas as pl
from jax.experimental.pallas import tpu as pltpu

VAR0, VAR1 = 0.1, 0.2                               # SSD encode/decode variances
BL1_ALPHA, BL1_GAMMA, BL1_BETA = 0.5, 1.5, 0.11     # BalancedL1 (Libra R-CNN) defaults
_BL1_B = math.exp(BL1_GAMMA / BL1_ALPHA) - 1.0
FOCAL_ALPHA = 0.25                                  # focal gamma == 2.0 (explicit square)

_VMEM_LIMIT = 32 * 1024 * 1024


def _round_up(x, m):
    return (x + m - 1) // m * m


def _choose_tile(p_pad):
    """Largest TILE_P in {128..1024} (multiple of 128) that divides p_pad."""
    n_chunks = p_pad // 128
    t = max(d for d in range(8, 0, -1) if n_chunks % d == 0)
    return 128 * t


# --------------------------------------------------------------------------
# Kernel 1: matching.  truths [N, M, 4] x priors [4, P_pad] -> per-prior best
# truth (overlap + index) and per-truth best prior index, all reduced in-kernel.
# Grid (N, P_tiles); per-truth accumulators are resident over the P-tile axis.
# --------------------------------------------------------------------------
def _match_kernel(truths_ref, priors_ref, bto_ref, bti_ref, bpv_ref, bpi_ref,
                  *, tile_p):
    @pl.when(pl.program_id(1) == 0)
    def _init():
        bpv_ref[...] = jnp.full_like(bpv_ref, -1.0)
        bpi_ref[...] = jnp.zeros_like(bpi_ref)

    t = truths_ref[0]                          # [M, 4]  (xmin, ymin, xmax, ymax)
    p = priors_ref[...]                        # [4, T]  point form, lane-dense
    M = t.shape[0]
    T = p.shape[1]

    txmin, tymin = t[:, 0:1], t[:, 1:2]
    txmax, tymax = t[:, 2:3], t[:, 3:4]
    pxmin, pymin, pxmax, pymax = p[0:1, :], p[1:2, :], p[2:3, :], p[3:4, :]

    iw = jnp.maximum(jnp.minimum(txmax, pxmax) - jnp.maximum(txmin, pxmin), 0.0)
    ih = jnp.maximum(jnp.minimum(tymax, pymax) - jnp.maximum(tymin, pymin), 0.0)
    inter = iw * ih                                        # [M, T]
    area_t = (txmax - txmin) * (tymax - tymin)             # [M, 1]
    area_p = (pxmax - pxmin) * (pymax - pymin)             # [1, T]
    union = area_t + area_p - inter
    ok = union > 0.0                                       # guard 0/0 -> 0 (padded priors)
    iou = jnp.where(ok, inter, 0.0) / jnp.where(ok, union, 1.0)   # [M, T]

    # ---- per-prior best truth: sublane max / first-argmax over M (XLU) ----
    bto = jnp.max(iou, axis=0, keepdims=True)                     # [1, T]
    m_iota = jax.lax.broadcasted_iota(jnp.int32, (M, T), 0)
    bti = jnp.min(jnp.where(iou >= bto, m_iota, M), axis=0, keepdims=True)
    bto_ref[...] = bto[None]
    bti_ref[...] = bti[None]

    # ---- per-truth best prior: lane max / first-argmax, running over P tiles ----
    p_start = pl.program_id(1) * tile_p
    lane_iota = jax.lax.broadcasted_iota(jnp.int32, (M, T), 1) + p_start
    row_max = jnp.max(iou, axis=1, keepdims=True)                 # [M, 1]
    row_idx = jnp.min(jnp.where(iou >= row_max, lane_iota, 2 ** 30),
                      axis=1, keepdims=True)                      # [M, 1]

    better = row_max > bpv_ref[0]            # strict ">" keeps earliest tile on ties
    bpv_ref[...] = jnp.where(better, row_max, bpv_ref[0])[None]
    bpi_ref[...] = jnp.where(better, row_idx, bpi_ref[0])[None]


def match_pallas(truths, priors_point_cm, tile_p):
    N, M, _ = truths.shape
    P_pad = priors_point_cm.shape[1]
    kernel = functools.partial(_match_kernel, tile_p=tile_p)
    return pl.pallas_call(
        kernel,
        out_shape=(jax.ShapeDtypeStruct((N, 1, P_pad), jnp.float32),   # best_truth_overlap
                   jax.ShapeDtypeStruct((N, 1, P_pad), jnp.int32),     # best_truth_idx
                   jax.ShapeDtypeStruct((N, M, 1), jnp.float32),       # best_prior_overlap
                   jax.ShapeDtypeStruct((N, M, 1), jnp.int32)),        # best_prior_idx
        grid=(N, P_pad // tile_p),
        in_specs=[
            pl.BlockSpec((1, M, 4), lambda n, p: (n, 0, 0)),
            pl.BlockSpec((4, tile_p), lambda n, p: (0, p)),
        ],
        out_specs=(pl.BlockSpec((1, 1, tile_p), lambda n, p: (n, 0, p)),
                   pl.BlockSpec((1, 1, tile_p), lambda n, p: (n, 0, p)),
                   pl.BlockSpec((1, M, 1), lambda n, p: (n, 0, 0)),
                   pl.BlockSpec((1, M, 1), lambda n, p: (n, 0, 0))),
        compiler_params=pltpu.CompilerParams(
            dimension_semantics=("parallel", "arbitrary"),
            vmem_limit_bytes=_VMEM_LIMIT),
    )(truths, priors_point_cm)


# --------------------------------------------------------------------------
# Kernel 2 (fused): encode() + BalancedL1 loc loss  AND  sigmoid focal cls loss.
# All prior-lane-dense; per-image [1, tile_p] partial sums resident over P tiles.
# --------------------------------------------------------------------------
def _balanced_l1(d):
    b = _BL1_B
    small = (BL1_ALPHA / b) * (b * d + 1.0) * jnp.log(b * d / BL1_BETA + 1.0) - BL1_ALPHA * d
    big = BL1_GAMMA * d + (BL1_GAMMA / b - BL1_ALPHA * BL1_BETA)
    return jnp.where(d < BL1_BETA, small, big)


def _fused_loss_kernel(loc_p_ref, loc_t_ref, pri_ref, cls_p_ref, cls_t_ref, cls_w_ref,
                       out_loc_ref, out_cls_ref, *, num_real, tile_p):
    @pl.when(pl.program_id(1) == 0)
    def _init():
        out_loc_ref[...] = jnp.zeros_like(out_loc_ref)
        out_cls_ref[...] = jnp.zeros_like(out_cls_ref)

    # per-prior masks built in-kernel (no streamed pos / valid / one-hot arrays)
    T = tile_p
    p_start = pl.program_id(1) * tile_p
    lane = jax.lax.broadcasted_iota(jnp.int32, (1, T), 1) + p_start
    valid = (lane < num_real).astype(jnp.float32)           # [1, T] tail mask
    w = cls_w_ref[0]                                         # [1, T] matched overlap
    pos = jnp.where(w >= 0.5, 1.0, 0.0)                      # [1, T] positive mask

    # ---------------- localization: coordinate-major [4, T] -----------------
    lp = loc_p_ref[0].astype(jnp.float32)           # [4, T] predicted offsets
    lt = loc_t_ref[0].astype(jnp.float32)           # [4, T] matched gt (xyxy)
    pr = pri_ref[...]                               # [4, T] priors (cx, cy, w, h)

    p_wh = jnp.maximum(pr[2:4, :], 1e-8)            # guard padded / degenerate priors
    t_cxcy = (lt[0:2, :] + lt[2:4, :]) * 0.5
    t_wh = jnp.maximum(lt[2:4, :] - lt[0:2, :], 1e-8)   # guard log(0)
    g_cxcy = (t_cxcy - pr[0:2, :]) / (VAR0 * p_wh)
    g_wh = jnp.log(t_wh / p_wh) * (1.0 / VAR1)
    d_c = jnp.abs(lp[0:2, :] - g_cxcy)
    d_s = jnp.abs(lp[2:4, :] - g_wh)
    loc_elem = _balanced_l1(d_c) + _balanced_l1(d_s)                  # [2, T]
    loc_part = jnp.sum(loc_elem, axis=0, keepdims=True) * pos         # [1, T]
    out_loc_ref[...] += loc_part[None]

    # ------------- classification: class-major [C, T], sigmoid focal --------
    x = cls_p_ref[0].astype(jnp.float32)            # [C, T] logits (C on sublanes)
    C = x.shape[0]
    tcol = cls_t_ref[0]                             # [1, T] int32 (label + 1)

    neg = w < 0.4
    ign = jnp.logical_and(w >= 0.4, w < 0.5)
    t_eff = jnp.where(neg, 0, tcol)                 # background -> 0
    cls_ids = jax.lax.broadcasted_iota(jnp.int32, (C, T), 0) + 1
    hit = cls_ids == t_eff                          # [C, T] (background column dropped)
    tgt = hit.astype(jnp.float32)
    keep = jnp.where(jnp.logical_and(ign, hit), 0.0, 1.0) * valid     # [C, T]

    # single-exp exact sigmoid + stable BCE, gamma=2 as an explicit square
    e = jnp.exp(-jnp.abs(x))
    one_pe = 1.0 + e
    sig = jnp.where(x >= 0.0, 1.0, e) / one_pe      # sigmoid(x), exact divide
    ce = jnp.maximum(x, 0.0) - x * tgt + jnp.log(one_pe)
    p_t = sig * tgt + (1.0 - sig) * (1.0 - tgt)
    one_m = 1.0 - p_t
    alpha_t = FOCAL_ALPHA * tgt + (1.0 - FOCAL_ALPHA) * (1.0 - tgt)
    f_loss = alpha_t * (one_m * one_m) * ce * keep  # [C, T]

    # reduce over C (sublanes, XLU) before the lane-dense accumulate
    out_cls_ref[...] += jnp.sum(f_loss, axis=0, keepdims=True)[None]


def fused_losses(loc_p_cm, loc_t_cm, priors_cm, cls_p_cm, cls_t_row, cls_w_row,
                 num_real, tile_p):
    N, _, P_pad = loc_p_cm.shape
    C = cls_p_cm.shape[1]
    kernel = functools.partial(_fused_loss_kernel, num_real=num_real, tile_p=tile_p)
    return pl.pallas_call(
        kernel,
        out_shape=(jax.ShapeDtypeStruct((N, 1, tile_p), jnp.float32),
                   jax.ShapeDtypeStruct((N, 1, tile_p), jnp.float32)),
        grid=(N, P_pad // tile_p),
        in_specs=[
            pl.BlockSpec((1, 4, tile_p), lambda n, p: (n, 0, p)),   # loc_p (coord-major)
            pl.BlockSpec((1, 4, tile_p), lambda n, p: (n, 0, p)),   # loc_t (coord-major)
            pl.BlockSpec((4, tile_p), lambda n, p: (0, p)),         # priors, shared over N
            pl.BlockSpec((1, C, tile_p), lambda n, p: (n, 0, p)),   # cls logits (class-major)
            pl.BlockSpec((1, 1, tile_p), lambda n, p: (n, 0, p)),   # cls_t row
            pl.BlockSpec((1, 1, tile_p), lambda n, p: (n, 0, p)),   # cls_w row
        ],
        out_specs=(pl.BlockSpec((1, 1, tile_p), lambda n, p: (n, 0, 0)),
                   pl.BlockSpec((1, 1, tile_p), lambda n, p: (n, 0, 0))),
        compiler_params=pltpu.CompilerParams(
            dimension_semantics=("parallel", "arbitrary"),
            vmem_limit_bytes=_VMEM_LIMIT),
    )(loc_p_cm, loc_t_cm, priors_cm, cls_p_cm, cls_t_row, cls_w_row)


# --------------------------------------------------------------------------
# MultiBoxLoss.forward — default branch.
# --------------------------------------------------------------------------
def multibox_loss(loc_p, cls_p, priors, targets, mutual_guide="", lam=1.0):
    # TODO(synk): the 'MG' / 'iou2classif*' / 'combined' branches require
    # mutual_match / GFocalLoss / SIOULoss which are not part of the provided
    # source; only the default match + FocalLoss + BalancedL1 path is implemented.
    del mutual_guide, lam
    N, P, C = cls_p.shape
    M = targets.shape[1]

    P_pad = _round_up(P, 128)
    tile_p = _choose_tile(P_pad)
    pad = P_pad - P

    priors = priors.astype(jnp.float32)
    priors_point = jnp.concatenate(
        [priors[:, :2] - priors[:, 2:] * 0.5, priors[:, :2] + priors[:, 2:] * 0.5], axis=1)
    priors_cm = jnp.pad(priors, ((0, pad), (0, 0))).T              # [4, P_pad] center form
    priors_point_cm = jnp.pad(priors_point, ((0, pad), (0, 0))).T  # [4, P_pad] point form

    truths = targets[:, :, :4].astype(jnp.float32)   # [N, M, 4]
    labels = targets[:, :, 4].astype(jnp.int32)      # [N, M]

    # ---- matching: fused IoU + max/argmax kernel, tiny JAX scatter/gather glue ----
    bto, bti, _bpv, bpi = match_pallas(truths, priors_point_cm, tile_p)
    best_truth_overlap = bto[:, 0, :]                              # [N, P_pad]
    best_truth_idx = bti[:, 0, :]                                  # [N, P_pad] int32
    best_prior_idx = bpi[:, :, 0]                                  # [N, M] int32

    rows = jnp.arange(N)
    best_truth_overlap = best_truth_overlap.at[rows[:, None], best_prior_idx].set(2.0)
    for j in range(M):  # sequential: preserve last-write-wins order of the torch loop
        best_truth_idx = best_truth_idx.at[rows, best_prior_idx[:, j]].set(j)

    cls_w = best_truth_overlap                                     # [N, P_pad]
    cls_t = jnp.take_along_axis(labels, best_truth_idx, axis=1) + 1   # [N, P_pad]

    # matched gt boxes gathered directly in coordinate-major layout [N, 4, P_pad]
    truths_cm = jnp.swapaxes(truths, 1, 2)                         # [N, 4, M]
    loc_t_cm = jnp.take_along_axis(
        truths_cm, jnp.broadcast_to(best_truth_idx[:, None, :], (N, 4, P_pad)), axis=2)

    valid = jnp.arange(P_pad) < P
    pos = (cls_w >= 0.5) & valid[None, :]
    num_pos = jnp.maximum(jnp.sum(pos.astype(jnp.float32)), 1.0)

    # single pad+transpose relayouts (kept in input dtype; upcast happens in-kernel)
    loc_p_cm = jnp.pad(jnp.swapaxes(loc_p, 1, 2), ((0, 0), (0, 0), (0, pad)))  # [N, 4, P_pad]
    cls_p_cm = jnp.pad(jnp.swapaxes(cls_p, 1, 2), ((0, 0), (0, 0), (0, pad)))  # [N, C, P_pad]
    cls_t_row = cls_t.astype(jnp.int32)[:, None, :]                            # [N, 1, P_pad]
    cls_w_row = cls_w.astype(jnp.float32)[:, None, :]                          # [N, 1, P_pad]

    out_loc, out_cls = fused_losses(loc_p_cm, loc_t_cm, priors_cm, cls_p_cm,
                                    cls_t_row, cls_w_row, P, tile_p)

    # TODO(synk): exact reduction convention of BalancedL1Loss / FocalLoss is not
    # in the provided source; using sum over (masked) elements / num_positives.
    loss_l = jnp.sum(out_loc) / num_pos
    loss_c = jnp.sum(out_cls) / num_pos
    return loss_l + loss_c


if __name__ == "__main__":
    # batch, num_priors (exercises padding + 2 P-tiles of 1024), classes, objects
    N, P, C, M = 2, 2000, 8, 8

    key = jax.random.PRNGKey(0)
    k1, k2, k3, k4, k5, k6, k7 = jax.random.split(key, 7)

    # priors: center form (cx, cy, w, h)
    prior_cxy = jax.random.uniform(k1, (P, 2), minval=0.1, maxval=0.9)
    prior_wh = jax.random.uniform(k2, (P, 2), minval=0.1, maxval=0.3)
    priors = jnp.concatenate([prior_cxy, prior_wh], axis=1).astype(jnp.float32)

    # ground-truth targets: [N, M, 5] = (xmin, ymin, xmax, ymax, label)
    t_cxy = jax.random.uniform(k3, (N, M, 2), minval=0.2, maxval=0.8)
    t_wh = jax.random.uniform(k4, (N, M, 2), minval=0.1, maxval=0.4)
    t_boxes = jnp.concatenate([t_cxy - t_wh / 2.0, t_cxy + t_wh / 2.0], axis=-1)
    t_labels = jax.random.randint(k5, (N, M, 1), 0, C).astype(jnp.float32)
    targets = jnp.concatenate([t_boxes, t_labels], axis=-1).astype(jnp.float32)

    # predictions
    loc_p = (0.1 * jax.random.normal(k6, (N, P, 4))).astype(jnp.float32)
    cls_p = jax.random.normal(k7, (N, P, C)).astype(jnp.float32)

    loss_fn = jax.jit(lambda lp, cp, pr, tg: multibox_loss(lp, cp, pr, tg))
    loss = jax.block_until_ready(loss_fn(loc_p, cls_p, priors, targets))
    assert jnp.isfinite(loss), "loss is not finite"
    print("KERNEL_OK")
</pallas_src>

<mosaic_0001>
module attributes {stable_mosaic.version = 11 : i64} {
  func.func @_match_kernel(%arg0: i32, %arg1: i32, %arg2: memref<1x8x4xf32, #tpu.memory_space<vmem>>, %arg3: memref<4x1024xf32, #tpu.memory_space<vmem>>, %arg4: memref<1x1x1024xf32, #tpu.memory_space<vmem>>, %arg5: memref<1x1x1024xi32, #tpu.memory_space<vmem>>, %arg6: memref<1x8x1xf32, #tpu.memory_space<vmem>>, %arg7: memref<1x8x1xi32, #tpu.memory_space<vmem>>) attributes {dimension_semantics = [#tpu.dimension_semantics<parallel>, #tpu.dimension_semantics<arbitrary>], iteration_bounds = array<i64: 2, 2>, scalar_prefetch = 0 : i64, scratch_operands = 0 : i64, tpu.core_type = #tpu.core_type<tc>, window_params = [{transform_indices = @transform_0, window_bounds = array<i64: 1, 8, 4>}, {transform_indices = @transform_1, window_bounds = array<i64: 4, 1024>}, {transform_indices = @transform_2, window_bounds = array<i64: 1, 1, 1024>}, {transform_indices = @transform_3, window_bounds = array<i64: 1, 1, 1024>}, {transform_indices = @transform_4, window_bounds = array<i64: 1, 8, 1>}, {transform_indices = @transform_5, window_bounds = array<i64: 1, 8, 1>}]} {
    %c0_i32 = arith.constant 0 : i32
    %0 = arith.cmpi eq, %arg1, %c0_i32 : i32
    %1 = arith.extui %0 : i1 to i32
    %c0_i32_0 = arith.constant 0 : i32
    %2 = arith.cmpi ne, %1, %c0_i32_0 : i32
    scf.if %2 {
      %cst_34 = arith.constant -1.000000e+00 : f32
      %88 = vector.broadcast %cst_34 : f32 to vector<1x8x1xf32>
      %c0_35 = arith.constant 0 : index
      %c0_36 = arith.constant 0 : index
      %c0_37 = arith.constant 0 : index
      %89 = vector.load %arg6[%c0_35, %c0_36, %c0_37] : memref<1x8x1xf32, #tpu.memory_space<vmem>>, vector<1x8x1xf32>
      tpu.vector_store %arg6[%c0_35, %c0_36, %c0_37], %88 {strides = array<i32>} : memref<1x8x1xf32, #tpu.memory_space<vmem>>, vector<1x8x1xf32>,
      %c0_i32_38 = arith.constant 0 : i32
      %90 = vector.broadcast %c0_i32_38 : i32 to vector<1x8x1xi32>
      %c0_39 = arith.constant 0 : index
      %c0_40 = arith.constant 0 : index
      %c0_41 = arith.constant 0 : index
      %91 = vector.load %arg7[%c0_39, %c0_40, %c0_41] : memref<1x8x1xi32, #tpu.memory_space<vmem>>, vector<1x8x1xi32>
      tpu.vector_store %arg7[%c0_39, %c0_40, %c0_41], %90 {strides = array<i32>} : memref<1x8x1xi32, #tpu.memory_space<vmem>>, vector<1x8x1xi32>,
    } else {
    }
    %c0 = arith.constant 0 : index
    %c0_1 = arith.constant 0 : index
    %c0_2 = arith.constant 0 : index
    %3 = vector.load %arg2[%c0, %c0_1, %c0_2] : memref<1x8x4xf32, #tpu.memory_space<vmem>>, vector<1x8x4xf32>
    %4 = vector.shape_cast %3 : vector<1x8x4xf32> to vector<8x4xf32>
    %c0_3 = arith.constant 0 : index
    %c0_4 = arith.constant 0 : index
    %5 = vector.load %arg3[%c0_3, %c0_4] : memref<4x1024xf32, #tpu.memory_space<vmem>>, vector<4x1024xf32>
    %6 = vector.extract_strided_slice %4 {offsets = [0, 0], sizes = [8, 1], strides = [1, 1]} : vector<8x4xf32> to vector<8x1xf32>
    %7 = vector.extract_strided_slice %4 {offsets = [0, 1], sizes = [8, 1], strides = [1, 1]} : vector<8x4xf32> to vector<8x1xf32>
    %8 = vector.extract_strided_slice %4 {offsets = [0, 2], sizes = [8, 1], strides = [1, 1]} : vector<8x4xf32> to vector<8x1xf32>
    %9 = vector.extract_strided_slice %4 {offsets = [0, 3], sizes = [8, 1], strides = [1, 1]} : vector<8x4xf32> to vector<8x1xf32>
    %10 = vector.extract_strided_slice %5 {offsets = [0, 0], sizes = [1, 1024], strides = [1, 1]} : vector<4x1024xf32> to vector<1x1024xf32>
    %11 = vector.extract_strided_slice %5 {offsets = [1, 0], sizes = [1, 1024], strides = [1, 1]} : vector<4x1024xf32> to vector<1x1024xf32>
    %12 = vector.extract_strided_slice %5 {offsets = [2, 0], sizes = [1, 1024], strides = [1, 1]} : vector<4x1024xf32> to vector<1x1024xf32>
    %13 = vector.extract_strided_slice %5 {offsets = [3, 0], sizes = [1, 1024], strides = [1, 1]} : vector<4x1024xf32> to vector<1x1024xf32>
    %14 = vector.broadcast %8 : vector<8x1xf32> to vector<8x1024xf32>
    %15 = vector.broadcast %12 : vector<1x1024xf32> to vector<8x1024xf32>
    %16 = arith.minimumf %14, %15 : vector<8x1024xf32>
    %17 = vector.broadcast %6 : vector<8x1xf32> to vector<8x1024xf32>
    %18 = vector.broadcast %10 : vector<1x1024xf32> to vector<8x1024xf32>
    %19 = arith.maximumf %17, %18 : vector<8x1024xf32>
    %20 = arith.subf %16, %19 : vector<8x1024xf32>
    %cst = arith.constant 0.000000e+00 : f32
    %21 = vector.broadcast %cst : f32 to vector<8x1024xf32>
    %22 = arith.maximumf %20, %21 : vector<8x1024xf32>
    %23 = vector.broadcast %9 : vector<8x1xf32> to vector<8x1024xf32>
    %24 = vector.broadcast %13 : vector<1x1024xf32> to vector<8x1024xf32>
    %25 = arith.minimumf %23, %24 : vector<8x1024xf32>
    %26 = vector.broadcast %7 : vector<8x1xf32> to vector<8x1024xf32>
    %27 = vector.broadcast %11 : vector<1x1024xf32> to vector<8x1024xf32>
    %28 = arith.maximumf %26, %27 : vector<8x1024xf32>
    %29 = arith.subf %25, %28 : vector<8x1024xf32>
    %cst_5 = arith.constant 0.000000e+00 : f32
    %30 = vector.broadcast %cst_5 : f32 to vector<8x1024xf32>
    %31 = arith.maximumf %29, %30 : vector<8x1024xf32>
    %32 = arith.mulf %22, %31 : vector<8x1024xf32>
    %33 = arith.subf %8, %6 : vector<8x1xf32>
    %34 = arith.subf %9, %7 : vector<8x1xf32>
    %35 = arith.mulf %33, %34 : vector<8x1xf32>
    %36 = arith.subf %12, %10 : vector<1x1024xf32>
    %37 = arith.subf %13, %11 : vector<1x1024xf32>
    %38 = arith.mulf %36, %37 : vector<1x1024xf32>
    %39 = vector.broadcast %35 : vector<8x1xf32> to vector<8x1024xf32>
    %40 = vector.broadcast %38 : vector<1x1024xf32> to vector<8x1024xf32>
    %41 = arith.addf %39, %40 : vector<8x1024xf32>
    %42 = arith.subf %41, %32 : vector<8x1024xf32>
    %cst_6 = arith.constant 0.000000e+00 : f32
    %43 = vector.broadcast %cst_6 : f32 to vector<8x1024xf32>
    %44 = arith.cmpf ogt, %42, %43 : vector<8x1024xf32>
    %cst_7 = arith.constant 0.000000e+00 : f32
    %45 = vector.broadcast %cst_7 : f32 to vector<8x1024xf32>
    %46 = arith.select %44, %32, %45 : vector<8x1024xi1>, vector<8x1024xf32>
    %cst_8 = arith.constant 1.000000e+00 : f32
    %47 = vector.broadcast %cst_8 : f32 to vector<8x1024xf32>
    %48 = arith.select %44, %42, %47 : vector<8x1024xi1>, vector<8x1024xf32>
    %49 = arith.divf %46, %48 : vector<8x1024xf32>
    %cst_9 = arith.constant dense<0xFF800000> : vector<1024xf32>
    %50 = vector.multi_reduction <maximumf>, %49, %cst_9 [0] : vector<8x1024xf32> to vector<1024xf32>
    %51 = vector.shape_cast %50 : vector<1024xf32> to vector<1x1024xf32>
    %52 = tpu.iota {dimensions = array<i32: 0>} : vector<8x1024xi32>
    %53 = vector.broadcast %51 : vector<1x1024xf32> to vector<8x1024xf32>
    %54 = arith.cmpf oge, %49, %53 : vector<8x1024xf32>
    %c8_i32 = arith.constant 8 : i32
    %55 = vector.broadcast %c8_i32 : i32 to vector<8x1024xi32>
    %56 = arith.select %54, %52, %55 : vector<8x1024xi1>, vector<8x1024xi32>
    %cst_10 = arith.constant dense<2147483647> : vector<1024xi32>
    %57 = vector.multi_reduction <minsi>, %56, %cst_10 [0] : vector<8x1024xi32> to vector<1024xi32>
    %58 = vector.shape_cast %57 : vector<1024xi32> to vector<1x1024xi32>
    %59 = vector.shape_cast %51 : vector<1x1024xf32> to vector<1x1x1024xf32>
    %c0_11 = arith.constant 0 : index
    %c0_12 = arith.constant 0 : index
    %c0_13 = arith.constant 0 : index
    %60 = vector.load %arg4[%c0_11, %c0_12, %c0_13] : memref<1x1x1024xf32, #tpu.memory_space<vmem>>, vector<1x1x1024xf32>
    tpu.vector_store %arg4[%c0_11, %c0_12, %c0_13], %59 {strides = array<i32>} : memref<1x1x1024xf32, #tpu.memory_space<vmem>>, vector<1x1x1024xf32>,
    %61 = vector.shape_cast %58 : vector<1x1024xi32> to vector<1x1x1024xi32>
    %c0_14 = arith.constant 0 : index
    %c0_15 = arith.constant 0 : index
    %c0_16 = arith.constant 0 : index
    %62 = vector.load %arg5[%c0_14, %c0_15, %c0_16] : memref<1x1x1024xi32, #tpu.memory_space<vmem>>, vector<1x1x1024xi32>
    tpu.vector_store %arg5[%c0_14, %c0_15, %c0_16], %61 {strides = array<i32>} : memref<1x1x1024xi32, #tpu.memory_space<vmem>>, vector<1x1x1024xi32>,
    %c1024_i32 = arith.constant 1024 : i32
    %63 = arith.muli %arg1, %c1024_i32 : i32
    %64 = tpu.iota {dimensions = array<i32: 1>} : vector<8x1024xi32>
    %65 = vector.broadcast %63 : i32 to vector<8x1024xi32>
    %66 = arith.addi %64, %65 : vector<8x1024xi32>
    %cst_17 = arith.constant dense<0xFF800000> : vector<8xf32>
    %67 = vector.multi_reduction <maximumf>, %49, %cst_17 [1] : vector<8x1024xf32> to vector<8xf32>
    %68 = vector.shape_cast %67 : vector<8xf32> to vector<8x1xf32>
    %69 = vector.broadcast %68 : vector<8x1xf32> to vector<8x1024xf32>
    %70 = arith.cmpf oge, %49, %69 : vector<8x1024xf32>
    %c1073741824_i32 = arith.constant 1073741824 : i32
    %71 = vector.broadcast %c1073741824_i32 : i32 to vector<8x1024xi32>
    %72 = arith.select %70, %66, %71 : vector<8x1024xi1>, vector<8x1024xi32>
    %cst_18 = arith.constant dense<2147483647> : vector<8xi32>
    %73 = vector.multi_reduction <minsi>, %72, %cst_18 [1] : vector<8x1024xi32> to vector<8xi32>
    %74 = vector.shape_cast %73 : vector<8xi32> to vector<8x1xi32>
    %c0_19 = arith.constant 0 : index
    %c0_20 = arith.constant 0 : index
    %c0_21 = arith.constant 0 : index
    %75 = vector.load %arg6[%c0_19, %c0_20, %c0_21] : memref<1x8x1xf32, #tpu.memory_space<vmem>>, vector<1x8x1xf32>
    %76 = vector.shape_cast %75 : vector<1x8x1xf32> to vector<8x1xf32>
    %77 = arith.cmpf ogt, %68, %76 : vector<8x1xf32>
    %c0_22 = arith.constant 0 : index
    %c0_23 = arith.constant 0 : index
    %c0_24 = arith.constant 0 : index
    %78 = vector.load %arg6[%c0_22, %c0_23, %c0_24] : memref<1x8x1xf32, #tpu.memory_space<vmem>>, vector<1x8x1xf32>
    %79 = vector.shape_cast %78 : vector<1x8x1xf32> to vector<8x1xf32>
    %80 = arith.select %77, %68, %79 : vector<8x1xi1>, vector<8x1xf32>
    %81 = vector.shape_cast %80 : vector<8x1xf32> to vector<1x8x1xf32>
    %c0_25 = arith.constant 0 : index
    %c0_26 = arith.constant 0 : index
    %c0_27 = arith.constant 0 : index
    %82 = vector.load %arg6[%c0_25, %c0_26, %c0_27] : memref<1x8x1xf32, #tpu.memory_space<vmem>>, vector<1x8x1xf32>
    tpu.vector_store %arg6[%c0_25, %c0_26, %c0_27], %81 {strides = array<i32>} : memref<1x8x1xf32, #tpu.memory_space<vmem>>, vector<1x8x1xf32>,
    %c0_28 = arith.constant 0 : index
    %c0_29 = arith.constant 0 : index
    %c0_30 = arith.constant 0 : index
    %83 = vector.load %arg7[%c0_28, %c0_29, %c0_30] : memref<1x8x1xi32, #tpu.memory_space<vmem>>, vector<1x8x1xi32>
    %84 = vector.shape_cast %83 : vector<1x8x1xi32> to vector<8x1xi32>
    %85 = arith.select %77, %74, %84 : vector<8x1xi1>, vector<8x1xi32>
    %86 = vector.shape_cast %85 : vector<8x1xi32> to vector<1x8x1xi32>
    %c0_31 = arith.constant 0 : index
    %c0_32 = arith.constant 0 : index
    %c0_33 = arith.constant 0 : index
    %87 = vector.load %arg7[%c0_31, %c0_32, %c0_33] : memref<1x8x1xi32, #tpu.memory_space<vmem>>, vector<1x8x1xi32>
    tpu.vector_store %arg7[%c0_31, %c0_32, %c0_33], %86 {strides = array<i32>} : memref<1x8x1xi32, #tpu.memory_space<vmem>>, vector<1x8x1xi32>,
    return
  }
  func.func @transform_0(%arg0: i32, %arg1: i32) -> (i32, i32, i32) {
    %c0_i32 = arith.constant 0 : i32
    %c0_i32_0 = arith.constant 0 : i32
    %c0_i32_1 = arith.constant 0 : i32
    return %arg0, %c0_i32, %c0_i32_0 : i32, i32, i32
  }
  func.func @transform_1(%arg0: i32, %arg1: i32) -> (i32, i32) {
    %c0_i32 = arith.constant 0 : i32
    %c0_i32_0 = arith.constant 0 : i32
    return %c0_i32, %arg1 : i32, i32
  }
  func.func @transform_2(%arg0: i32, %arg1: i32) -> (i32, i32, i32) {
    %c0_i32 = arith.constant 0 : i32
    %c0_i32_0 = arith.constant 0 : i32
    return %arg0, %c0_i32, %arg1 : i32, i32, i32
  }
  func.func @transform_3(%arg0: i32, %arg1: i32) -> (i32, i32, i32) {
    %c0_i32 = arith.constant 0 : i32
    %c0_i32_0 = arith.constant 0 : i32
    return %arg0, %c0_i32, %arg1 : i32, i32, i32
  }
  func.func @transform_4(%arg0: i32, %arg1: i32) -> (i32, i32, i32) {
    %c0_i32 = arith.constant 0 : i32
    %c0_i32_0 = arith.constant 0 : i32
    %c0_i32_1 = arith.constant 0 : i32
    return %arg0, %c0_i32, %c0_i32_0 : i32, i32, i32
  }
  func.func @transform_5(%arg0: i32, %arg1: i32) -> (i32, i32, i32) {
    %c0_i32 = arith.constant 0 : i32
    %c0_i32_0 = arith.constant 0 : i32
    %c0_i32_1 = arith.constant 0 : i32
    return %arg0, %c0_i32, %c0_i32_0 : i32, i32, i32
  }
}

module attributes {stable_mosaic.version = 11 : i64} {
  func.func @_fused_loss_kernel(%arg0: i32, %arg1: i32, %arg2: memref<1x4x1024xf32, #tpu.memory_space<vmem>>, %arg3: memref<1x4x1024xf32, #tpu.memory_space<vmem>>, %arg4: memref<4x1024xf32, #tpu.memory_space<vmem>>, %arg5: memref<1x8x1024xf32, #tpu.memory_space<vmem>>, %arg6: memref<1x1x1024xi32, #tpu.memory_space<vmem>>, %arg7: memref<1x1x1024xf32, #tpu.memory_space<vmem>>, %arg8: memref<1x1x1024xf32, #tpu.memory_space<vmem>>, %arg9: memref<1x1x1024xf32, #tpu.memory_space<vmem>>) attributes {dimension_semantics = [#tpu.dimension_semantics<parallel>, #tpu.dimension_semantics<arbitrary>], iteration_bounds = array<i64: 2, 2>, scalar_prefetch = 0 : i64, scratch_operands = 0 : i64, tpu.core_type = #tpu.core_type<tc>, window_params = [{transform_indices = @transform_0, window_bounds = array<i64: 1, 4, 1024>}, {transform_indices = @transform_1, window_bounds = array<i64: 1, 4, 1024>}, {transform_indices = @transform_2, window_bounds = array<i64: 4, 1024>}, {transform_indices = @transform_3, window_bounds = array<i64: 1, 8, 1024>}, {transform_indices = @transform_4, window_bounds = array<i64: 1, 1, 1024>}, {transform_indices = @transform_5, window_bounds = array<i64: 1, 1, 1024>}, {transform_indices = @transform_6, window_bounds = array<i64: 1, 1, 1024>}, {transform_indices = @transform_7, window_bounds = array<i64: 1, 1, 1024>}]} {
    %c0_i32 = arith.constant 0 : i32
    %0 = arith.cmpi eq, %arg1, %c0_i32 : i32
    %1 = arith.extui %0 : i1 to i32
    %c0_i32_0 = arith.constant 0 : i32
    %2 = arith.cmpi ne, %1, %c0_i32_0 : i32
    scf.if %2 {
      %cst_75 = arith.constant 0.000000e+00 : f32
      %177 = vector.broadcast %cst_75 : f32 to vector<1x1x1024xf32>
      %c0_76 = arith.constant 0 : index
      %c0_77 = arith.constant 0 : index
      %c0_78 = arith.constant 0 : index
      %178 = vector.load %arg8[%c0_76, %c0_77, %c0_78] : memref<1x1x1024xf32, #tpu.memory_space<vmem>>, vector<1x1x1024xf32>
      tpu.vector_store %arg8[%c0_76, %c0_77, %c0_78], %177 {strides = array<i32>} : memref<1x1x1024xf32, #tpu.memory_space<vmem>>, vector<1x1x1024xf32>,
      %cst_79 = arith.constant 0.000000e+00 : f32
      %179 = vector.broadcast %cst_79 : f32 to vector<1x1x1024xf32>
      %c0_80 = arith.constant 0 : index
      %c0_81 = arith.constant 0 : index
      %c0_82 = arith.constant 0 : index
      %180 = vector.load %arg9[%c0_80, %c0_81, %c0_82] : memref<1x1x1024xf32, #tpu.memory_space<vmem>>, vector<1x1x1024xf32>
      tpu.vector_store %arg9[%c0_80, %c0_81, %c0_82], %179 {strides = array<i32>} : memref<1x1x1024xf32, #tpu.memory_space<vmem>>, vector<1x1x1024xf32>,
    } else {
    }
    %c1024_i32 = arith.constant 1024 : i32
    %3 = arith.muli %arg1, %c1024_i32 : i32
    %4 = tpu.iota {dimensions = array<i32: 1>} : vector<1x1024xi32>
    %5 = vector.broadcast %3 : i32 to vector<1x1024xi32>
    %6 = arith.addi %4, %5 : vector<1x1024xi32>
    %c2000_i32 = arith.constant 2000 : i32
    %7 = vector.broadcast %c2000_i32 : i32 to vector<1x1024xi32>
    %8 = arith.cmpi slt, %6, %7 : vector<1x1024xi32>
    %9 = arith.extui %8 : vector<1x1024xi1> to vector<1x1024xi32>
    %10 = arith.sitofp %9 : vector<1x1024xi32> to vector<1x1024xf32>
    %c0 = arith.constant 0 : index
    %c0_1 = arith.constant 0 : index
    %c0_2 = arith.constant 0 : index
    %11 = vector.load %arg7[%c0, %c0_1, %c0_2] : memref<1x1x1024xf32, #tpu.memory_space<vmem>>, vector<1x1x1024xf32>
    %12 = vector.shape_cast %11 : vector<1x1x1024xf32> to vector<1x1024xf32>
    %cst = arith.constant 5.000000e-01 : f32
    %13 = vector.broadcast %cst : f32 to vector<1x1024xf32>
    %14 = arith.cmpf oge, %12, %13 : vector<1x1024xf32>
    %cst_3 = arith.constant 1.000000e+00 : f32
    %cst_4 = arith.constant 0.000000e+00 : f32
    %15 = vector.broadcast %cst_3 : f32 to vector<1x1024xf32>
    %16 = vector.broadcast %cst_4 : f32 to vector<1x1024xf32>
    %17 = arith.select %14, %15, %16 : vector<1x1024xi1>, vector<1x1024xf32>
    %c0_5 = arith.constant 0 : index
    %c0_6 = arith.constant 0 : index
    %c0_7 = arith.constant 0 : index
    %18 = vector.load %arg2[%c0_5, %c0_6, %c0_7] : memref<1x4x1024xf32, #tpu.memory_space<vmem>>, vector<1x4x1024xf32>
    %19 = vector.shape_cast %18 : vector<1x4x1024xf32> to vector<4x1024xf32>
    %c0_8 = arith.constant 0 : index
    %c0_9 = arith.constant 0 : index
    %c0_10 = arith.constant 0 : index
    %20 = vector.load %arg3[%c0_8, %c0_9, %c0_10] : memref<1x4x1024xf32, #tpu.memory_space<vmem>>, vector<1x4x1024xf32>
    %21 = vector.shape_cast %20 : vector<1x4x1024xf32> to vector<4x1024xf32>
    %c0_11 = arith.constant 0 : index
    %c0_12 = arith.constant 0 : index
    %22 = vector.load %arg4[%c0_11, %c0_12] : memref<4x1024xf32, #tpu.memory_space<vmem>>, vector<4x1024xf32>
    %23 = vector.extract_strided_slice %22 {offsets = [2, 0], sizes = [2, 1024], strides = [1, 1]} : vector<4x1024xf32> to vector<2x1024xf32>
    %cst_13 = arith.constant 9.99999993E-9 : f32
    %24 = vector.broadcast %cst_13 : f32 to vector<2x1024xf32>
    %25 = arith.maximumf %23, %24 : vector<2x1024xf32>
    %26 = vector.extract_strided_slice %21 {offsets = [0, 0], sizes = [2, 1024], strides = [1, 1]} : vector<4x1024xf32> to vector<2x1024xf32>
    %27 = vector.extract_strided_slice %21 {offsets = [2, 0], sizes = [2, 1024], strides = [1, 1]} : vector<4x1024xf32> to vector<2x1024xf32>
    %28 = arith.addf %26, %27 : vector<2x1024xf32>
    %cst_14 = arith.constant 5.000000e-01 : f32
    %29 = vector.broadcast %cst_14 : f32 to vector<2x1024xf32>
    %30 = arith.mulf %28, %29 : vector<2x1024xf32>
    %31 = vector.extract_strided_slice %21 {offsets = [2, 0], sizes = [2, 1024], strides = [1, 1]} : vector<4x1024xf32> to vector<2x1024xf32>
    %32 = vector.extract_strided_slice %21 {offsets = [0, 0], sizes = [2, 1024], strides = [1, 1]} : vector<4x1024xf32> to vector<2x1024xf32>
    %33 = arith.subf %31, %32 : vector<2x1024xf32>
    %cst_15 = arith.constant 9.99999993E-9 : f32
    %34 = vector.broadcast %cst_15 : f32 to vector<2x1024xf32>
    %35 = arith.maximumf %33, %34 : vector<2x1024xf32>
    %36 = vector.extract_strided_slice %22 {offsets = [0, 0], sizes = [2, 1024], strides = [1, 1]} : vector<4x1024xf32> to vector<2x1024xf32>
    %37 = arith.subf %30, %36 : vector<2x1024xf32>
    %cst_16 = arith.constant 1.000000e-01 : f32
    %38 = vector.broadcast %cst_16 : f32 to vector<2x1024xf32>
    %39 = arith.mulf %38, %25 : vector<2x1024xf32>
    %40 = arith.divf %37, %39 : vector<2x1024xf32>
    %41 = arith.divf %35, %25 : vector<2x1024xf32>
    %42 = math.log %41 : vector<2x1024xf32>
    %cst_17 = arith.constant 5.000000e+00 : f32
    %43 = vector.broadcast %cst_17 : f32 to vector<2x1024xf32>
    %44 = arith.mulf %42, %43 : vector<2x1024xf32>
    %45 = vector.extract_strided_slice %19 {offsets = [0, 0], sizes = [2, 1024], strides = [1, 1]} : vector<4x1024xf32> to vector<2x1024xf32>
    %46 = arith.subf %45, %40 : vector<2x1024xf32>
    %47 = math.absf %46 : vector<2x1024xf32>
    %48 = vector.extract_strided_slice %19 {offsets = [2, 0], sizes = [2, 1024], strides = [1, 1]} : vector<4x1024xf32> to vector<2x1024xf32>
    %49 = arith.subf %48, %44 : vector<2x1024xf32>
    %50 = math.absf %49 : vector<2x1024xf32>
    %cst_18 = arith.constant 19.085537 : f32
    %51 = vector.broadcast %cst_18 : f32 to vector<2x1024xf32>
    %52 = arith.mulf %51, %47 : vector<2x1024xf32>
    %cst_19 = arith.constant 1.000000e+00 : f32
    %53 = vector.broadcast %cst_19 : f32 to vector<2x1024xf32>
    %54 = arith.addf %52, %53 : vector<2x1024xf32>
    %cst_20 = arith.constant 0.0261978488 : f32
    %55 = vector.broadcast %cst_20 : f32 to vector<2x1024xf32>
    %56 = arith.mulf %55, %54 : vector<2x1024xf32>
    %cst_21 = arith.constant 19.085537 : f32
    %57 = vector.broadcast %cst_21 : f32 to vector<2x1024xf32>
    %58 = arith.mulf %57, %47 : vector<2x1024xf32>
    %cst_22 = arith.constant 1.100000e-01 : f32
    %59 = vector.broadcast %cst_22 : f32 to vector<2x1024xf32>
    %60 = arith.divf %58, %59 : vector<2x1024xf32>
    %cst_23 = arith.constant 1.000000e+00 : f32
    %61 = vector.broadcast %cst_23 : f32 to vector<2x1024xf32>
    %62 = arith.addf %60, %61 : vector<2x1024xf32>
    %63 = math.log %62 : vector<2x1024xf32>
    %64 = arith.mulf %56, %63 : vector<2x1024xf32>
    %cst_24 = arith.constant 5.000000e-01 : f32
    %65 = vector.broadcast %cst_24 : f32 to vector<2x1024xf32>
    %66 = arith.mulf %65, %47 : vector<2x1024xf32>
    %67 = arith.subf %64, %66 : vector<2x1024xf32>
    %cst_25 = arith.constant 1.500000e+00 : f32
    %68 = vector.broadcast %cst_25 : f32 to vector<2x1024xf32>
    %69 = arith.mulf %68, %47 : vector<2x1024xf32>
    %cst_26 = arith.constant 0.023593545 : f32
    %70 = vector.broadcast %cst_26 : f32 to vector<2x1024xf32>
    %71 = arith.addf %69, %70 : vector<2x1024xf32>
    %cst_27 = arith.constant 1.100000e-01 : f32
    %72 = vector.broadcast %cst_27 : f32 to vector<2x1024xf32>
    %73 = arith.cmpf olt, %47, %72 : vector<2x1024xf32>
    %74 = arith.select %73, %67, %71 : vector<2x1024xi1>, vector<2x1024xf32>
    %cst_28 = arith.constant 19.085537 : f32
    %75 = vector.broadcast %cst_28 : f32 to vector<2x1024xf32>
    %76 = arith.mulf %75, %50 : vector<2x1024xf32>
    %cst_29 = arith.constant 1.000000e+00 : f32
    %77 = vector.broadcast %cst_29 : f32 to vector<2x1024xf32>
    %78 = arith.addf %76, %77 : vector<2x1024xf32>
    %cst_30 = arith.constant 0.0261978488 : f32
    %79 = vector.broadcast %cst_30 : f32 to vector<2x1024xf32>
    %80 = arith.mulf %79, %78 : vector<2x1024xf32>
    %cst_31 = arith.constant 19.085537 : f32
    %81 = vector.broadcast %cst_31 : f32 to vector<2x1024xf32>
    %82 = arith.mulf %81, %50 : vector<2x1024xf32>
    %cst_32 = arith.constant 1.100000e-01 : f32
    %83 = vector.broadcast %cst_32 : f32 to vector<2x1024xf32>
    %84 = arith.divf %82, %83 : vector<2x1024xf32>
    %cst_33 = arith.constant 1.000000e+00 : f32
    %85 = vector.broadcast %cst_33 : f32 to vector<2x1024xf32>
    %86 = arith.addf %84, %85 : vector<2x1024xf32>
    %87 = math.log %86 : vector<2x1024xf32>
    %88 = arith.mulf %80, %87 : vector<2x1024xf32>
    %cst_34 = arith.constant 5.000000e-01 : f32
    %89 = vector.broadcast %cst_34 : f32 to vector<2x1024xf32>
    %90 = arith.mulf %89, %50 : vector<2x1024xf32>
    %91 = arith.subf %88, %90 : vector<2x1024xf32>
    %cst_35 = arith.constant 1.500000e+00 : f32
    %92 = vector.broadcast %cst_35 : f32 to vector<2x1024xf32>
    %93 = arith.mulf %92, %50 : vector<2x1024xf32>
    %cst_36 = arith.constant 0.023593545 : f32
    %94 = vector.broadcast %cst_36 : f32 to vector<2x1024xf32>
    %95 = arith.addf %93, %94 : vector<2x1024xf32>
    %cst_37 = arith.constant 1.100000e-01 : f32
    %96 = vector.broadcast %cst_37 : f32 to vector<2x1024xf32>
    %97 = arith.cmpf olt, %50, %96 : vector<2x1024xf32>
    %98 = arith.select %97, %91, %95 : vector<2x1024xi1>, vector<2x1024xf32>
    %99 = arith.addf %74, %98 : vector<2x1024xf32>
    %cst_38 = arith.constant dense<0.000000e+00> : vector<1024xf32>
    %100 = vector.multi_reduction <add>, %99, %cst_38 [0] : vector<2x1024xf32> to vector<1024xf32>
    %101 = vector.shape_cast %100 : vector<1024xf32> to vector<1x1024xf32>
    %102 = arith.mulf %101, %17 : vector<1x1024xf32>
    %c0_39 = arith.constant 0 : index
    %c0_40 = arith.constant 0 : index
    %c0_41 = arith.constant 0 : index
    %103 = vector.load %arg8[%c0_39, %c0_40, %c0_41] : memref<1x1x1024xf32, #tpu.memory_space<vmem>>, vector<1x1x1024xf32>
    %104 = vector.shape_cast %102 : vector<1x1024xf32> to vector<1x1x1024xf32>
    %105 = arith.addf %103, %104 : vector<1x1x1024xf32>
    %c0_42 = arith.constant 0 : index
    %c0_43 = arith.constant 0 : index
    %c0_44 = arith.constant 0 : index
    %106 = vector.load %arg8[%c0_42, %c0_43, %c0_44] : memref<1x1x1024xf32, #tpu.memory_space<vmem>>, vector<1x1x1024xf32>
    tpu.vector_store %arg8[%c0_42, %c0_43, %c0_44], %105 {strides = array<i32>} : memref<1x1x1024xf32, #tpu.memory_space<vmem>>, vector<1x1x1024xf32>,
    %c0_45 = arith.constant 0 : index
    %c0_46 = arith.constant 0 : index
    %c0_47 = arith.constant 0 : index
    %107 = vector.load %arg5[%c0_45, %c0_46, %c0_47] : memref<1x8x1024xf32, #tpu.memory_space<vmem>>, vector<1x8x1024xf32>
    %108 = vector.shape_cast %107 : vector<1x8x1024xf32> to vector<8x1024xf32>
    %c0_48 = arith.constant 0 : index
    %c0_49 = arith.constant 0 : index
    %c0_50 = arith.constant 0 : index
    %109 = vector.load %arg6[%c0_48, %c0_49, %c0_50] : memref<1x1x1024xi32, #tpu.memory_space<vmem>>, vector<1x1x1024xi32>
    %110 = vector.shape_cast %109 : vector<1x1x1024xi32> to vector<1x1024xi32>
    %cst_51 = arith.constant 4.000000e-01 : f32
    %111 = vector.broadcast %cst_51 : f32 to vector<1x1024xf32>
    %112 = arith.cmpf olt, %12, %111 : vector<1x1024xf32>
    %cst_52 = arith.constant 4.000000e-01 : f32
    %113 = vector.broadcast %cst_52 : f32 to vector<1x1024xf32>
    %114 = arith.cmpf oge, %12, %113 : vector<1x1024xf32>
    %cst_53 = arith.constant 5.000000e-01 : f32
    %115 = vector.broadcast %cst_53 : f32 to vector<1x1024xf32>
    %116 = arith.cmpf olt, %12, %115 : vector<1x1024xf32>
    %117 = arith.andi %114, %116 : vector<1x1024xi1>
    %c0_i32_54 = arith.constant 0 : i32
    %118 = vector.broadcast %c0_i32_54 : i32 to vector<1x1024xi32>
    %119 = arith.select %112, %118, %110 : vector<1x1024xi1>, vector<1x1024xi32>
    %120 = tpu.iota {dimensions = array<i32: 0>} : vector<8x1024xi32>
    %c1_i32 = arith.constant 1 : i32
    %121 = vector.broadcast %c1_i32 : i32 to vector<8x1024xi32>
    %122 = arith.addi %120, %121 : vector<8x1024xi32>
    %123 = vector.broadcast %119 : vector<1x1024xi32> to vector<8x1024xi32>
    %124 = arith.cmpi eq, %122, %123 : vector<8x1024xi32>
    %125 = arith.extui %124 : vector<8x1024xi1> to vector<8x1024xi32>
    %126 = arith.sitofp %125 : vector<8x1024xi32> to vector<8x1024xf32>
    %127 = vector.broadcast %117 : vector<1x1024xi1> to vector<8x1024xi1>
    %128 = arith.andi %127, %124 : vector<8x1024xi1>
    %cst_55 = arith.constant 0.000000e+00 : f32
    %cst_56 = arith.constant 1.000000e+00 : f32
    %129 = vector.broadcast %cst_55 : f32 to vector<8x1024xf32>
    %130 = vector.broadcast %cst_56 : f32 to vector<8x1024xf32>
    %131 = arith.select %128, %129, %130 : vector<8x1024xi1>, vector<8x1024xf32>
    %132 = vector.broadcast %10 : vector<1x1024xf32> to vector<8x1024xf32>
    %133 = arith.mulf %131, %132 : vector<8x1024xf32>
    %134 = math.absf %108 : vector<8x1024xf32>
    %cst_57 = arith.constant 0.000000e+00 : f32
    %135 = vector.broadcast %cst_57 : f32 to vector<8x1024xf32>
    %136 = arith.subf %135, %134 : vector<8x1024xf32>
    %137 = math.exp %136 : vector<8x1024xf32>
    %cst_58 = arith.constant 1.000000e+00 : f32
    %138 = vector.broadcast %cst_58 : f32 to vector<8x1024xf32>
    %139 = arith.addf %138, %137 : vector<8x1024xf32>
    %cst_59 = arith.constant 0.000000e+00 : f32
    %140 = vector.broadcast %cst_59 : f32 to vector<8x1024xf32>
    %141 = arith.cmpf oge, %108, %140 : vector<8x1024xf32>
    %cst_60 = arith.constant 1.000000e+00 : f32
    %142 = vector.broadcast %cst_60 : f32 to vector<8x1024xf32>
    %143 = arith.select %141, %142, %137 : vector<8x1024xi1>, vector<8x1024xf32>
    %144 = arith.divf %143, %139 : vector<8x1024xf32>
    %cst_61 = arith.constant 0.000000e+00 : f32
    %145 = vector.broadcast %cst_61 : f32 to vector<8x1024xf32>
    %146 = arith.maximumf %108, %145 : vector<8x1024xf32>
    %147 = arith.mulf %108, %126 : vector<8x1024xf32>
    %148 = arith.subf %146, %147 : vector<8x1024xf32>
    %149 = math.log %139 : vector<8x1024xf32>
    %150 = arith.addf %148, %149 : vector<8x1024xf32>
    %151 = arith.mulf %144, %126 : vector<8x1024xf32>
    %cst_62 = arith.constant 1.000000e+00 : f32
    %152 = vector.broadcast %cst_62 : f32 to vector<8x1024xf32>
    %153 = arith.subf %152, %144 : vector<8x1024xf32>
    %cst_63 = arith.constant 1.000000e+00 : f32
    %154 = vector.broadcast %cst_63 : f32 to vector<8x1024xf32>
    %155 = arith.subf %154, %126 : vector<8x1024xf32>
    %156 = arith.mulf %153, %155 : vector<8x1024xf32>
    %157 = arith.addf %151, %156 : vector<8x1024xf32>
    %cst_64 = arith.constant 1.000000e+00 : f32
    %158 = vector.broadcast %cst_64 : f32 to vector<8x1024xf32>
    %159 = arith.subf %158, %157 : vector<8x1024xf32>
    %cst_65 = arith.constant 2.500000e-01 : f32
    %160 = vector.broadcast %cst_65 : f32 to vector<8x1024xf32>
    %161 = arith.mulf %160, %126 : vector<8x1024xf32>
    %cst_66 = arith.constant 1.000000e+00 : f32
    %162 = vector.broadcast %cst_66 : f32 to vector<8x1024xf32>
    %163 = arith.subf %162, %126 : vector<8x1024xf32>
    %cst_67 = arith.constant 7.500000e-01 : f32
    %164 = vector.broadcast %cst_67 : f32 to vector<8x1024xf32>
    %165 = arith.mulf %164, %163 : vector<8x1024xf32>
    %166 = arith.addf %161, %165 : vector<8x1024xf32>
    %167 = arith.mulf %159, %159 : vector<8x1024xf32>
    %168 = arith.mulf %166, %167 : vector<8x1024xf32>
    %169 = arith.mulf %168, %150 : vector<8x1024xf32>
    %170 = arith.mulf %169, %133 : vector<8x1024xf32>
    %c0_68 = arith.constant 0 : index
    %c0_69 = arith.constant 0 : index
    %c0_70 = arith.constant 0 : index
    %171 = vector.load %arg9[%c0_68, %c0_69, %c0_70] : memref<1x1x1024xf32, #tpu.memory_space<vmem>>, vector<1x1x1024xf32>
    %cst_71 = arith.constant dense<0.000000e+00> : vector<1024xf32>
    %172 = vector.multi_reduction <add>, %170, %cst_71 [0] : vector<8x1024xf32> to vector<1024xf32>
    %173 = vector.shape_cast %172 : vector<1024xf32> to vector<1x1024xf32>
    %174 = vector.shape_cast %173 : vector<1x1024xf32> to vector<1x1x1024xf32>
    %175 = arith.addf %171, %174 : vector<1x1x1024xf32>
    %c0_72 = arith.constant 0 : index
    %c0_73 = arith.constant 0 : index
    %c0_74 = arith.constant 0 : index
    %176 = vector.load %arg9[%c0_72, %c0_73, %c0_74] : memref<1x1x1024xf32, #tpu.memory_space<vmem>>, vector<1x1x1024xf32>
    tpu.vector_store %arg9[%c0_72, %c0_73, %c0_74], %175 {strides = array<i32>} : memref<1x1x1024xf32, #tpu.memory_space<vmem>>, vector<1x1x1024xf32>,
    return
  }
  func.func @transform_0(%arg0: i32, %arg1: i32) -> (i32, i32, i32) {
    %c0_i32 = arith.constant 0 : i32
    %c0_i32_0 = arith.constant 0 : i32
    return %arg0, %c0_i32, %arg1 : i32, i32, i32
  }
  func.func @transform_1(%arg0: i32, %arg1: i32) -> (i32, i32, i32) {
    %c0_i32 = arith.constant 0 : i32
    %c0_i32_0 = arith.constant 0 : i32
    return %arg0, %c0_i32, %arg1 : i32, i32, i32
  }
  func.func @transform_2(%arg0: i32, %arg1: i32) -> (i32, i32) {
    %c0_i32 = arith.constant 0 : i32
    %c0_i32_0 = arith.constant 0 : i32
    return %c0_i32, %arg1 : i32, i32
  }
  func.func @transform_3(%arg0: i32, %arg1: i32) -> (i32, i32, i32) {
    %c0_i32 = arith.constant 0 : i32
    %c0_i32_0 = arith.constant 0 : i32
    return %arg0, %c0_i32, %arg1 : i32, i32, i32
  }
  func.func @transform_4(%arg0: i32, %arg1: i32) -> (i32, i32, i32) {
    %c0_i32 = arith.constant 0 : i32
    %c0_i32_0 = arith.constant 0 : i32
    return %arg0, %c0_i32, %arg1 : i32, i32, i32
  }
  func.func @transform_5(%arg0: i32, %arg1: i32) -> (i32, i32, i32) {
    %c0_i32 = arith.constant 0 : i32
    %c0_i32_0 = arith.constant 0 : i32
    return %arg0, %c0_i32, %arg1 : i32, i32, i32
  }
  func.func @transform_6(%arg0: i32, %arg1: i32) -> (i32, i32, i32) {
    %c0_i32 = arith.constant 0 : i32
    %c0_i32_0 = arith.constant 0 : i32
    %c0_i32_1 = arith.constant 0 : i32
    return %arg0, %c0_i32, %c0_i32_0 : i32, i32, i32
  }
  func.func @transform_7(%arg0: i32, %arg1: i32) -> (i32, i32, i32) {
    %c0_i32 = arith.constant 0 : i32
    %c0_i32_0 = arith.constant 0 : i32
    %c0_i32_1 = arith.constant 0 : i32
    return %arg0, %c0_i32, %c0_i32_0 : i32, i32, i32
  }
}

</mosaic_0001>

<bundles_post_ra>
// kernel: _lambda_.2
= control target key start
LH: loop header
LB: loop body
LE: loop exit
PB: predicated region body
PF: predicated region fallthrough
CT: control target
= control target key end

     0   :  { %s2102_s0 = inlined_call_operand.vmem [shape: f32[2,8,4], index: 0, kind: input, shape index: {}]   ;;  %s2103_s1 = inlined_call_operand.vmem [shape: f32[4,2048], index: 1, kind: input, shape index: {}]   ;;  %s2104_s2 = inlined_call_operand.vmem [shape: f32[2,1,2048], index: 2, kind: output, shape index: {0}]   ;;  %s2105_s3 = inlined_call_operand.vmem [shape: s32[2,1,2048], index: 3, kind: output, shape index: {1}]   ;;  %s2106_s4 = inlined_call_operand.hbm [shape: f32[2,8,1], index: 4, kind: output, shape index: {2}]   ;;  %s2107_s5 = inlined_call_operand.vmem [shape: s32[2,8,1], index: 5, kind: output, shape index: {3}]  }
   0x1   :  { %2115 = sst [smem:[#allocation11_spill]] %s2102_s0 }
   0x2   :  { %11 = vsyncpa [#allocation3], 0 }
   0x3   :  { %13 = vsyncpa [#allocation3 + $0x1], 0  ;;  %s1481_s18 = smov 0   ;;  %s1483_s19 = smov 0  }
   0x4   :  { %s1485_s20 = smov 0   ;;  %s1487_s21 = smov 0  }
   0x5   :  { %s1489_s22 = smov 0   ;;  %s1491_s23 = smov 0  }
   0x6   :  { %s1493_s24 = smov 0   ;;  %s1495_s25 = smov 0  }
   0x7 LB: > { %2116 = sst [smem:[#allocation5_spill]] %s1421_s20  ;;  %s1223_s26 = sadd.s32 4294967295, %s1441_s25   ;;  %s1441_s25 = sphi %s1495_s25, %s19_s25   ;;  %s1437_s24 = sphi %s1493_s24, %s2145_s24   ;;  %s1433_s23 = sphi %s1491_s23, %s2144_s23   ;;  %s1429_s22 = sphi %s1489_s22, %s2143_s22   ;;  %s1425_s21 = sphi %s1487_s21, %s2142_s21   ;;  %s1421_s20 = sphi %s1485_s20, %s2141_s20   ;;  %s1417_s19 = sphi %s1483_s19, %s2147_s19   ;;  %s1413_s18 = sphi %s1481_s18, %s2146_s18  }
   0x8   : > { %2117 = sst [smem:[#allocation6_spill]] %s1433_s23  ;;  %s1224_s27 = sadd.s32 4294967294, %s1441_s25  }
   0x9   : > { %2118 = sst [smem:[#allocation7_spill]] %s1437_s24  ;;  %s28_s28 = sadd.s32 1, %s1433_s23 }
   0xa   : > { %p29_p0 = scmp.ge.s32.totalorder %s28_s28, 2  ;;  %s31_s29 = sadd.s32 1, %s1437_s24 }
   0xb   : > { %p156_p1 = scmp.ne.s32.totalorder %s1421_s20, %s1417_s19  ;;  %p157_p2 = scmp.eq.s32.totalorder %s1223_s26, 3 }
   0xc   : > { %s2149_s28 = smov (%p29_p0, %s28_s28), 0  ;;  %s2151_s29 = smov (!%p29_p0, %s31_s29), %s1437_s24 }
   0xd   : > { %2119 = sst [smem:[#allocation8_spill]] %s2149_s28  ;;  %p1530_p3 = por %p157_p2, %p156_p1 }
   0xe   : > { %p162_p4 = scmp.ne.s32.totalorder %s1417_s19, %s1413_s18  ;;  %p33_p5 = scmp.ge.s32.totalorder %s2151_s29, 2 }
   0xf   : > { %p163_p6 = scmp.eq.s32.totalorder %s1224_s27, 3  ;;  %p1227_p7 = scmp.ge.s32.totalorder %s1441_s25, 1 }
  0x10   : > { %p223_p8 = scmp.lt.s32.totalorder %s1441_s25, 5  ;;  %s2153_s29 = smov (%p33_p5, %s2151_s29), 0 }
  0x11   : > { %2121 = sst [smem:[#allocation9_spill]] %s2153_s29  ;;  %p1540_p9 = por %p163_p6, %p162_p4 }
  0x12   : > { %p224_p10 = pnand %p1227_p7, %p223_p8  ;;  %s143_s7 = ssub.s32 %s1437_s24, %s2153_s29 }
  0x13   : > { %s146_s8 = sadd.s32 1, %s1421_s20  ;;  %p144_p11 = scmp.eq.s32.totalorder %s143_s7, 0 }
  0x14   : > { %227 = sbr.rel (%p224_p10) target bundleno = 829 (0x33d), region = 28  ;;  %s2109_s10 = sand.u32 (!%p224_p10), 1, %s1417_s19  }
  0x15   : > { %s1548_s9 = scalar_select %p144_p11, %s1421_s20, %s146_s8  }
  0x16   : > { %p275_p12 = scmp.lt.s32.totalorder (!%p224_p10), %s1429_s22, 1  ;;  %s1228_s11 = sshll.u32 (!%p224_p10), %s2109_s10, 3 }
  0x17   : > { %2123 = sst [smem:[#allocation10_spill]] %s1548_s9  ;;  %s1230_s12 = sshll.u32 (!%p224_p10), %s1425_s21, 3 }
  0x18   : > { %p280_p13 = scmp.lt.s32.totalorder (!%p224_p10), %s1230_s12, 15  ;;  %s2124_s0 = sld [smem:[#allocation11_spill]] (!%p224_p10) }
  0x19   : > { %s276_s13 = scalar_select %p275_p12, %s1429_s22, 1 }
  0x1a   : > { %s2155_s12 = smov (!%p280_p13, %s1230_s12), 15  ;;  %s1579_s7 = scalar_lea.vmem [#allocation2], %s1228_s11 }
  0x1b   : > { %s1229_s14 = sshll.u32 %s276_s13, 3  ;;  %s1233_s15 = sshll.u32 %s276_s13, 4 }
  0x1c   : > { %s1231_s27 = sshll.u32 %s2155_s12, 2  ;;  %s1564_s28 = sadd.s32 %s1233_s15, %s2155_s12 }
  0x1d   : > { %s1562_s29 = scalar_lea.vmem %s2103_s1, %s1231_s27  ;;  %s292_s23 = scalar_lea.vmem %s2104_s2, %s1564_s28 }
  0x1e   : > { %s278_s26 = scalar_lea.vmem %s2124_s0, %s1229_s14  ;;  %s301_s20 = scalar_lea.vmem %s2105_s3, %s1564_s28 }
  0x1f   : > { %s1577_s0 = scalar_lea.vmem %s2107_s5, %s1229_s14  ;;  %p1237_p0 = scmp.ne.s32.totalorder %s1425_s21, 0 }
  0x21   : > { %310 = sbr.rel (%p1237_p0) target bundleno = 41 (0x29), region = 32 }
  0x26   : > { %vm311_vm0 = vcmask 7168   ;;  %v1443_v0 = vmov -1.0   ;;  %v1444_v1 = vmov 0  }
  0x27   : > { %312 = vst.msk [vmem:[%s1579_s7] sm:$0xff] %vm311_vm0, %v1443_v0 }
  0x28   : > { %313 = vst.msk [vmem:[%s1577_s0] sm:$0xff] %vm311_vm0, %v1444_v1 }
  0x29 PF: > { %v314_v2 = vld [vmem:[%s278_s26] sm:$0xff]  ;;  %s1445_s24 = smov 2   ;;  %v1446_v3 = vmov 2   ;;  %v1447_v4 = vmov 0   ;;  %s1448_s9 = smov 127   ;;  %v1449_v7 = vmov 3  }
  0x2a   : > { %508 = vrot.lane.b32.xlu0 %v314_v2, %s1445_s24  ;;  %1326 = vset.pattern.permute.xlu1 %v1446_v3  ;;  %v1450_v8 = vmov 1   ;;  %v1585_v11 = vld [vmem:[%s1562_s29] sm:$0xff]  ;;  %v1588_v12 = vld [vmem:[%s1562_s29 + $0x8] sm:$0xff]  ;;  %v1591_v13 = vld [vmem:[%s1562_s29 + $0x10] sm:$0xff]  ;;  %s1242_s12 = sshll.u32 %s1425_s21, 10  ;;  %s1047_s15 = sshll.u32 %s1579_s7, 4  ;;  %s1048_s15 = int_to_ptr.vmem [resolvable:$true] %s1047_s15 }
  0x2b   : > { %1330 = vset.pattern.permute.xlu0 %v1446_v3  ;;  %321 = vperm.xlu1 %1326, %v314_v2   ;;  %v1594_v14 = vld [vmem:[%s1562_s29 + $0x18] sm:$0xff]  ;;  %v328_v15 = vperm.slane %v1585_v11, 2  ;;  %v329_v16 = vperm.slane %v1585_v11, 6  ;;  %v330_v17 = vperm.slane %v1588_v12, 2  ;;  %v416_v18 = vperm.slane %v1585_v11, 3  ;;  %s2139_s27 = sand.u32 1, %s1417_s19  }
  0x2c   : > { %1328 = vset.pattern.permute.xlu2 %v1449_v7  ;;  %v417_v19 = vperm.slane %v1585_v11, 7  ;;  %v418_v20 = vperm.slane %v1588_v12, 3  ;;  %v331_v21 = vperm.slane %v1588_v12, 6  ;;  %v419_v22 = vperm.slane %v1588_v12, 7  ;;  %s1023_s8 = scalar_lea.sflag [#allocation3], %s2139_s27  ;;  %s1367_s24 = scalar_lea.hbm %s2106_s4, 16 }
  0x2d   : > { %413 = vperm.xlu2 %1328, %v314_v2   ;;  %v420_v23 = vperm.slane %v1591_v13, 3  ;;  %v332_v24 = vperm.slane %v1591_v13, 2  ;;  %v333_v25 = vperm.slane %v1591_v13, 6  ;;  %v421_v26 = vperm.slane %v1591_v13, 7 }
  0x2e   : > { %v422_v27 = vperm.slane %v1594_v14, 3  ;;  %v334_v28 = vperm.slane %v1594_v14, 2  ;;  %v335_v29 = vperm.slane %v1594_v14, 6  ;;  %v423_v30 = vperm.slane %v1594_v14, 7 }
  0x2f   : > { %v1612_v31 = vperm.slane %v328_v15, 2  ;;  %v1614_v32 = vperm.slane %v329_v16, 2  ;;  %v1616_v33 = vperm.slane %v330_v17, 2  ;;  %v1620_v35 = vperm.slane %v416_v18, 3 }
  0x30   : > { %v1622_v36 = vperm.slane %v417_v19, 3  ;;  %v1624_v37 = vperm.slane %v418_v20, 3  ;;  %v1626_v38 = vperm.slane %v331_v21, 2  ;;  %v1628_v39 = vperm.slane %v419_v22, 3 }
  0x31   : > { %v1630_v40 = vperm.slane %v420_v23, 3  ;;  %v1632_v41 = vperm.slane %v332_v24, 2  ;;  %v1634_v42 = vperm.slane %v333_v25, 2  ;;  %v1636_v43 = vperm.slane %v421_v26, 3 }
  0x32   : > { %v1638_v44 = vperm.slane %v422_v27, 3  ;;  %v1640_v45 = vperm.slane %v334_v28, 2  ;;  %v1642_v46 = vperm.slane %v335_v29, 2  ;;  %v1644_v47 = vperm.slane %v423_v30, 3 }
  0x33   : > { %1327 = vset.pattern.permute.xlu1 %v1447_v4  ;;  %v364_v52 = vperm.slane %v1585_v11, 0  ;;  %v365_v53 = vperm.slane %v1585_v11, 4  ;;  %v366_v54 = vperm.slane %v1588_v12, 0  ;;  %v367_v57 = vperm.slane %v1588_v12, 4 }
  0x34   : > { %361 = vperm.xlu1 %1327, %v314_v2   ;;  %v368_v58 = vperm.slane %v1591_v13, 0  ;;  %v452_v61 = vperm.slane %v1585_v11, 1  ;;  %v453_v62 = vperm.slane %v1585_v11, 5  ;;  %v454_v63 = vperm.slane %v1588_v12, 1 }
  0x35   : > { %1329 = vset.pattern.permute.xlu2 %v1450_v8  ;;  %v455_v0 = vperm.slane %v1588_v12, 5  ;;  %v369_v1 = vperm.slane %v1591_v13, 4  ;;  %v371_v4 = vperm.slane %v1594_v14, 4  ;;  %v382_v7 = vperm.slane %v366_v54, 0 }
  0x36   : > { %449 = vperm.xlu2 %1329, %v314_v2   ;;  %v456_v8 = vperm.slane %v1591_v13, 1  ;;  %v384_v15 = vperm.slane %v368_v58, 0  ;;  %v458_v17 = vperm.slane %v1594_v14, 1  ;;  %v459_v18 = vperm.slane %v1594_v14, 5 }
  0x37   : > { %v517_v19 = vrot.slane %v1585_v11, 6  ;;  %v518_v20 = vrot.slane %v1588_v12, 6  ;;  %v385_v21 = vperm.slane %v369_v1, 0  ;;  %v519_v23 = vrot.slane %v1591_v13, 6 }
  0x38   : > { %v520_v24 = vrot.slane %v1594_v14, 6  ;;  %v387_v25 = vperm.slane %v371_v4, 0  ;;  %v1684_v29 = vperm.slane %v452_v61, 1  ;;  %v469_v30 = vperm.slane %v453_v62, 1 }
  0x39   : > { %v472_v61 = vperm.slane %v456_v8, 1 }
  0x87   : > { %v1673_v3 = vpop.permute.xlu2 %413 }
  0x90   : > { %v450_v1 = vpop.permute.xlu2 %449 }
  0x9c   : > { %v509_v5 = vpop.permute.xlu0 %508 }
  0x9d   : > { %v511_v6 = vsub.f32 %v314_v2, %v509_v5  ;;  %v1618_v34 = vpop.permute.xlu1 %321  ;;  %v370_v2 = vperm.slane %v1594_v14, 0  ;;  %v380_v5 = vperm.slane %v364_v52, 0  ;;  %v528_v52 = vsub.f32 %v1594_v14, %v520_v24 }
  0x9e   : > { %v352_v48 = vmin.f32 %v1618_v34, %v1612_v31  ;;  %v353_v49 = vmin.f32 %v1618_v34, %v1614_v32  ;;  %v354_v50 = vmin.f32 %v1618_v34, %v1616_v33  ;;  %v355_v51 = vmin.f32 %v1618_v34, %v1626_v38 }
  0x9f   : > { %513 = vrot.lane.b32.xlu0 %v511_v6, %s1448_s9  ;;  %v356_v55 = vmin.f32 %v1618_v34, %v1632_v41  ;;  %v357_v56 = vmin.f32 %v1618_v34, %v1634_v42  ;;  %v358_v59 = vmin.f32 %v1618_v34, %v1640_v45  ;;  %v359_v60 = vmin.f32 %v1618_v34, %v1642_v46 }
  0xa0   : > { %v386_v22 = vperm.slane %v370_v2, 0  ;;  %v470_v33 = vperm.slane %v454_v63, 1  ;;  %v471_v34 = vperm.slane %v455_v0, 1  ;;  %v525_v38 = vsub.f32 %v1585_v11, %v517_v19 }
  0xa1   : > { %v526_v41 = vsub.f32 %v1588_v12, %v518_v20  ;;  %v527_v46 = vsub.f32 %v1591_v13, %v519_v23  ;;  %v474_v12 = vperm.slane %v458_v17, 1  ;;  %v475_v0 = vperm.slane %v459_v18, 1 }
  0xa2   : > { %v1238_v2 = vrot.slane %v525_v38, 9  ;;  %v443_v19 = vmin.f32 %v1673_v3, %v1628_v39  ;;  %v444_v20 = vmin.f32 %v1673_v3, %v1630_v40  ;;  %v480_v23 = vmax.f32 %v450_v1, %v472_v61 }
  0xa3   : > { %v476_v39 = vmax.f32 %v450_v1, %v1684_v29 }
  0xa6   : > { %v362_v16 = vpop.permute.xlu1 %361 }
  0xa7   : > { %v388_v26 = vmax.f32 %v362_v16, %v380_v5  ;;  %v390_v28 = vmax.f32 %v362_v16, %v382_v7  ;;  %v392_v32 = vmax.f32 %v362_v16, %v384_v15  ;;  %v393_v42 = vmax.f32 %v362_v16, %v385_v21 }
  0xa8   : > { %v394_v45 = vmax.f32 %v362_v16, %v386_v22  ;;  %v477_v7 = vmax.f32 %v450_v1, %v469_v30  ;;  %v479_v21 = vmax.f32 %v450_v1, %v471_v34  ;;  %v446_v22 = vmin.f32 %v1673_v3, %v1638_v44 }
  0xa9   : > { %v1690_v54 = vsub.f32 %v352_v48, %v388_v26  ;;  %v1694_v58 = vsub.f32 %v354_v50, %v390_v28  ;;  %v1698_v11 = vsub.f32 %v356_v55, %v392_v32  ;;  %v1700_v4 = vsub.f32 %v357_v56, %v393_v42 }
  0xaa   : > { %v1702_v14 = vsub.f32 %v358_v59, %v394_v45  ;;  %v1240_v48 = vrot.slane %v527_v46, 9  ;;  %v442_v59 = vmin.f32 %v1673_v3, %v1624_v37  ;;  %v445_v37 = vmin.f32 %v1673_v3, %v1636_v43 }
  0xab   : > { %v404_v50 = vmax.f32 %v1690_v54, 0.0  ;;  %v406_v55 = vmax.f32 %v1694_v58, 0.0  ;;  %v408_v56 = vmax.f32 %v1698_v11, 0.0  ;;  %v409_v15 = vmax.f32 %v1700_v4, 0.0 }
  0xac   : > { %v547_v17 = vmul.f32 %v1240_v48, %v527_v46  ;;  %v487_v32 = vsub.f32 %v443_v19, %v479_v21  ;;  %v483_v34 = vmax.f32 %v450_v1, %v475_v0 }
  0xae   : > { %v562_v40 = vperm.slane %v547_v17, 2  ;;  %v563_v43 = vperm.slane %v547_v17, 6  ;;  %v495_v29 = vmax.f32 %v487_v32, 0.0 }
 0x111   : > { %v514_v9 = vpop.permute.xlu0 %513 }
 0x112   : > { %v516_v10 = vmul.f32 %v514_v9, %v511_v6  ;;  %v381_v6 = vperm.slane %v365_v53, 0  ;;  %v457_v9 = vperm.slane %v1591_v13, 5  ;;  %v395_v53 = vmax.f32 %v362_v16, %v387_v25 }
 0x113   : > { %v1239_v13 = vrot.slane %v526_v41, 9 }
 0x114   : > { %551 = vperm.xlu0 %1330, %v516_v10   ;;  %v383_v10 = vperm.slane %v367_v57, 0  ;;  %v389_v27 = vmax.f32 %v362_v16, %v381_v6  ;;  %v473_v62 = vperm.slane %v457_v9, 1  ;;  %v1704_v5 = vsub.f32 %v359_v60, %v395_v53 }
 0x115   : > { %v441_v6 = vmin.f32 %v1673_v3, %v1622_v36  ;;  %v478_v9 = vmax.f32 %v450_v1, %v470_v33  ;;  %v545_v60 = vmul.f32 %v1238_v2, %v525_v38  ;;  %v440_v36 = vmin.f32 %v1673_v3, %v1620_v35 }
 0x116   : > { %v391_v31 = vmax.f32 %v362_v16, %v383_v10  ;;  %v1692_v57 = vsub.f32 %v353_v49, %v389_v27  ;;  %v1241_v49 = vrot.slane %v528_v52, 9  ;;  %v546_v10 = vmul.f32 %v1239_v13, %v526_v41 }
 0x117   : > { %v410_v16 = vmax.f32 %v1702_v14, 0.0  ;;  %v485_v24 = vsub.f32 %v441_v6, %v477_v7  ;;  %v486_v25 = vsub.f32 %v442_v59, %v478_v9  ;;  %v559_v26 = vperm.slane %v545_v60, 6 }
 0x118   : > { %v1696_v63 = vsub.f32 %v355_v51, %v391_v31  ;;  %v405_v51 = vmax.f32 %v1692_v57, 0.0  ;;  %v548_v18 = vmul.f32 %v1241_v49, %v528_v52  ;;  %v560_v27 = vperm.slane %v546_v10, 2 }
 0x119   : > { %v561_v28 = vperm.slane %v546_v10, 6  ;;  %v447_v35 = vmin.f32 %v1673_v3, %v1644_v47  ;;  %v481_v30 = vmax.f32 %v450_v1, %v473_v62  ;;  %v482_v31 = vmax.f32 %v450_v1, %v474_v12 }
 0x11a   : > { %v407_v8 = vmax.f32 %v1696_v63, 0.0  ;;  %v558_v33 = vperm.slane %v545_v60, 2  ;;  %v488_v38 = vsub.f32 %v444_v20, %v480_v23  ;;  %v493_v44 = vmax.f32 %v485_v24, 0.0 }
 0x11b   : > { %v564_v41 = vperm.slane %v548_v18, 2  ;;  %v494_v42 = vmax.f32 %v486_v25, 0.0  ;;  %v575_v45 = vperm.slane %v559_v26, 2  ;;  %v576_v46 = vperm.slane %v560_v27, 2 }
 0x11c   : > { %v577_v52 = vperm.slane %v561_v28, 2  ;;  %v484_v53 = vsub.f32 %v440_v36, %v476_v39  ;;  %v489_v57 = vsub.f32 %v445_v37, %v481_v30  ;;  %v565_v58 = vperm.slane %v548_v18, 6 }
 0x11d   : > { %v578_v47 = vperm.slane %v562_v40, 2  ;;  %v490_v3 = vsub.f32 %v446_v22, %v482_v31  ;;  %v574_v61 = vperm.slane %v558_v33, 2  ;;  %v579_v62 = vperm.slane %v563_v43, 2 }
 0x11e   : > { %v491_v63 = vsub.f32 %v447_v35, %v483_v34  ;;  %v496_v12 = vmax.f32 %v488_v38, 0.0  ;;  %v580_v2 = vperm.slane %v564_v41, 2  ;;  %v501_v0 = vmul.f32 %v493_v44, %v405_v51 }
 0x11f   : > { %v502_v6 = vmul.f32 %v494_v42, %v406_v55  ;;  %v492_v7 = vmax.f32 %v484_v53, 0.0  ;;  %v497_v59 = vmax.f32 %v489_v57, 0.0  ;;  %v581_v9 = vperm.slane %v565_v58, 2 }
 0x120   : > { %v498_v10 = vmax.f32 %v490_v3, 0.0  ;;  %v503_v17 = vmul.f32 %v495_v29, %v407_v8  ;;  %v499_v19 = vmax.f32 %v491_v63, 0.0  ;;  %v411_v20 = vmax.f32 %v1704_v5, 0.0 }
 0x121   : > { %v504_v37 = vmul.f32 %v496_v12, %v408_v56  ;;  %v505_v55 = vmul.f32 %v497_v59, %v409_v15  ;;  %v1737_v8 = vmul.f32 %v492_v7, %v404_v50 }
 0x122   : > { %v1741_v5 = vmul.f32 %v498_v10, %v410_v16  ;;  %v1743_v11 = vmul.f32 %v499_v19, %v411_v20 }
 0x186   : > { %v552_v13 = vpop.permute.xlu0 %551 }
 0x187   : > { %v583_v1 = vadd.f32 %v575_v45, %v552_v13  ;;  %v584_v48 = vadd.f32 %v576_v46, %v552_v13  ;;  %v585_v49 = vadd.f32 %v577_v52, %v552_v13  ;;  %v586_v60 = vadd.f32 %v578_v47, %v552_v13 }
 0x188   : > { %v587_v21 = vadd.f32 %v579_v62, %v552_v13  ;;  %v582_v51 = vadd.f32 %v574_v61, %v552_v13  ;;  %v588_v22 = vadd.f32 %v580_v2, %v552_v13  ;;  %v589_v24 = vadd.f32 %v581_v9, %v552_v13 }
 0x189   : > { %v591_v18 = vsub.f32 %v583_v1, %v501_v0  ;;  %v592_v36 = vsub.f32 %v584_v48, %v502_v6  ;;  %v593_v23 = vsub.f32 %v585_v49, %v503_v17  ;;  %v594_v25 = vsub.f32 %v586_v60, %v504_v37 }
 0x18a   : > { %v595_v56 = vsub.f32 %v587_v21, %v505_v55  ;;  %v1746_v26 = vsub.f32 %v582_v51, %v1737_v8  ;;  %v1749_v4 = vsub.f32 %v588_v22, %v1741_v5  ;;  %v1755_v54 = vsub.f32 %v589_v24, %v1743_v11 }
 0x18b   : > { %vm599_vm1 = vcmp.gt.f32.partialorder %v591_v18, 0.0  ;;  %vm600_vm2 = vcmp.gt.f32.partialorder %v592_v36, 0.0  ;;  %vm601_vm3 = vcmp.gt.f32.partialorder %v593_v23, 0.0  ;;  %vm602_vm4 = vcmp.gt.f32.partialorder %v594_v25, 0.0 }
 0x18c   : > { %v1752_v15 = vsel %vm599_vm1, %v591_v18, 1.0  ;;  %v1758_v14 = vsel %vm600_vm2, %v592_v36, 1.0  ;;  %vm603_vm5 = vcmp.gt.f32.partialorder %v595_v56, 0.0  ;;  %v1760_v50 = vsel %vm601_vm3, %v593_v23, 1.0 }
 0x18d   : > { %1331 = vrcp.f32 %v1752_v15  ;;  %vm2113_vm6 = vcmp.gt.f32.partialorder %v1746_v26, 0.0  ;;  %vm604_vm7 = vcmp.gt.f32.partialorder %v1749_v4, 0.0  ;;  %v1766_v16 = vsel %vm602_vm4, %v594_v25, 1.0 }
 0x18e   : > { %1333 = vrcp.f32 %v1758_v14  ;;  %vm2114_vm8 = vcmp.gt.f32.partialorder %v1755_v54, 0.0  ;;  %v1771_v27 = vsel %vm599_vm1, %v501_v0, 0.0  ;;  %v1774_v28 = vsel %vm600_vm2, %v502_v6, 0.0 }
 0x18f   : > { %v1776_v35 = vsel %vm601_vm3, %v503_v17, 0.0  ;;  %v1779_v39 = vsel %vm603_vm5, %v595_v56, 1.0  ;;  %v646_v30 = vand.u32 2147483647, %v1752_v15  ;;  %v648_v40 = vand.u32 2147483648, %v1752_v15 }
 0x190   : > { %1335 = vrcp.f32 %v1760_v50  ;;  %v1785_v31 = vsel %vm602_vm4, %v504_v37, 0.0  ;;  %v661_v32 = vand.u32 2147483647, %v1758_v14  ;;  %v663_v33 = vand.u32 2147483648, %v1758_v14 }
 0x191   : > { %1337 = vrcp.f32 %v1766_v16  ;;  %v1791_v43 = vsel %vm603_vm5, %v505_v55, 0.0  ;;  %v1796_v34 = vsel %vm2113_vm6, %v1746_v26, 1.0  ;;  %v1801_v38 = vsel %vm604_vm7, %v1749_v4, 1.0 }
 0x192   : > { %v1806_v44 = vsel %vm2114_vm8, %v1755_v54, 1.0  ;;  %vm642_vm9 = vweird.f32 %v1752_v15  ;;  %v676_v42 = vand.u32 2147483647, %v1760_v50  ;;  %v678_v45 = vand.u32 2147483648, %v1760_v50 }
 0x193   : > { %v1332_v41 = vpop.eup %1331  ;;  %1339 = vrcp.f32 %v1779_v39  ;;  %vm1813_vm10 = vcmp.eq.f32.partialorder %v646_v30, 8.507059e+37  ;;  %v649_v57 = vor.u32 1.1754944e-38, %v648_v40  ;;  %vm657_vm11 = vweird.f32 %v1758_v14 }
 0x194   : > { %v1334_v46 = vpop.eup %1333  ;;  %v638_v52 = vmul.f32 %v1332_v41, %v1752_v15  ;;  %vm1819_vm12 = vcmp.eq.f32.partialorder %v661_v32, 8.507059e+37  ;;  %v664_v3 = vor.u32 1.1754944e-38, %v663_v33  ;;  %vm672_vm13 = vweird.f32 %v1760_v50 }
 0x195   : > { %v653_v58 = vmul.f32 %v1334_v46, %v1758_v14  ;;  %v691_v29 = vand.u32 2147483647, %v1766_v16  ;;  %vm687_vm14 = vweird.f32 %v1766_v16  ;;  %v693_v63 = vand.u32 2147483648, %v1766_v16 }
 0x196   : > { %v1336_v61 = vpop.eup %1335  ;;  %v639_v62 = vsub.f32 1.0, %v638_v52  ;;  %1341 = vrcp.f32 %v1801_v38  ;;  %vm1829_vm15 = vcmp.eq.f32.partialorder %v676_v42, 8.507059e+37  ;;  %v679_v1 = vor.u32 1.1754944e-38, %v678_v45 }
 0x197   : > { %v1338_v12 = vpop.eup %1337  ;;  %v654_v2 = vsub.f32 1.0, %v653_v58  ;;  %v668_v13 = vmul.f32 %v1336_v61, %v1760_v50  ;;  %vm643_vm0 = vweird.f32 %v1332_v41  ;;  %vm702_vm1 = vweird.f32 %v1779_v39 }
 0x198   : > { %v640_v48 = vmul.f32 %v1332_v41, %v639_v62  ;;  %v683_v49 = vmul.f32 %v1338_v12, %v1766_v16  ;;  %vm658_vm2 = vweird.f32 %v1334_v46  ;;  %vm1835_vm3 = vcmp.eq.f32.partialorder %v691_v29, 8.507059e+37  ;;  %vm644_vm4 = vmor %vm642_vm9, %vm643_vm0 }
 0x199   : > { %v1340_v6 = vpop.eup %1339  ;;  %v655_v7 = vmul.f32 %v1334_v46, %v654_v2  ;;  %v669_v59 = vsub.f32 1.0, %v668_v13  ;;  %v694_v17 = vor.u32 1.1754944e-38, %v693_v63  ;;  %vm673_vm5 = vweird.f32 %v1336_v61  ;;  %vm659_vm6 = vmor %vm657_vm11, %vm658_vm2 }
 0x19a   : > { %v641_v60 = vadd.f32 %v1332_v41, %v640_v48  ;;  %v684_v10 = vsub.f32 1.0, %v683_v49  ;;  %v698_v18 = vmul.f32 %v1340_v6, %v1779_v39  ;;  %v706_v20 = vand.u32 2147483647, %v1779_v39  ;;  %vm674_vm9 = vmor %vm672_vm13, %vm673_vm5 }
 0x19b   : > { %v656_v36 = vadd.f32 %v1334_v46, %v655_v7  ;;  %v670_v19 = vmul.f32 %v1336_v61, %v669_v59  ;;  %vm688_vm8 = vweird.f32 %v1338_v12  ;;  %v708_v25 = vand.u32 2147483648, %v1779_v39 }
 0x19c   : > { %v1342_v21 = vpop.eup %1341  ;;  %v645_v37 = vsel %vm644_vm4, %v1332_v41, %v641_v60  ;;  %v685_v51 = vmul.f32 %v1338_v12, %v684_v10  ;;  %v699_v22 = vsub.f32 1.0, %v698_v18  ;;  %vm703_vm0 = vweird.f32 %v1340_v6 }
 0x19d   : > { %v650_v23 = vsel %vm1813_vm10, %v649_v57, %v645_v37  ;;  %v660_v24 = vsel %vm659_vm6, %v1334_v46, %v656_v36  ;;  %v671_v55 = vadd.f32 %v1336_v61, %v670_v19  ;;  %vm689_vm10 = vmor %vm687_vm14, %vm688_vm8  ;;  %vm707_vm6 = vcmp.eq.f32.partialorder %v706_v20, 8.507059e+37 }
 0x19e   : > { %v665_v56 = vsel %vm1819_vm12, %v664_v3, %v660_v24  ;;  %v686_v15 = vadd.f32 %v1338_v12, %v685_v51  ;;  %v700_v30 = vmul.f32 %v1340_v6, %v699_v22  ;;  %v1853_v14 = vmul.f32 %v650_v23, %v1771_v27  ;;  %vm704_vm8 = vmor %vm702_vm1, %vm703_vm0 }
 0x19f   : > { %v675_v40 = vsel %vm674_vm9, %v1336_v61, %v671_v55  ;;  %v713_v32 = vmul.f32 %v1342_v21, %v1801_v38  ;;  %v1859_v33 = vmul.f32 %v665_v56, %v1774_v28  ;;  %v709_v16 = vor.u32 1.1754944e-38, %v708_v25 }
 0x1a0   : > { %v680_v50 = vsel %vm1829_vm15, %v679_v1, %v675_v40  ;;  %v690_v41 = vsel %vm689_vm10, %v1338_v12, %v686_v15  ;;  %v701_v42 = vadd.f32 %v1340_v6, %v700_v30  ;;  %v723_v53 = vand.u32 2147483648, %v1801_v38 }
 0x1a1   : > { %v1864_v45 = vmul.f32 %v680_v50, %v1776_v35  ;;  %v695_v27 = vsel %vm1835_vm3, %v694_v17, %v690_v41  ;;  %v714_v46 = vsub.f32 1.0, %v713_v32  ;;  %1343 = vrcp.f32 %v1806_v44 }
 0x1a2   : > { %v1871_v52 = vmul.f32 %v695_v27, %v1785_v31  ;;  %v705_v28 = vsel %vm704_vm8, %v1340_v6, %v701_v42  ;;  %vm718_vm11 = vweird.f32 %v1342_v21  ;;  %v721_v35 = vand.u32 2147483647, %v1801_v38 }
 0x1a3   : > { %v710_v57 = vsel %vm707_vm6, %v709_v16, %v705_v28  ;;  %v715_v58 = vmul.f32 %v1342_v21, %v714_v46  ;;  %1345 = vrcp.f32 %v1796_v34  ;;  %v748_v47 = vrot.slane %v1853_v14, 4 }
 0x1a4   : > { %v1878_v39 = vmul.f32 %v710_v57, %v1791_v43  ;;  %v754_v31 = vrot.slane %v1859_v33, 4  ;;  %vm717_vm12 = vweird.f32 %v1801_v38  ;;  %v760_v29 = vrot.slane %v1864_v45, 4 }
 0x1a5   : > { %v716_v3 = vadd.f32 %v1342_v21, %v715_v58  ;;  %v766_v61 = vrot.slane %v1871_v52, 4  ;;  %vm719_vm13 = vmor %vm717_vm12, %vm718_vm11  ;;  %v724_v62 = vor.u32 1.1754944e-38, %v723_v53  ;;  %v749_v63 = vmax.f32 %v1853_v14, %v748_v47 }
 0x1a6   : > { %v755_v12 = vmax.f32 %v1859_v33, %v754_v31  ;;  %v772_v43 = vrot.slane %v1878_v39, 4  ;;  %vm722_vm14 = vcmp.eq.f32.partialorder %v721_v35, 8.507059e+37  ;;  %v761_v13 = vmax.f32 %v1864_v45, %v760_v29 }
 0x1a7   : > { %v720_v2 = vsel %vm719_vm13, %v1342_v21, %v716_v3  ;;  %v767_v0 = vmax.f32 %v1871_v52, %v766_v61  ;;  %v1344_v1 = vpop.eup %1343  ;;  %v612_v38 = vsel %vm604_vm7, %v1741_v5, 0.0  ;;  %v750_v49 = vrot.slane %v749_v63, 2 }
 0x1a8   : > { %v725_v48 = vsel %vm722_vm14, %v724_v62, %v720_v2  ;;  %v773_v6 = vmax.f32 %v1878_v39, %v772_v43  ;;  %v728_v59 = vmul.f32 %v1344_v1, %v1806_v44  ;;  %v756_v9 = vrot.slane %v755_v12, 2 }
 0x1a9   : > { %v1894_v7 = vmul.f32 %v725_v48, %v612_v38  ;;  %v1897_v60 = vpop.eup %1345  ;;  %v768_v10 = vrot.slane %v767_v0, 2  ;;  %v751_v36 = vmax.f32 %v749_v63, %v750_v49  ;;  %v762_v19 = vrot.slane %v761_v13, 2 }
 0x1aa   : > { %v774_v17 = vrot.slane %v773_v6, 2  ;;  %v729_v18 = vsub.f32 1.0, %v728_v59  ;;  %vm733_vm15 = vweird.f32 %v1344_v1  ;;  %v736_v5 = vand.u32 2147483647, %v1806_v44 }
 0x1ab   : > { %v778_v20 = vrot.slane %v1894_v7, 4  ;;  %v738_v4 = vand.u32 2147483648, %v1806_v44  ;;  %v769_v21 = vmax.f32 %v767_v0, %v768_v10  ;;  %v757_v51 = vmax.f32 %v755_v12, %v756_v9 }
 0x1ac   : > { %v730_v37 = vmul.f32 %v1344_v1, %v729_v18  ;;  %v775_v22 = vmax.f32 %v773_v6, %v774_v17  ;;  %vm732_vm7 = vweird.f32 %v1806_v44  ;;  %v752_v55 = vrot.slane %v751_v36, 1 }
 0x1ad   : > { %v779_v23 = vmax.f32 %v1894_v7, %v778_v20  ;;  %v763_v25 = vmax.f32 %v761_v13, %v762_v19  ;;  %v623_v15 = vmul.f32 %v1897_v60, %v1796_v34  ;;  %vm734_vm1 = vmor %vm732_vm7, %vm733_vm15  ;;  %vm737_vm2 = vcmp.eq.f32.partialorder %v736_v5, 8.507059e+37 }
 0x1ae   : > { %v731_v24 = vadd.f32 %v1344_v1, %v730_v37  ;;  %v739_v30 = vor.u32 1.1754944e-38, %v738_v4  ;;  %v770_v40 = vrot.slane %v769_v21, 1  ;;  %v758_v50 = vrot.slane %v757_v51, 1 }
 0x1af   : > { %v780_v56 = vrot.slane %v779_v23, 2  ;;  %v776_v41 = vrot.slane %v775_v22, 1  ;;  %vm2133_vm3 = vcmp.gt.f32.partialorder %v1755_v54, 0.0  ;;  %v790_v16 = vlaneseq }
 0x1b0   : > { %v735_v32 = vsel %vm734_vm1, %v1344_v1, %v731_v24  ;;  %v613_v27 = vsel %vm2133_vm3, %v1743_v11, 0.0  ;;  %v1911_v28 = vmax.f32 %v751_v36, %v752_v55  ;;  %v764_v53 = vrot.slane %v763_v25, 1 }
 0x1b1   : > { %v781_v42 = vmax.f32 %v779_v23, %v780_v56  ;;  %v740_v44 = vsel %vm737_vm2, %v739_v30, %v735_v32  ;;  %v1913_v58 = vmax.f32 %v769_v21, %v770_v40  ;;  %v624_v35 = vsub.f32 1.0, %v623_v15 }
 0x1b2   : > { %v1909_v46 = vmul.f32 %v740_v44, %v613_v27  ;;  %v1915_v47 = vmax.f32 %v757_v51, %v758_v50  ;;  %v1917_v31 = vmax.f32 %v775_v22, %v776_v41  ;;  %v1923_v11 = vshrl.u32 %v790_v16, 7 }
 0x1b3   : > { %v782_v57 = vrot.slane %v781_v42, 1  ;;  %v1925_v54 = vmax.f32 %v763_v25, %v764_v53  ;;  %vm793_vm4 = vcmp.ge.f32.partialorder %v1853_v14, %v1911_v28  ;;  %vm796_vm5 = vcmp.ge.f32.partialorder %v1871_v52, %v1913_v58 }
 0x1b4   : > { %v784_v3 = vrot.slane %v1909_v46, 4  ;;  %v625_v62 = vmul.f32 %v1897_v60, %v624_v35  ;;  %vm794_vm9 = vcmp.ge.f32.partialorder %v1859_v33, %v1915_v47  ;;  %vm797_vm0 = vcmp.ge.f32.partialorder %v1878_v39, %v1917_v31 }
 0x1b5   : > { %v1920_v29 = vmax.f32 %v781_v42, %v782_v57  ;;  %v801_v12 = vsel %vm793_vm4, %v1923_v11, 8  ;;  %vm795_vm6 = vcmp.ge.f32.partialorder %v1864_v45, %v1925_v54  ;;  %v804_v2 = vsel %vm796_vm5, %v1923_v11, 8 }
 0x1b6   : > { %v785_v61 = vmax.f32 %v1909_v46, %v784_v3  ;;  %vm628_vm8 = vweird.f32 %v1897_v60  ;;  %v802_v13 = vsel %vm794_vm9, %v1923_v11, 8  ;;  %v805_v0 = vsel %vm797_vm0, %v1923_v11, 8 }
 0x1b7   : > { %vm798_vm10 = vcmp.ge.f32.partialorder %v1894_v7, %v1920_v29  ;;  %v626_v1 = vadd.f32 %v1897_v60, %v625_v62  ;;  %v817_v49 = vrot.slane %v801_v12, 4  ;;  %vm627_vm11 = vweird.f32 %v1796_v34 }
 0x1b8   : > { %v786_v63 = vrot.slane %v785_v61, 2  ;;  %v806_v48 = vsel %vm798_vm10, %v1923_v11, 8  ;;  %v633_v6 = vand.u32 2147483648, %v1796_v34  ;;  %v803_v59 = vsel %vm795_vm6, %v1923_v11, 8  ;;  %vm629_vm12 = vmor %vm627_vm11, %vm628_vm8 }
 0x1b9   : > { %v844_v9 = vrot.slane %v804_v2, 4  ;;  %v631_v10 = vand.u32 2147483647, %v1796_v34  ;;  %v826_v18 = vrot.slane %v802_v13, 4  ;;  %v853_v36 = vrot.slane %v805_v0, 4 }
 0x1ba   : > { %v787_v43 = vmax.f32 %v785_v61, %v786_v63  ;;  %v862_v19 = vrot.slane %v806_v48, 4  ;;  %v630_v20 = vsel %vm629_vm12, %v1897_v60, %v626_v1  ;;  %vm818_vm14 = vcmp.lt.s32.totalorder %v801_v12, %v817_v49 }
 0x1bb   : > { %v835_v5 = vrot.slane %v803_v59, 4  ;;  %v634_v4 = vor.u32 1.1754944e-38, %v633_v6  ;;  %vm845_vm15 = vcmp.lt.s32.totalorder %v804_v2, %v844_v9  ;;  %vm632_vm7 = vcmp.eq.f32.partialorder %v631_v10, 8.507059e+37 }
 0x1bc   : > { %v788_v38 = vrot.slane %v787_v43, 1  ;;  %vm827_vm1 = vcmp.lt.s32.totalorder %v802_v13, %v826_v18  ;;  %vm854_vm2 = vcmp.lt.s32.totalorder %v805_v0, %v853_v36  ;;  %v819_v51 = vsel %vm818_vm14, %v801_v12, %v817_v49 }
 0x1bd   : > { %v635_v37 = vsel %vm632_vm7, %v634_v4, %v630_v20  ;;  %vm863_vm3 = vcmp.lt.s32.totalorder %v806_v48, %v862_v19  ;;  %vm836_vm4 = vcmp.lt.s32.totalorder %v803_v59, %v835_v5  ;;  %v846_v22 = vsel %vm845_vm15, %v804_v2, %v844_v9 }
 0x1be   : > { %v1952_v17 = vmax.f32 %v787_v43, %v788_v38  ;;  %vm2134_vm9 = vcmp.gt.f32.partialorder %v1746_v26, 0.0  ;;  %v828_v23 = vsel %vm827_vm1, %v802_v13, %v826_v18  ;;  %v855_v24 = vsel %vm854_vm2, %v805_v0, %v853_v36 }
 0x1bf   : > { %v606_v60 = vsel %vm2134_vm9, %v1737_v8, 0.0  ;;  %v820_v25 = vrot.slane %v819_v51, 2  ;;  %v864_v56 = vsel %vm863_vm3, %v806_v48, %v862_v19  ;;  %v837_v15 = vsel %vm836_vm4, %v803_v59, %v835_v5 }
 0x1c0   : > { %vm799_vm13 = vcmp.ge.f32.partialorder %v1909_v46, %v1952_v17  ;;  %v1963_v55 = vmul.f32 %v635_v37, %v606_v60  ;;  %v847_v30 = vrot.slane %v846_v22, 2  ;;  %v829_v32 = vrot.slane %v828_v23, 2 }
 0x1c1   : > { %v807_v21 = vsel %vm799_vm13, %v1923_v11, 8  ;;  %v856_v50 = vrot.slane %v855_v24, 2  ;;  %v865_v41 = vrot.slane %v864_v56, 2  ;;  %vm821_vm0 = vcmp.lt.s32.totalorder %v819_v51, %v820_v25 }
 0x1c2   : > { %v871_v34 = vrot.slane %v807_v21, 4  ;;  %v838_v42 = vrot.slane %v837_v15, 2  ;;  %v945_v44 = vmax.f32 %v1963_v55, %v1871_v52  ;;  %vm848_vm10 = vcmp.lt.s32.totalorder %v846_v22, %v847_v30 }
 0x1c3   : > { %vm897_vm6 = vcmask 1042434   ;;  %v946_v8 = vmax.f32 %v1853_v14, %v1878_v39  ;;  %v947_v26 = vmax.f32 %v1859_v33, %v1894_v7  ;;  %v948_v53 = vmax.f32 %v1864_v45, %v1909_v46 }
 0x1c4   : > { %vm872_vm5 = vcmp.lt.s32.totalorder %v807_v21, %v871_v34  ;;  %vm1973_vm8 = vcmp.lt.s32.totalorder %v828_v23, %v829_v32  ;;  %vm857_vm11 = vcmp.lt.s32.totalorder %v855_v24, %v856_v50  ;;  %v888_v35 = vrot.slane %v1911_v28, 7 }
 0x1c5   : > { %v873_v40 = vsel %vm872_vm5, %v807_v21, %v871_v34  ;;  %v742_v3 = vrot.slane %v1963_v55, 4  ;;  %v1979_v61 = vsel %vm821_vm0, %v819_v51, %v820_v25  ;;  %vm866_vm12 = vcmp.lt.s32.totalorder %v864_v56, %v865_v41 }
 0x1c6   : > { %v874_v27 = vrot.slane %v873_v40, 2  ;;  %v949_v62 = vmax.f32 %v945_v44, %v946_v8  ;;  %v950_v63 = vmax.f32 %v947_v26, %v948_v53  ;;  %vm1981_vm13 = vcmp.lt.s32.totalorder %v837_v15, %v838_v42 }
 0x1c7   : > { %v849_v43 = vsel %vm848_vm10, %v846_v22, %v847_v30  ;;  %v743_v2 = vmax.f32 %v1963_v55, %v742_v3  ;;  %v858_v13 = vsel %vm857_vm11, %v855_v24, %v856_v50  ;;  %v891_v0 = vrot.slane %v1913_v58, 4 }
 0x1c8   : > { %vm875_vm14 = vcmp.lt.s32.totalorder %v873_v40, %v874_v27  ;;  %v892_v28 = vrot.slane %v1917_v31, 3  ;;  %v951_v1 = vmax.f32 %v949_v62, %v950_v63  ;;  %v867_v38 = vsel %vm866_vm12, %v864_v56, %v865_v41 }
 0x1c9   : > { %v893_v48 = vrot.slane %v1920_v29, 2  ;;  %v894_v49 = vrot.slane %v1952_v17, 1  ;;  %v744_v6 = vrot.slane %v743_v2, 2  ;;  %v831_v59 = vsel %vm1973_vm8, %v828_v23, %v829_v32 }
 0x1ca   : > { %v876_v9 = vsel %vm875_vm14, %v873_v40, %v874_v27  ;;  %vm901_vm15 = vcmask 1044484   ;;  %vm903_vm7 = vcmask 1046534   ;;  %952 = vmax.xlane.f32.xlu1 %v951_v1  ;;  %v840_v10 = vsel %vm1981_vm13, %v837_v15, %v838_v42 }
 0x1cb   : > { %v889_v58 = vrot.slane %v1915_v47, 6  ;;  %v890_v31 = vrot.slane %v1925_v54, 5  ;;  %v745_v18 = vmax.f32 %v743_v2, %v744_v6  ;;  %v850_v36 = vrot.slane %v849_v43, 1 }
 0x1cc   : > { %v859_v29 = vrot.slane %v858_v13, 1  ;;  %v868_v19 = vrot.slane %v867_v38, 1  ;;  %vm905_vm1 = vcmask 1045508   ;;  %v877_v17 = vrot.slane %v876_v9, 1 }
 0x1cd   : > { %v902_v20 = vsel %vm901_vm15, %v891_v0, %v892_v28  ;;  %v904_v5 = vsel %vm903_vm7, %v893_v48, %v894_v49  ;;  %v746_v4 = vrot.slane %v745_v18, 1  ;;  %v823_v21 = vrot.slane %v1979_v61, 1 }
 0x1ce   : > { %v832_v34 = vrot.slane %v831_v59, 1  ;;  %vm895_vm2 = vcmask 1040384   ;;  %v841_v37 = vrot.slane %v840_v10, 1  ;;  %v898_v47 = vsel %vm897_vm6, %v889_v58, %v890_v31 }
 0x1cf   : > { %vm899_vm3 = vcmask 1041408   ;;  %v747_v54 = vmax.f32 %v745_v18, %v746_v4  ;;  %vm851_vm4 = vcmp.lt.s32.totalorder %v849_v43, %v850_v36  ;;  %vm860_vm5 = vcmp.lt.s32.totalorder %v858_v13, %v859_v29 }
 0x1d0   : > { %v906_v51 = vsel %vm905_vm1, %v902_v20, %v904_v5  ;;  %vm907_vm9 = vcmask 1043456   ;;  %vm869_vm0 = vcmp.lt.s32.totalorder %v867_v38, %v868_v19  ;;  %vm878_vm10 = vcmp.lt.s32.totalorder %v876_v9, %v877_v17 }
 0x1d1   : > { %vm792_vm8 = vcmp.ge.f32.partialorder %v1963_v55, %v747_v54  ;;  %v896_v22 = vsel %vm895_vm2, %v747_v54, %v888_v35  ;;  %vm833_vm11 = vcmp.lt.s32.totalorder %v831_v59, %v832_v34  ;;  %vm842_vm12 = vcmp.lt.s32.totalorder %v840_v10, %v841_v37 }
 0x1d2   : > { %v800_v60 = vsel %vm792_vm8, %v1923_v11, 8  ;;  %v900_v23 = vsel %vm899_vm3, %v896_v22, %v898_v47  ;;  %v852_v24 = vsel %vm851_vm4, %v849_v43, %v850_v36  ;;  %v861_v15 = vsel %vm860_vm5, %v858_v13, %v859_v29  ;;  %v998_v47 = vld [vmem:[%s1579_s7] sm:$0xff] }
 0x1d3   : > { %v808_v25 = vrot.slane %v800_v60, 4  ;;  %v908_v56 = vsel %vm907_vm9, %v900_v23, %v906_v51  ;;  %v870_v30 = vsel %vm869_vm0, %v867_v38, %v868_v19  ;;  %v879_v40 = vsel %vm878_vm10, %v876_v9, %v877_v17 }
 0x1d4   : > { %910 = vst [vmem:[%s292_s23] sm:$0xff] %v908_v56  ;;  %vm824_vm13 = vcmp.lt.s32.totalorder %v1979_v61, %v823_v21  ;;  %v834_v32 = vsel %vm833_vm11, %v831_v59, %v832_v34  ;;  %v843_v11 = vsel %vm842_vm12, %v840_v10, %v841_v37  ;;  %v914_v50 = vrot.slane %v852_v24, 4 }
 0x1d5   : > { %vm809_vm14 = vcmp.lt.s32.totalorder %v800_v60, %v808_v25  ;;  %v915_v42 = vrot.slane %v861_v15, 3  ;;  %v916_v27 = vrot.slane %v870_v30, 2  ;;  %v917_v44 = vrot.slane %v879_v40, 1 }
 0x1d6   : > { %v810_v41 = vsel %vm809_vm14, %v800_v60, %v808_v25  ;;  %v825_v26 = vsel %vm824_vm13, %v1979_v61, %v823_v21  ;;  %v912_v53 = vrot.slane %v834_v32, 6  ;;  %v913_v57 = vrot.slane %v843_v11, 5 }
 0x1d7   : > { %v811_v8 = vrot.slane %v810_v41, 2  ;;  %v911_v3 = vrot.slane %v825_v26, 7  ;;  %v921_v62 = vsel %vm901_vm15, %v914_v50, %v915_v42  ;;  %v922_v63 = vsel %vm903_vm7, %v916_v27, %v917_v44 }
 0x1d8   : > { %v919_v43 = vsel %vm897_vm6, %v912_v53, %v913_v57  ;;  %v923_v2 = vsel %vm905_vm1, %v921_v62, %v922_v63  ;;  %v928_v1 = vand.u32 127, %v790_v16  ;;  %v936_v59 = vstv %s1242_s12 }
 0x1d9   : > { %vm812_vm4 = vcmp.lt.s32.totalorder %v810_v41, %v811_v8  ;;  %vm1001_vm6 = vcmask 7168  }
 0x1da   : > { %v813_v35 = vsel %vm812_vm4, %v810_v41, %v811_v8  ;;  %v929_v38 = vadd.s32 128, %v928_v1  ;;  %v930_v48 = vadd.s32 256, %v928_v1  ;;  %v931_v49 = vadd.s32 384, %v928_v1 }
 0x1db   : > { %v814_v12 = vrot.slane %v813_v35, 1  ;;  %v932_v6 = vadd.s32 512, %v928_v1  ;;  %v933_v9 = vadd.s32 640, %v928_v1  ;;  %v934_v10 = vadd.s32 768, %v928_v1 }
 0x1dc   : > { %v935_v58 = vadd.s32 896, %v928_v1  ;;  %v937_v31 = vadd.s32 %v936_v59, %v928_v1  ;;  %v938_v18 = vadd.s32 %v936_v59, %v929_v38  ;;  %v939_v36 = vadd.s32 %v936_v59, %v930_v48 }
 0x1dd   : > { %vm815_vm5 = vcmp.lt.s32.totalorder %v813_v35, %v814_v12  ;;  %v940_v29 = vadd.s32 %v936_v59, %v931_v49  ;;  %v941_v19 = vadd.s32 %v936_v59, %v932_v6  ;;  %v942_v20 = vadd.s32 %v936_v59, %v933_v9 }
 0x1de   : > { %v816_v13 = vsel %vm815_vm5, %v813_v35, %v814_v12  ;;  %v943_v5 = vadd.s32 %v936_v59, %v934_v10  ;;  %v944_v4 = vadd.s32 %v936_v59, %v935_v58 }
 0x1df   : > { %v918_v61 = vsel %vm895_vm2, %v816_v13, %v911_v3 }
 0x1e0   : > { %v920_v0 = vsel %vm899_vm3, %v918_v61, %v919_v43 }
 0x1e1   : > { %v924_v28 = vsel %vm907_vm9, %v920_v0, %v923_v2 }
 0x1e2   : > { %925 = vst [vmem:[%s301_s20] sm:$0xff] %v924_v28  ;;  %s1244_s20 = sshll.u32 %s1429_s22, 3 }
 0x1e3   : > { %s1045_s14 = scalar_lea.hbm %s2106_s4, %s1244_s20 }
 0x1e4   : > { %s1049_s26 = sshll.u32 %s1045_s14, 4  ;;  %s1050_s26 = int_to_ptr.hbm [resolvable:$true] %s1049_s26 }
 0x1e5   : > { %s1361_s13 = sshra.s32 %s1050_s26, 4  ;;  %s1362_s13 = int_to_ptr.hbm [resolvable:$true] %s1361_s13 }
 0x1e6   : > { %s1363_s16 = scalar_lea.hbm %s1362_s13, 8  ;;  %p1368_p5 = scmp.lt.s32.totalorder %s1362_s13, %s2106_s4 }
 0x1e7   : > { %p1364_p1 = scmp.ne.s32.totalorder %s1362_s13, %s1363_s16  ;;  %p1369_p6 = scmp.lt.s32.totalorder %s1367_s24, %s1363_s16 }
 0x1e9   : > { %p1365_p2 = pnand %p1364_p1, %p1530_p3  ;;  %p1370_p7 = por %p1369_p6, %p1368_p5 }
 0x1eb   : > { %p1366_p4 = pneg %p1365_p2 }
 0x1ed   : > { %p1371_p8 = pnand %p1370_p7, %p1366_p4 }
 0x23d   : > { %v2027_v17 = vpop.xlane.xlu1 %952 }
 0x23e   : > { %vm954_vm15 = vcmp.ge.f32.partialorder %v1963_v55, %v2027_v17  ;;  %vm955_vm7 = vcmp.ge.f32.partialorder %v1853_v14, %v2027_v17  ;;  %vm956_vm1 = vcmp.ge.f32.partialorder %v1859_v33, %v2027_v17  ;;  %vm957_vm2 = vcmp.ge.f32.partialorder %v1864_v45, %v2027_v17 }
 0x23f   : > { %vm958_vm3 = vcmp.ge.f32.partialorder %v1871_v52, %v2027_v17  ;;  %vm959_vm9 = vcmp.ge.f32.partialorder %v1878_v39, %v2027_v17  ;;  %vm960_vm0 = vcmp.ge.f32.partialorder %v1894_v7, %v2027_v17  ;;  %vm961_vm10 = vcmp.ge.f32.partialorder %v1909_v46, %v2027_v17 }
 0x240   : > { %v962_v16 = vsel %vm954_vm15, %v937_v31, 1073741824  ;;  %v963_v14 = vsel %vm955_vm7, %v938_v18, 1073741824  ;;  %v964_v55 = vsel %vm956_vm1, %v939_v36, 1073741824  ;;  %v965_v21 = vsel %vm957_vm2, %v940_v29, 1073741824 }
 0x241   : > { %v966_v33 = vsel %vm958_vm3, %v941_v19, 1073741824  ;;  %v967_v34 = vsel %vm959_vm9, %v942_v20, 1073741824  ;;  %v968_v37 = vsel %vm960_vm0, %v943_v5, 1073741824  ;;  %v969_v45 = vsel %vm961_vm10, %v944_v4, 1073741824 }
 0x242   : > { %vm970_vm8 = vcmp.lt.s32.totalorder %v962_v16, %v966_v33  ;;  %vm972_vm11 = vcmp.lt.s32.totalorder %v963_v14, %v967_v34  ;;  %vm974_vm12 = vcmp.lt.s32.totalorder %v964_v55, %v968_v37  ;;  %vm976_vm13 = vcmp.lt.s32.totalorder %v965_v21, %v969_v45 }
 0x243   : > { %v971_v52 = vsel %vm970_vm8, %v962_v16, %v966_v33  ;;  %v973_v39 = vsel %vm972_vm11, %v963_v14, %v967_v34  ;;  %v975_v7 = vsel %vm974_vm12, %v964_v55, %v968_v37  ;;  %v977_v54 = vsel %vm976_vm13, %v965_v21, %v969_v45 }
 0x244   : > { %vm978_vm14 = vcmp.lt.s32.totalorder %v971_v52, %v973_v39  ;;  %vm980_vm4 = vcmp.lt.s32.totalorder %v975_v7, %v977_v54  ;;  %vm999_vm5 = vcmp.gt.f32.partialorder %v2027_v17, %v998_v47 }
 0x245   : > { %v979_v46 = vsel %vm978_vm14, %v971_v52, %v973_v39  ;;  %v981_v51 = vsel %vm980_vm4, %v975_v7, %v977_v54  ;;  %v1000_v22 = vsel %vm999_vm5, %v2027_v17, %v998_v47 }
 0x246   : > { %vm982_vm15 = vcmp.lt.s32.totalorder %v979_v46, %v981_v51  ;;  %1002 = vst.msk [vmem:[%s1579_s7] sm:$0xff] %vm1001_vm6, %v1000_v22 }
 0x247   : > { %v983_v60 = vsel %vm982_vm15, %v979_v46, %v981_v51 }
 0x248   : > { %v985_v23 = vshra.s32 %v983_v60, 16  ;;  %v984_v25 = vand.u32 65535, %v983_v60 }
 0x24a   : > { %v987_v24 = vcvt.s32.f32 %v985_v23  ;;  %v986_v15 = vcvt.s32.f32 %v984_v25 }
 0x24c   : > { %988 = vmin.xlane.f32.xlu2 %v987_v24 }
 0x2bf   : > { %v989_v56 = vpop.xlane.xlu2 %988 }
 0x2c0   : > { %1374 = shalt.err (!%p1371_p8)
}
 0x2c1   : > { %1247 = dma.vmem_to_hbm [thread:$0]  (%p1530_p3), %s1048_s15, 128, %s1050_s26, %s1023_s8   ;;  %vm990_vm7 = vcmp.eq.f32.partialorder %v987_v24, %v989_v56  ;;  %v995_v40 = vcvt.f32.s32 %v989_v56  ;;  %v1003_v41 = vld [vmem:[%s1577_s0] sm:$0xff] }
 0x2c2   : > { %v991_v30 = vsel %vm990_vm7, %v986_v15, inf }
 0x2c3   : > { %992 = vmin.xlane.f32.xlu0 %v991_v30  ;;  %v996_v11 = vshll.u32 %v995_v40, 16 }
 0x336   : > { %v993_v32 = vpop.xlane.xlu0 %992 }
 0x337   : > { %v994_v50 = vcvt.f32.s32 %v993_v32 }
 0x339   : > { %v997_v42 = vadd.s32 %v996_v11, %v994_v50 }
 0x33b   : > { %v1004_v27 = vsel %vm999_vm5, %v997_v42, %v1003_v41 }
 0x33c   : > { %1005 = vst.msk [vmem:[%s1577_s0] sm:$0xff] %vm1001_vm6, %v1004_v27 }
 0x33d PF: > { %p1253_p10 = scmp.ge.s32.totalorder %s1441_s25, 2  ;;  %s1086_s30 = sand.u32 1, %s1413_s18  }
 0x33e   : > { %s1087_s29 = scalar_lea.sflag [#allocation3], %s1086_s30 }
 0x33f   : > { %p1250_p3 = pnand %p1253_p10, %p1540_p9 }
 0x341   : > { %p1251_p11 = pneg %p1250_p3 }
 0x343   : > { %1408 = dma.done.wait (%p1251_p11), %s1087_s29, 128  }
 0x344   : > { %1410 = vsyncadd (%p1251_p11), %s1087_s29, 4294967168  ;;  %s19_s25 = sadd.s32 1, %s1441_s25   ;;  %s2140_s10 = sld [smem:[#allocation5_spill]] }
 0x345   : > { %p16_p12 = scmp.ge.s32.totalorder %s19_s25, 6   ;;  %s2141_s20 = sld [smem:[#allocation10_spill]] }
 0x346   : > { %s2142_s21 = sld [smem:[#allocation6_spill]]  ;;  %s2146_s18 = smov %s1417_s19 }
 0x347   : > { %s2143_s22 = sld [smem:[#allocation7_spill]]  ;;  %18 = sbr.rel (!%p16_p12) target bundleno = 7 (0x7), region = 106 }
 0x348   : > { %s2144_s23 = sld [smem:[#allocation8_spill]] }
 0x349   : > { %s2145_s24 = sld [smem:[#allocation9_spill]] }
 0x34a   : > { %s2147_s19 = smov %s2140_s10 }
 0x34c   :  { %1100 = vsyncpa [#allocation3], 1 }
 0x34d   :  { %1102 = vsyncpa [#allocation3 + $0x1], 1 }

// kernel: _lambda_.3
= control target key start
LH: loop header
LB: loop body
LE: loop exit
PB: predicated region body
PF: predicated region fallthrough
CT: control target
= control target key end

     0   :  { %s1969_s24 = smov 0   ;;  %s1971_s25 = smov 0   ;;  %s3230_s0 = inlined_call_operand.vmem [shape: f32[2,4,2048], index: 0, kind: input, shape index: {}]   ;;  %s3231_s1 = inlined_call_operand.vmem [shape: f32[2,4,2048], index: 1, kind: input, shape index: {}]   ;;  %s3232_s2 = inlined_call_operand.vmem [shape: f32[4,2048], index: 2, kind: input, shape index: {}]   ;;  %s3233_s3 = inlined_call_operand.vmem [shape: f32[2,8,2048], index: 3, kind: input, shape index: {}]   ;;  %s3234_s4 = inlined_call_operand.vmem [shape: s32[2,1,2048], index: 4, kind: input, shape index: {}]   ;;  %s3235_s5 = inlined_call_operand.vmem [shape: f32[2,1,2048], index: 5, kind: input, shape index: {}]   ;;  %s3236_s6 = inlined_call_operand.vmem [shape: f32[2,1,1024], index: 6, kind: output, shape index: {0}]   ;;  %s3237_s7 = inlined_call_operand.vmem [shape: f32[2,1,1024], index: 7, kind: output, shape index: {1}]  }
   0x1   :  { %3251 = sst [smem:[#allocation12_spill]] %s3230_s0  ;;  %s1973_s26 = smov 0  }
   0x2   :  { %3252 = sst [smem:[#allocation13_spill]] %s3232_s2  ;;  %s1975_s27 = smov 0  }
   0x3   :  { %s1977_s28 = smov 0  }
   0x4 LB: > { %s27_s29 = sadd.s32 1, %s1914_s26  ;;  %s30_s30 = sadd.s32 1, %s1918_s27  ;;  %s1922_s28 = sphi %s1977_s28, %s18_s28   ;;  %s1918_s27 = sphi %s1975_s27, %s3389_s27   ;;  %s1914_s26 = sphi %s1973_s26, %s3388_s26   ;;  %s1910_s25 = sphi %s1971_s25, %s3387_s25   ;;  %s1906_s24 = sphi %s1969_s24, %s3386_s24  }
   0x5   : > { %p28_p0 = scmp.ge.s32.totalorder %s27_s29, 2  ;;  %p1707_p1 = scmp.ge.s32.totalorder %s1922_s28, 1 }
   0x6   : > { %p336_p2 = scmp.lt.s32.totalorder %s1922_s28, 5 }
   0x7   : > { %s3391_s29 = smov (%p28_p0, %s27_s29), 0  ;;  %s3393_s30 = smov (!%p28_p0, %s30_s30), %s1918_s27 }
   0x8   : > { %3253 = sst [smem:[#allocation2_spill]] %s3391_s29  ;;  %p337_p3 = pnand %p1707_p1, %p336_p2 }
   0x9   : > { %p32_p4 = scmp.ge.s32.totalorder %s3393_s30, 2 }
   0xa   : > { %340 = sbr.rel (%p337_p3) target bundleno = 271 (0x10f), region = 44 }
   0xb   : > { %s3395_s30 = smov (%p32_p4, %s3393_s30), 0 }
   0xc   : > { %3254 = sst [smem:[#allocation3_spill]] %s3395_s30 }
   0xf   : > { %s1708_s8 = sshll.u32 %s1906_s24, 3  ;;  %p415_p5 = scmp.lt.s32.totalorder %s1910_s25, 1 }
  0x10   : > { %p417_p6 = scmp.lt.s32.totalorder %s1708_s8, 15  ;;  %s3255_s2 = sld [smem:[#allocation13_spill]] }
  0x11   : > { %s3397_s25 = smov (!%p415_p5, %s1910_s25), 1  ;;  %s3256_s0 = sld [smem:[#allocation12_spill]] }
  0x12   : > { %s3399_s8 = smov (!%p417_p6, %s1708_s8), 15  ;;  %s1709_s9 = sshll.u32 %s3397_s25, 4 }
  0x13   : > { %s1723_s10 = sshll.u32 %s3397_s25, 3  ;;  %s2002_s11 = sadd.s32 %s1709_s9, %s3399_s8 }
  0x14   : > { %s1715_s12 = sshll.u32 %s3399_s8, 2  ;;  %s1710_s13 = sshll.u32 %s2002_s11, 2 }
  0x15   : > { %s432_s22 = scalar_lea.vmem %s3231_s1, %s1710_s13  ;;  %s1718_s23 = sshll.u32 %s2002_s11, 3 }
  0x16   : > { %s2008_s16 = scalar_lea.vmem %s3255_s2, %s1715_s12  ;;  %s457_s8 = scalar_lea.vmem %s3234_s4, %s2002_s11 }
  0x17   : > { %s2013_s19 = scalar_lea.vmem %s3256_s0, %s1710_s13  ;;  %s2026_s14 = scalar_lea.vmem %s3233_s3, %s1718_s23 }
  0x18   : > { %s466_s17 = scalar_lea.vmem %s3235_s5, %s2002_s11  ;;  %s2035_s2 = scalar_lea.vmem %s3236_s6, %s1723_s10 }
  0x19   : > { %s2040_s21 = scalar_lea.vmem %s3237_s7, %s1723_s10  ;;  %p1725_p7 = scmp.ne.s32.totalorder %s1906_s24, 0 }
  0x1b   : > { %479 = sbr.rel (%p1725_p7) target bundleno = 35 (0x23), region = 48 }
  0x20   : > { %v1924_v0 = vmov 0.0  }
  0x21   : > { %480 = vst [vmem:[%s2035_s2] sm:$0xff] %v1924_v0 }
  0x22   : > { %481 = vst [vmem:[%s2040_s21] sm:$0xff] %v1924_v0 }
  0x23 PF: > { %v532_v1 = vld [vmem:[%s432_s22] sm:$0xff]  ;;  %v533_v2 = vld [vmem:[%s432_s22 + $0x8] sm:$0xff]  ;;  %v534_v3 = vld [vmem:[%s432_s22 + $0x10] sm:$0xff]  ;;  %v483_v17 = vlaneseq  ;;  %s1726_s30 = sshll.u32 %s1906_s24, 10 }
  0x24   : > { %v2045_v4 = vld [vmem:[%s432_s22 + $0x18] sm:$0xff]  ;;  %v2048_v5 = vld [vmem:[%s2008_s16] sm:$0xff]  ;;  %v548_v6 = vrot.slane %v532_v1, 6  ;;  %v550_v7 = vrot.slane %v533_v2, 6  ;;  %v552_v8 = vrot.slane %v534_v3, 6  ;;  %v2055_v11 = vld [vmem:[%s2008_s16 + $0x8] sm:$0xff] }
  0x25   : > { %v554_v9 = vrot.slane %v2045_v4, 6  ;;  %v2052_v10 = vmax.f32 %v2048_v5, 1e-08  ;;  %v2058_v12 = vld [vmem:[%s2008_s16 + $0x10] sm:$0xff]  ;;  %v2063_v18 = vld [vmem:[%s2008_s16 + $0x18] sm:$0xff]  ;;  %v2066_v21 = vand.u32 127, %v483_v17 }
  0x26   : > { %v549_v13 = vrot.slane %v548_v6, 4  ;;  %v551_v14 = vrot.slane %v550_v7, 4  ;;  %v553_v15 = vrot.slane %v552_v8, 4  ;;  %v2069_v22 = vmax.f32 %v2055_v11, 1e-08 }
  0x27   : > { %v555_v16 = vrot.slane %v554_v9, 4  ;;  %v2072_v23 = vmax.f32 %v2058_v12, 1e-08  ;;  %1794 = vrcp.f32 %v2052_v10  ;;  %v2076_v24 = vmax.f32 %v2063_v18, 1e-08 }
  0x28   : > { %v560_v19 = vadd.f32 %v549_v13, %v532_v1  ;;  %v561_v20 = vadd.f32 %v551_v14, %v533_v2  ;;  %v562_v25 = vadd.f32 %v553_v15, %v534_v3  ;;  %v2079_v27 = vsub.f32 %v532_v1, %v548_v6 }
  0x29   : > { %v563_v26 = vadd.f32 %v555_v16, %v2045_v4  ;;  %v584_v28 = vmul.f32 0.1, %v2052_v10  ;;  %v585_v29 = vmul.f32 0.1, %v2069_v22  ;;  %v586_v30 = vmul.f32 0.1, %v2072_v23 }
  0x2a   : > { %v2084_v31 = vmul.f32 0.5, %v560_v19  ;;  %v2086_v32 = vmul.f32 0.5, %v561_v20  ;;  %v2088_v33 = vsub.f32 %v533_v2, %v550_v7  ;;  %v2090_v34 = vsub.f32 %v534_v3, %v552_v8 }
  0x2b   : > { %v587_v35 = vmul.f32 0.1, %v2076_v24  ;;  %v592_v36 = vrot.slane %v584_v28, 6  ;;  %v594_v37 = vrot.slane %v585_v29, 6  ;;  %v596_v38 = vrot.slane %v586_v30, 6  ;;  %v2175_v28 = vld [vmem:[%s466_s17] sm:$0xff] }
  0x2c   : > { %v2093_v39 = vmul.f32 0.5, %v562_v25  ;;  %v2095_v40 = vmul.f32 0.5, %v563_v26  ;;  %v576_v41 = vmax.f32 %v2079_v27, 1e-08  ;;  %1796 = vrcp.f32 %v2069_v22 }
  0x2d   : > { %v2099_v42 = vpop.eup %1794  ;;  %v2101_v43 = vrot.slane %v592_v36, 4  ;;  %v2103_v44 = vrot.slane %v594_v37, 4  ;;  %v2105_v45 = vrot.slane %v596_v38, 4  ;;  %v598_v46 = vrot.slane %v587_v35, 6 }
  0x2e   : > { %v577_v47 = vmax.f32 %v2088_v33, 1e-08  ;;  %vm669_vm0 = vweird.f32 %v2052_v10  ;;  %v673_v48 = vand.u32 2147483647, %v2052_v10  ;;  %v675_v49 = vand.u32 2147483648, %v2052_v10 }
  0x2f   : > { %v580_v50 = vsub.f32 %v2084_v31, %v2048_v5  ;;  %v581_v51 = vsub.f32 %v2086_v32, %v2055_v11  ;;  %v2115_v52 = vrot.slane %v598_v46, 4  ;;  %1798 = vrcp.f32 %v2101_v43 }
  0x30   : > { %v582_v53 = vsub.f32 %v2093_v39, %v2058_v12  ;;  %v615_v54 = vand.u32 2147483648, %v2101_v43  ;;  %1800 = vrcp.f32 %v2103_v44  ;;  %v665_v55 = vmul.f32 %v2099_v42, %v2052_v10  ;;  %v528_v39 = vld [vmem:[%s2013_s19] sm:$0xff] }
  0x31   : > { %v583_v56 = vsub.f32 %v2095_v40, %v2063_v18  ;;  %1802 = vrcp.f32 %v2105_v45  ;;  %vm670_vm1 = vweird.f32 %v2099_v42  ;;  %vm684_vm2 = vweird.f32 %v2069_v22  ;;  %v529_v40 = vld [vmem:[%s2013_s19 + $0x8] sm:$0xff] }
  0x32   : > { %v2129_v57 = vpop.eup %1796  ;;  %vm609_vm3 = vweird.f32 %v2101_v43  ;;  %v613_v58 = vand.u32 2147483647, %v2101_v43  ;;  %vm624_vm4 = vweird.f32 %v2103_v44  ;;  %vm2134_vm5 = vcmp.eq.f32.partialorder %v673_v48, 8.507059e+37  ;;  %vm2184_vm12 = vmor %vm669_vm0, %vm670_vm1 }
  0x33   : > { %v676_v60 = vor.u32 1.1754944e-38, %v675_v49  ;;  %v628_v61 = vand.u32 2147483647, %v2103_v44  ;;  %v630_v62 = vand.u32 2147483648, %v2103_v44  ;;  %vm639_vm6 = vweird.f32 %v2105_v45 }
  0x34   : > { %1804 = vrcp.f32 %v2115_v52  ;;  %v2142_v63 = vor.u32 1.1754944e-38, %v615_v54  ;;  %v643_v0 = vand.u32 2147483647, %v2105_v45  ;;  %v645_v1 = vand.u32 2147483648, %v2105_v45 }
  0x35   : > { %v666_v2 = vsub.f32 1.0, %v665_v55  ;;  %v2146_v3 = vpop.eup %1798  ;;  %vm654_vm7 = vweird.f32 %v2115_v52  ;;  %v658_v6 = vand.u32 2147483647, %v2115_v52  ;;  %v680_v7 = vmul.f32 %v2129_v57, %v2069_v22 }
  0x36   : > { %v688_v8 = vand.u32 2147483647, %v2069_v22  ;;  %v2153_v13 = vpop.eup %1800  ;;  %v605_v14 = vmul.f32 %v2146_v3, %v2101_v43  ;;  %vm2157_vm8 = vcmp.eq.f32.partialorder %v613_v58, 8.507059e+37  ;;  %v660_v16 = vand.u32 2147483648, %v2115_v52 }
  0x37   : > { %v667_v19 = vmul.f32 %v2099_v42, %v666_v2  ;;  %vm685_vm9 = vweird.f32 %v2129_v57  ;;  %v2164_v20 = vpop.eup %1802  ;;  %vm610_vm10 = vweird.f32 %v2146_v3  ;;  %v620_v25 = vmul.f32 %v2153_v13, %v2103_v44 }
  0x38   : > { %vm625_vm11 = vweird.f32 %v2153_v13  ;;  %v681_v26 = vsub.f32 1.0, %v680_v7  ;;  %v606_v29 = vsub.f32 1.0, %v605_v14  ;;  %v635_v30 = vmul.f32 %v2164_v20, %v2105_v45  ;;  %vm2203_vm0 = vmor %vm684_vm2, %vm685_vm9 }
  0x39   : > { %v668_v35 = vadd.f32 %v2099_v42, %v667_v19  ;;  %vm2188_vm13 = vcmp.eq.f32.partialorder %v688_v8, 8.507059e+37  ;;  %vm526_vm14 = vcmp.ge.f32.partialorder %v2175_v28, 0.5  ;;  %v621_v46 = vsub.f32 1.0, %v620_v25  ;;  %vm2211_vm1 = vmor %vm609_vm3, %vm610_vm10 }
  0x3a   : > { %v1805_v38 = vpop.eup %1804  ;;  %v682_v48 = vmul.f32 %v2129_v57, %v681_v26  ;;  %v690_v49 = vand.u32 2147483648, %v2069_v22  ;;  %1806 = vrcp.f32 %v2072_v23  ;;  %v607_v10 = vmul.f32 %v2146_v3, %v606_v29  ;;  %vm2227_vm3 = vmor %vm624_vm4, %vm625_vm11 }
  0x3b   : > { %v636_v54 = vsub.f32 1.0, %v635_v30  ;;  %vm640_vm15 = vweird.f32 %v2164_v20  ;;  %v650_v55 = vmul.f32 %v1805_v38, %v2115_v52  ;;  %v622_v7 = vmul.f32 %v2153_v13, %v621_v46 }
  0x3c   : > { %v672_v8 = vsel %vm2184_vm12, %v2099_v42, %v668_v35  ;;  %v683_v22 = vadd.f32 %v2129_v57, %v682_v48  ;;  %v691_v14 = vor.u32 1.1754944e-38, %v690_v49  ;;  %v608_v19 = vadd.f32 %v2146_v3, %v607_v10  ;;  %vm2248_vm4 = vmor %vm639_vm6, %vm640_vm15 }
  0x3d   : > { %v637_v25 = vmul.f32 %v2164_v20, %v636_v54  ;;  %v651_v26 = vsub.f32 1.0, %v650_v55  ;;  %vm655_vm2 = vweird.f32 %v1805_v38  ;;  %v623_v43 = vadd.f32 %v2153_v13, %v622_v7 }
  0x3e   : > { %vm2231_vm9 = vcmp.eq.f32.partialorder %v628_v61, 8.507059e+37  ;;  %v677_v30 = vsel %vm2134_vm5, %v676_v60, %v672_v8  ;;  %v687_v35 = vsel %vm2203_vm0, %v2129_v57, %v683_v22  ;;  %v612_v44 = vsel %vm2211_vm1, %v2146_v3, %v608_v19  ;;  %vm2258_vm10 = vmor %vm654_vm7, %vm655_vm2 }
  0x3f   : > { %v631_v36 = vor.u32 1.1754944e-38, %v630_v62  ;;  %v638_v46 = vadd.f32 %v2164_v20, %v637_v25  ;;  %v652_v59 = vmul.f32 %v1805_v38, %v651_v26  ;;  %vm2252_vm5 = vcmp.eq.f32.partialorder %v643_v0, 8.507059e+37 }
  0x40   : > { %v1807_v60 = vpop.eup %1806  ;;  %v646_v48 = vor.u32 1.1754944e-38, %v645_v1  ;;  %vm2262_vm11 = vcmp.eq.f32.partialorder %v658_v6, 8.507059e+37  ;;  %v692_v45 = vsel %vm2188_vm13, %v691_v14, %v687_v35  ;;  %v627_v0 = vsel %vm2227_vm3, %v2153_v13, %v623_v43 }
  0x41   : > { %v653_v49 = vadd.f32 %v1805_v38, %v652_v59  ;;  %v661_v10 = vor.u32 1.1754944e-38, %v660_v16  ;;  %v678_v52 = vmul.f32 %v677_v30, %v576_v41  ;;  %v617_v1 = vsel %vm2157_vm8, %v2142_v63, %v612_v44 }
  0x42   : > { %v642_v6 = vsel %vm2248_vm4, %v2164_v20, %v638_v46  ;;  %v695_v37 = vmul.f32 %v1807_v60, %v2072_v23  ;;  %vm699_vm6 = vweird.f32 %v2072_v23  ;;  %v693_v27 = vmul.f32 %v692_v45, %v577_v47 }
  0x43   : > { %v657_v13 = vsel %vm2258_vm10, %v1805_v38, %v653_v49  ;;  %v703_v41 = vand.u32 2147483647, %v2072_v23  ;;  %v705_v16 = vand.u32 2147483648, %v2072_v23  ;;  %v632_v63 = vsel %vm2231_vm9, %v631_v36, %v627_v0 }
  0x44   : > { %v696_v15 = vsub.f32 1.0, %v695_v37  ;;  %vm700_vm7 = vweird.f32 %v1807_v60  ;;  %1808 = vrcp.f32 %v2076_v24  ;;  %v2291_v20 = vstv %s1726_s30 }
  0x45   : > { %v1925_v54 = vmov 0.0   ;;  %v647_v33 = vsel %vm2252_vm5, %v646_v48, %v642_v6  ;;  %v662_v47 = vsel %vm2262_vm11, %v661_v10, %v657_v13  ;;  %v485_v55 = vadd.s32 128, %v2066_v21  ;;  %vm2312_vm8 = vmor %vm699_vm6, %vm700_vm7 }
  0x46   : > { %v2296_v38 = vsel %vm526_vm14, 1.0, %v1925_v54  ;;  %v578_v58 = vmax.f32 %v2090_v34, 1e-08  ;;  %v697_v2 = vmul.f32 %v1807_v60, %v696_v15  ;;  %1810 = vlog2.f32 %v678_v52 }
  0x47   : > { %v618_v7 = vmul.f32 %v617_v1, %v580_v50  ;;  %v633_v8 = vmul.f32 %v632_v63, %v581_v51  ;;  %v706_v14 = vor.u32 1.1754944e-38, %v705_v16  ;;  %1812 = vlog2.f32 %v693_v27 }
  0x48   : > { %v648_v5 = vmul.f32 %v647_v33, %v582_v53  ;;  %v663_v11 = vmul.f32 %v662_v47, %v583_v56  ;;  %v698_v31 = vadd.f32 %v1807_v60, %v697_v2  ;;  %vm704_vm12 = vcmp.eq.f32.partialorder %v703_v41, 8.507059e+37  ;;  %v2337_v53 = vld [vmem:[%s2013_s19 + $0x10] sm:$0xff]  ;;  %v2340_v56 = vld [vmem:[%s2013_s19 + $0x18] sm:$0xff] }
  0x49   : > { %v486_v23 = vadd.s32 256, %v2066_v21  ;;  %v487_v32 = vadd.s32 384, %v2066_v21  ;;  %v2325_v34 = vadd.s32 512, %v2066_v21  ;;  %v575_v50 = vsub.f32 %v2045_v4, %v554_v9 }
  0x4a   : > { %v1809_v12 = vpop.eup %1808  ;;  %v702_v51 = vsel %vm2312_vm8, %v1807_v60, %v698_v31  ;;  %vm714_vm13 = vweird.f32 %v2076_v24  ;;  %v718_v18 = vand.u32 2147483647, %v2076_v24  ;;  %v720_v26 = vand.u32 2147483648, %v2076_v24 }
  0x4b   : > { %v707_v19 = vsel %vm704_vm12, %v706_v14, %v702_v51  ;;  %v710_v25 = vmul.f32 %v1809_v12, %v2076_v24  ;;  %v736_v4 = vsub.f32 %v528_v39, %v618_v7  ;;  %v737_v29 = vsub.f32 %v529_v40, %v633_v8 }
  0x4c   : > { %v1811_v9 = vpop.eup %1810  ;;  %v708_v43 = vmul.f32 %v707_v19, %v578_v58  ;;  %v738_v42 = vsub.f32 %v2337_v53, %v648_v5  ;;  %v739_v30 = vsub.f32 %v2340_v56, %v663_v11  ;;  %vm715_vm14 = vweird.f32 %v1809_v12 }
  0x4d   : > { %v1813_v35 = vpop.eup %1812  ;;  %v711_v44 = vsub.f32 1.0, %v710_v25  ;;  %v725_v36 = vmul.f32 0.6931472, %v1811_v9  ;;  %v1926_v46 = vmov 0.11   ;;  %v489_v61 = vadd.s32 640, %v2066_v21  ;;  %vm2352_vm15 = vmor %vm714_vm13, %vm715_vm14 }
  0x4e   : > { %1814 = vrcp.f32 %v1926_v46  ;;  %v490_v59 = vadd.s32 768, %v2066_v21  ;;  %v727_v60 = vmul.f32 0.6931472, %v1813_v35  ;;  %v493_v57 = vadd.s32 %v2291_v20, %v2066_v21 }
  0x4f   : > { %1816 = vlog2.f32 %v708_v43  ;;  %v579_v48 = vmax.f32 %v575_v50, 1e-08  ;;  %v712_v62 = vmul.f32 %v1809_v12, %v711_v44  ;;  %v732_v3 = vmul.f32 5.0, %v725_v36 }
  0x50   : > { %v721_v0 = vor.u32 1.1754944e-38, %v720_v26  ;;  %v733_v49 = vmul.f32 5.0, %v727_v60  ;;  %v2356_v10 = vand.u32 2147483647, %v736_v4  ;;  %v2358_v52 = vand.u32 2147483647, %v737_v29 }
  0x51   : > { %v713_v1 = vadd.f32 %v1809_v12, %v712_v62  ;;  %vm719_vm0 = vcmp.eq.f32.partialorder %v718_v18, 8.507059e+37  ;;  %v2360_v6 = vand.u32 2147483647, %v738_v42  ;;  %v2362_v37 = vand.u32 2147483647, %v739_v30 }
  0x52   : > { %v2365_v13 = vadd.s32 896, %v2066_v21  ;;  %v494_v24 = vadd.s32 %v2291_v20, %v485_v55  ;;  %v744_v27 = vsub.f32 %v528_v39, %v732_v3  ;;  %v745_v41 = vsub.f32 %v529_v40, %v733_v49 }
  0x53   : > { %v2369_v63 = vadd.s32 %v2291_v20, %v486_v23  ;;  %v2372_v15 = vadd.s32 %v2291_v20, %v487_v32  ;;  %vm501_vm1 = vcmp.lt.s32.totalorder %v493_v57, 2000  ;;  %v717_v33 = vsel %vm2352_vm15, %v1809_v12, %v713_v1 }
  0x54   : > { %v1815_v16 = vpop.eup %1814  ;;  %v722_v58 = vsel %vm719_vm0, %v721_v0, %v717_v33  ;;  %v752_v21 = vmul.f32 19.085537, %v2356_v10  ;;  %v753_v2 = vmul.f32 19.085537, %v2358_v52  ;;  %v754_v22 = vmul.f32 19.085537, %v2360_v6 }
  0x55   : > { %v1817_v47 = vpop.eup %1816  ;;  %v765_v55 = vmul.f32 0.11, %v1815_v16  ;;  %v723_v7 = vmul.f32 %v722_v58, %v579_v48  ;;  %v755_v14 = vmul.f32 19.085537, %v2362_v37  ;;  %vm502_vm2 = vcmp.lt.s32.totalorder %v494_v24, 2000 }
  0x56   : > { %v729_v8 = vmul.f32 0.6931472, %v1817_v47  ;;  %v2380_v5 = vand.u32 2147483647, %v744_v27  ;;  %v2382_v11 = vand.u32 2147483647, %v745_v41  ;;  %v2386_v12 = vadd.s32 %v2291_v20, %v2325_v34 }
  0x57   : > { %v766_v31 = vsub.f32 1.0, %v765_v55  ;;  %1818 = vlog2.f32 %v723_v7  ;;  %v756_v32 = vadd.f32 1.0, %v752_v21  ;;  %v757_v50 = vadd.f32 1.0, %v753_v2 }
  0x58   : > { %v734_v23 = vmul.f32 5.0, %v729_v8  ;;  %v758_v39 = vadd.f32 1.0, %v754_v22  ;;  %v759_v51 = vadd.f32 1.0, %v755_v14  ;;  %v2389_v40 = vadd.s32 %v2291_v20, %v489_v61 }
  0x59   : > { %v767_v18 = vmul.f32 %v1815_v16, %v766_v31  ;;  %v2393_v19 = vsel %vm501_vm1, 1.0, %v1925_v54  ;;  %vm769_vm3 = vweird.f32 %v1815_v16  ;;  %v2398_v26 = vsel %vm502_vm2, 1.0, %v1925_v54 }
  0x5a   : > { %v746_v25 = vsub.f32 %v2337_v53, %v734_v23  ;;  %v815_v34 = vmul.f32 19.085537, %v2380_v5  ;;  %v816_v9 = vmul.f32 19.085537, %v2382_v11  ;;  %v2403_v43 = vadd.s32 %v2291_v20, %v490_v59 }
  0x5b   : > { %v768_v4 = vadd.f32 %v1815_v16, %v767_v18  ;;  %v2407_v42 = vmul.f32 0.026197849, %v756_v32  ;;  %v2409_v30 = vmul.f32 0.026197849, %v757_v50  ;;  %v2411_v53 = vmul.f32 0.026197849, %v758_v39 }
  0x5c   : > { %v2405_v29 = vand.u32 2147483647, %v746_v25  ;;  %v2413_v35 = vmul.f32 0.026197849, %v759_v51  ;;  %v2416_v36 = vmul.f32 0.5, %v2356_v10  ;;  %v799_v24 = vmul.f32 1.5, %v2356_v10 }
  0x5d   : > { %v770_v44 = vsel %vm769_vm3, %v1815_v16, %v768_v4  ;;  %v1819_v46 = vpop.eup %1818  ;;  %v800_v16 = vmul.f32 1.5, %v2358_v52  ;;  %v2422_v47 = vmul.f32 0.5, %v2358_v52  ;;  %v801_v58 = vmul.f32 1.5, %v2360_v6 }
  0x5e   : > { %v771_v61 = vmul.f32 %v770_v44, %v752_v21  ;;  %v772_v60 = vmul.f32 %v770_v44, %v753_v2  ;;  %v773_v57 = vmul.f32 %v770_v44, %v754_v22  ;;  %v774_v59 = vmul.f32 %v770_v44, %v755_v14 }
  0x5f   : > { %v731_v48 = vmul.f32 0.6931472, %v1819_v46  ;;  %v817_v62 = vmul.f32 19.085537, %v2405_v29  ;;  %v827_v3 = vmul.f32 %v815_v34, %v770_v44  ;;  %v828_v45 = vmul.f32 %v816_v9, %v770_v44 }
  0x60   : > { %v775_v0 = vadd.f32 1.0, %v771_v61  ;;  %v776_v49 = vadd.f32 1.0, %v772_v60  ;;  %v777_v1 = vadd.f32 1.0, %v773_v57  ;;  %v778_v41 = vadd.f32 1.0, %v774_v59 }
  0x61   : > { %v735_v27 = vmul.f32 5.0, %v731_v48  ;;  %v829_v33 = vmul.f32 %v817_v62, %v770_v44  ;;  %v831_v21 = vadd.f32 1.0, %v827_v3  ;;  %v802_v55 = vmul.f32 1.5, %v2362_v37 }
  0x62   : > { %1820 = vlog2.f32 %v775_v0  ;;  %v832_v7 = vadd.f32 1.0, %v828_v45  ;;  %v2428_v8 = vmul.f32 0.5, %v2360_v6  ;;  %v2431_v22 = vmul.f32 0.5, %v2362_v37 }
  0x63   : > { %v747_v2 = vsub.f32 %v2340_v56, %v735_v27  ;;  %1822 = vlog2.f32 %v776_v49  ;;  %v833_v14 = vadd.f32 1.0, %v829_v33  ;;  %v2435_v23 = vadd.f32 0.023593545, %v799_v24 }
  0x64   : > { %1824 = vlog2.f32 %v777_v1  ;;  %v2437_v32 = vadd.f32 0.023593545, %v800_v16  ;;  %v2439_v56 = vadd.f32 0.023593545, %v801_v58  ;;  %v819_v50 = vadd.f32 1.0, %v815_v34 }
  0x65   : > { %v2433_v31 = vand.u32 2147483647, %v747_v2  ;;  %1826 = vlog2.f32 %v778_v41  ;;  %v855_v39 = vmul.f32 1.5, %v2380_v5  ;;  %v2442_v51 = vadd.f32 0.023593545, %v802_v55 }
  0x66   : > { %1828 = vlog2.f32 %v831_v21  ;;  %v2446_v25 = vmul.f32 0.5, %v2380_v5  ;;  %vm807_vm9 = vcmp.lt.f32.partialorder %v2356_v10, 0.11  ;;  %v820_v46 = vadd.f32 1.0, %v816_v9 }
  0x67   : > { %v818_v18 = vmul.f32 19.085537, %v2433_v31  ;;  %1830 = vlog2.f32 %v832_v7  ;;  %v2450_v61 = vmul.f32 0.5, %v2382_v11  ;;  %v856_v34 = vmul.f32 1.5, %v2382_v11 }
  0x68   : > { %v1821_v4 = vpop.eup %1820  ;;  %1832 = vlog2.f32 %v833_v14  ;;  %vm808_vm4 = vcmp.lt.f32.partialorder %v2358_v52, 0.11  ;;  %v821_v59 = vadd.f32 1.0, %v817_v62  ;;  %vm863_vm5 = vcmp.lt.f32.partialorder %v2380_v5, 0.11  ;;  %v1040_v52 = vld [vmem:[%s457_s8] sm:$0xff] }
  0x69   : > { %v1823_v60 = vpop.eup %1822  ;;  %v780_v57 = vmul.f32 0.6931472, %v1821_v4  ;;  %v830_v48 = vmul.f32 %v818_v18, %v770_v44  ;;  %v2457_v45 = vadd.s32 %v2291_v20, %v2365_v13  ;;  %vm809_vm10 = vcmp.lt.f32.partialorder %v2360_v6, 0.11 }
  0x6a   : > { %v1825_v3 = vpop.eup %1824  ;;  %v782_v9 = vmul.f32 0.6931472, %v1823_v60  ;;  %v823_v0 = vmul.f32 0.026197849, %v819_v50  ;;  %v859_v49 = vadd.f32 0.023593545, %v855_v39 }
  0x6b   : > { %v1827_v1 = vpop.eup %1826  ;;  %v784_v24 = vmul.f32 0.6931472, %v1825_v3  ;;  %v787_v27 = vmul.f32 %v780_v57, %v2407_v42  ;;  %v834_v41 = vadd.f32 1.0, %v830_v48  ;;  %v857_v62 = vmul.f32 1.5, %v2405_v29 }
  0x6c   : > { %v1829_v44 = vpop.eup %1828  ;;  %vm503_vm11 = vcmp.lt.s32.totalorder %v2369_v63, 2000  ;;  %v788_v16 = vmul.f32 %v782_v9, %v2409_v30  ;;  %v824_v33 = vmul.f32 0.026197849, %v820_v46  ;;  %v860_v20 = vadd.f32 0.023593545, %v856_v34 }
  0x6d   : > { %vm864_vm6 = vcmp.lt.f32.partialorder %v2382_v11, 0.11  ;;  %v1831_v13 = vpop.eup %1830  ;;  %vm504_vm7 = vcmp.lt.s32.totalorder %v2372_v15, 2000  ;;  %v789_v58 = vmul.f32 %v784_v24, %v2411_v53  ;;  %v825_v21 = vmul.f32 0.026197849, %v821_v59 }
  0x6e   : > { %v836_v2 = vmul.f32 0.6931472, %v1829_v44  ;;  %1834 = vlog2.f32 %v834_v41  ;;  %v1833_v42 = vpop.eup %1832  ;;  %vm505_vm8 = vcmp.lt.s32.totalorder %v2386_v12, 2000  ;;  %vm506_vm12 = vcmp.lt.s32.totalorder %v2389_v40, 2000 }
  0x6f   : > { %vm507_vm13 = vcmp.lt.s32.totalorder %v2403_v43, 2000  ;;  %vm508_vm14 = vcmp.lt.s32.totalorder %v2457_v45, 2000  ;;  %v786_v30 = vmul.f32 0.6931472, %v1827_v1  ;;  %v822_v55 = vadd.f32 1.0, %v818_v18 }
  0x70   : > { %v838_v7 = vmul.f32 0.6931472, %v1831_v13  ;;  %v849_v14 = vmul.f32 0.5, %v2405_v29  ;;  %v795_v50 = vsub.f32 %v787_v27, %v2416_v36  ;;  %v840_v53 = vmul.f32 0.6931472, %v1833_v42 }
  0x71   : > { %v843_v39 = vmul.f32 %v836_v2, %v823_v0  ;;  %v861_v4 = vadd.f32 0.023593545, %v857_v62  ;;  %v796_v46 = vsub.f32 %v788_v16, %v2422_v47  ;;  %vm865_vm15 = vcmp.lt.f32.partialorder %v2405_v29, 0.11 }
  0x72   : > { %v844_v34 = vmul.f32 %v838_v7, %v824_v33  ;;  %vm1041_vm0 = vcmp.lt.f32.partialorder %v2175_v28, 0.4  ;;  %v797_v60 = vsub.f32 %v789_v58, %v2428_v8  ;;  %v845_v57 = vmul.f32 %v840_v53, %v825_v21 }
  0x73   : > { %v851_v18 = vsub.f32 %v843_v39, %v2446_v25  ;;  %v858_v59 = vmul.f32 1.5, %v2433_v31  ;;  %v790_v48 = vmul.f32 %v786_v30, %v2413_v35  ;;  %v826_v36 = vmul.f32 0.026197849, %v822_v55 }
  0x74   : > { %v852_v3 = vsub.f32 %v844_v34, %v2450_v61  ;;  %v1047_v47 = vshrl.u32 %v483_v17, 7  ;;  %v1835_v9 = vpop.eup %1834  ;;  %v811_v0 = vsel %vm807_vm9, %v795_v50, %v2435_v23  ;;  %v850_v8 = vmul.f32 0.5, %v2433_v31 }
  0x75   : > { %v853_v1 = vsub.f32 %v845_v57, %v849_v14  ;;  %v867_v25 = vsel %vm863_vm5, %v851_v18, %v859_v49  ;;  %v812_v35 = vsel %vm808_vm4, %v796_v46, %v2437_v32  ;;  %v842_v24 = vmul.f32 0.6931472, %v1835_v9 }
  0x76   : > { %v868_v61 = vsel %vm864_vm6, %v852_v3, %v860_v20  ;;  %v1735_v17 = vrot.slane %v867_v25, 10  ;;  %v813_v10 = vsel %vm809_vm10, %v797_v60, %v2439_v56  ;;  %v862_v23 = vadd.f32 0.023593545, %v858_v59 }
  0x77   : > { %v869_v27 = vsel %vm865_vm15, %v853_v1, %v861_v4  ;;  %v1736_v41 = vrot.slane %v868_v61, 10  ;;  %v798_v5 = vsub.f32 %v790_v48, %v2431_v22  ;;  %v846_v32 = vmul.f32 %v842_v24, %v826_v36 }
  0x78   : > { %v1737_v11 = vrot.slane %v869_v27, 10  ;;  %v887_v49 = vadd.f32 %v1735_v17, %v811_v0  ;;  %v2507_v6 = vsel %vm503_vm11, 1.0, %v1925_v54  ;;  %vm810_vm1 = vcmp.lt.f32.partialorder %v2362_v37, 0.11 }
  0x79   : > { %vm866_vm2 = vcmp.lt.f32.partialorder %v2433_v31, 0.11  ;;  %v888_v29 = vadd.f32 %v1736_v41, %v812_v35  ;;  %v2514_v56 = vsel %vm504_vm7, 1.0, %v1925_v54  ;;  %v854_v62 = vsub.f32 %v846_v32, %v850_v8 }
  0x7a   : > { %v889_v22 = vadd.f32 %v1737_v11, %v813_v10  ;;  %895 = vst [vmem:[#allocation1] ss:$2 sm:$0xff] %v887_v49  ;;  %v2518_v44 = vsel %vm1041_vm0, 0, %v1040_v52  ;;  %v2523_v63 = vsel %vm505_vm8, 1.0, %v1925_v54  ;;  %v2528_v37 = vsel %vm506_vm12, 1.0, %v1925_v54 }
  0x7b   : > { %v2533_v15 = vsel %vm507_vm13, 1.0, %v1925_v54  ;;  %v2538_v31 = vsel %vm508_vm14, 1.0, %v1925_v54  ;;  %897 = vst [vmem:[#allocation1 + $0x10] ss:$2 sm:$0xff] %v888_v29  ;;  %v814_v12 = vsel %vm810_vm1, %v798_v5, %v2442_v51  ;;  %v870_v16 = vsel %vm866_vm2, %v854_v62, %v862_v23 }
  0x7c   : > { %899 = vst [vmem:[#allocation1 + $0x20] ss:$2 sm:$0xff] %v889_v22  ;;  %vm3242_vm3 = vcmask 1041408   ;;  %v2541_v33 = vadd.s32 1, %v1047_v47  ;;  %v1738_v40 = vrot.slane %v870_v16, 10  ;;  %v1049_v20 = vperm.slane %v2518_v44, 0 }
  0x7d   : > { %v1050_v43 = vperm.slane %v2518_v44, 1  ;;  %v1051_v13 = vperm.slane %v2518_v44, 2  ;;  %v1052_v58 = vperm.slane %v2518_v44, 3  ;;  %v1053_v45 = vperm.slane %v2518_v44, 4 }
  0x7e   : > { %v1054_v21 = vperm.slane %v2518_v44, 5  ;;  %v1055_v51 = vperm.slane %v2518_v44, 6  ;;  %v890_v2 = vadd.f32 %v1738_v40, %v814_v12  ;;  %v976_v42 = vperm.slane %v2296_v38, 0 }
  0x7f   : > { %v977_v30 = vperm.slane %v2296_v38, 1  ;;  %v1056_v55 = vperm.slane %v2518_v44, 7  ;;  %v978_v7 = vperm.slane %v2296_v38, 2  ;;  %v979_v14 = vperm.slane %v2296_v38, 3 }
  0x80   : > { %v980_v50 = vperm.slane %v2296_v38, 4  ;;  %v981_v53 = vperm.slane %v2296_v38, 5  ;;  %901 = vst [vmem:[#allocation1 + $0x30] ss:$2 sm:$0xff] %v890_v2  ;;  %v982_v4 = vperm.slane %v2296_v38, 6  ;;  %v983_v35 = vperm.slane %v2296_v38, 7 }
  0x81   : > { %v902_v39 = vld.sshfl [vmem:[#allocation1] sm:$0xff pattern:$0x75316420]  ;;  %v903_v46 = vld.sshfl [vmem:[#allocation1 + $0x8] sm:$0xff pattern:$0x75316420]  ;;  %vm2570_vm10 = vcmp.eq.s32.totalorder %v2541_v33, %v1049_v20  ;;  %vm2577_vm6 = vcmp.eq.s32.totalorder %v2541_v33, %v1050_v43  ;;  %vm2584_vm7 = vcmp.eq.s32.totalorder %v2541_v33, %v1051_v13  ;;  %vm2591_vm8 = vcmp.eq.s32.totalorder %v2541_v33, %v1052_v58 }
  0x82   : > { %v904_v34 = vld.sshfl [vmem:[#allocation1 + $0x10] sm:$0xff pattern:$0x75316420]  ;;  %v905_v60 = vld.sshfl [vmem:[#allocation1 + $0x18] sm:$0xff pattern:$0x75316420]  ;;  %vm2598_vm13 = vcmp.eq.s32.totalorder %v2541_v33, %v1053_v45  ;;  %vm2619_vm1 = vcmp.eq.s32.totalorder %v2541_v33, %v1054_v21 }
  0x83   : > { %v906_v57 = vld.sshfl [vmem:[#allocation1 + $0x20] sm:$0xff pattern:$0x75316420]  ;;  %v907_v18 = vld.sshfl [vmem:[#allocation1 + $0x28] sm:$0xff pattern:$0x75316420] }
  0x84   : > { %v919_v59 = vsel %vm3242_vm3, %v902_v39, 0.0  ;;  %v926_v48 = vsel %vm3242_vm3, %v903_v46, 0.0  ;;  %v933_v36 = vsel %vm3242_vm3, %v904_v34, 0.0  ;;  %v940_v0 = vsel %vm3242_vm3, %v905_v60, 0.0 }
  0x85   : > { %v920_v3 = vrot.slane %v919_v59, 4  ;;  %v927_v47 = vrot.slane %v926_v48, 4  ;;  %v934_v9 = vrot.slane %v933_v36, 4  ;;  %v941_v8 = vrot.slane %v940_v0, 4 }
  0x86   : > { %v947_v1 = vsel %vm3242_vm3, %v906_v57, 0.0  ;;  %v954_v25 = vsel %vm3242_vm3, %v907_v18, 0.0  ;;  %vm1042_vm9 = vcmp.ge.f32.partialorder %v2175_v28, 0.4  ;;  %vm1043_vm4 = vcmp.lt.f32.partialorder %v2175_v28, 0.5 }
  0x87   : > { %v921_v24 = vadd.f32 %v920_v3, %v919_v59  ;;  %v928_v61 = vadd.f32 %v927_v47, %v926_v48  ;;  %v935_v17 = vadd.f32 %v934_v9, %v933_v36  ;;  %v948_v10 = vrot.slane %v947_v1, 4  ;;  %v908_v23 = vld.sshfl [vmem:[#allocation1 + $0x30] sm:$0xff pattern:$0x75316420]  ;;  %vm1044_vm14 = vmand %vm1042_vm9, %vm1043_vm4 }
  0x88   : > { %v909_v27 = vld.sshfl [vmem:[#allocation1 + $0x38] sm:$0xff pattern:$0x75316420]  ;;  %v942_v41 = vadd.f32 %v941_v8, %v940_v0  ;;  %v955_v29 = vrot.slane %v954_v25, 4  ;;  %v961_v62 = vsel %vm3242_vm3, %v908_v23, 0.0  ;;  %vm3244_vm5 = vcmask 1040384  }
  0x89   : > { %v922_v52 = vrot.slane %v921_v24, 2  ;;  %v929_v5 = vrot.slane %v928_v61, 2  ;;  %v936_v32 = vrot.slane %v935_v17, 2  ;;  %v949_v11 = vadd.f32 %v948_v10, %v947_v1 }
  0x8a   : > { %v943_v49 = vrot.slane %v942_v41, 2  ;;  %v968_v22 = vsel %vm3242_vm3, %v909_v27, 0.0  ;;  %v956_v46 = vadd.f32 %v955_v29, %v954_v25  ;;  %v962_v34 = vrot.slane %v961_v62, 4 }
  0x8b   : > { %v923_v12 = vadd.f32 %v922_v52, %v921_v24  ;;  %v930_v16 = vadd.f32 %v929_v5, %v928_v61  ;;  %v937_v40 = vadd.f32 %v936_v32, %v935_v17  ;;  %v950_v2 = vrot.slane %v949_v11, 2 }
  0x8c   : > { %v944_v39 = vadd.f32 %v943_v49, %v942_v41  ;;  %v969_v60 = vrot.slane %v968_v22, 4  ;;  %v3285_v57 = vmov 0  ;;  %vm3243_vm11 = vcmask 1042434  }
  0x8d   : > { %v3286_v57 = vsel %vm2570_vm10, 4294967295, %v3285_v57  ;;  %v924_v18 = vrot.slane %v923_v12, 1  ;;  %v931_v59 = vrot.slane %v930_v16, 1  ;;  %v938_v48 = vrot.slane %v937_v40, 1 }
  0x8e   : > { %v951_v36 = vadd.f32 %v950_v2, %v949_v11  ;;  %v945_v3 = vrot.slane %v944_v39, 1  ;;  %v957_v47 = vrot.slane %v956_v46, 2  ;;  %v963_v9 = vadd.f32 %v962_v34, %v961_v62 }
  0x8f   : > { %v970_v0 = vadd.f32 %v969_v60, %v968_v22  ;;  %v3287_v8 = vmov 0  ;;  %v932_v25 = vadd.f32 %v931_v59, %v930_v16  ;;  %v939_v24 = vadd.f32 %v938_v48, %v937_v40  ;;  %v2640_v48 = vld [vmem:[%s2026_s14] sm:$0xff] }
  0x90   : > { %v3288_v8 = vsel %vm2577_vm6, 4294967295, %v3287_v8  ;;  %v952_v43 = vrot.slane %v951_v36, 1  ;;  %vm3239_vm12 = vcmask 1044484   ;;  %v946_v61 = vadd.f32 %v945_v3, %v944_v39 }
  0x91   : > { %v958_v17 = vadd.f32 %v957_v47, %v956_v46  ;;  %v964_v10 = vrot.slane %v963_v9, 2  ;;  %v971_v23 = vrot.slane %v970_v0, 2  ;;  %v3293_v13 = vmov 0 }
  0x92   : > { %v3294_v13 = vsel %vm2598_vm13, 4294967295, %v3293_v13  ;;  %v925_v27 = vadd.f32 %v924_v18, %v923_v12  ;;  %v953_v58 = vadd.f32 %v952_v43, %v951_v36  ;;  %v993_v41 = vmul.f32 %v977_v30, %v932_v25  ;;  %v2643_v36 = vld [vmem:[%s2026_s14 + $0x8] sm:$0xff] }
  0x93   : > { %v994_v52 = vmul.f32 %v978_v7, %v939_v24  ;;  %v959_v5 = vrot.slane %v958_v17, 1  ;;  %v965_v32 = vadd.f32 %v964_v10, %v963_v9  ;;  %v972_v11 = vadd.f32 %v971_v23, %v970_v0  ;;  %v2682_v10 = vld [vmem:[%s2026_s14 + $0x18] sm:$0xff] }
  0x94   : > { %v995_v49 = vmul.f32 %v979_v14, %v946_v61  ;;  %v996_v45 = vmul.f32 %v980_v50, %v953_v58  ;;  %v1009_v29 = vrot.slane %v993_v41, 7  ;;  %vm3238_vm15 = vcmask 1046534  }
  0x95   : > { %v1010_v62 = vrot.slane %v994_v52, 6  ;;  %v960_v30 = vadd.f32 %v959_v5, %v958_v17  ;;  %v966_v22 = vrot.slane %v965_v32, 1  ;;  %v973_v7 = vrot.slane %v972_v11, 1  ;;  %v2679_v17 = vld [vmem:[%s2026_s14 + $0x10] sm:$0xff] }
  0x96   : > { %v1011_v12 = vrot.slane %v995_v49, 5  ;;  %v992_v16 = vmul.f32 %v976_v42, %v925_v27  ;;  %vm3240_vm0 = vcmask 1045508   ;;  %v3295_v28 = vmov 0  ;;  %v2694_v27 = vld [vmem:[%s2026_s14 + $0x20] sm:$0xff] }
  0x97   : > { %v3296_v28 = vsel %vm2619_vm1, 4294967295, %v3295_v28  ;;  %v1927_v14 = vmov 0   ;;  %v967_v40 = vadd.f32 %v966_v22, %v965_v32  ;;  %v974_v2 = vadd.f32 %v973_v7, %v972_v11  ;;  %v2704_v32 = vld [vmem:[%s2026_s14 + $0x28] sm:$0xff]  ;;  %v2707_v11 = vld [vmem:[%s2026_s14 + $0x30] sm:$0xff] }
  0x98   : > { %v2623_v50 = vsel %vm1044_vm14, 1, %v1927_v14  ;;  %v997_v39 = vmul.f32 %v981_v53, %v960_v30  ;;  %v1012_v46 = vrot.slane %v996_v45, 4  ;;  %v1017_v42 = vsel %vm3244_vm5, %v992_v16, %v1009_v29  ;;  %v2717_v30 = vld [vmem:[%s2026_s14 + $0x38] sm:$0xff] }
  0x99   : > { %vm3241_vm2 = vcmask 1043456   ;;  %v2631_v21 = vsel %vm2570_vm10, 1.0, %v1925_v54  ;;  %v1082_v34 = vperm.slane %v2623_v50, 0  ;;  %v998_v60 = vmul.f32 %v982_v4, %v967_v40 }
  0x9a   : > { %v999_v18 = vmul.f32 %v983_v35, %v974_v2  ;;  %v1013_v59 = vrot.slane %v997_v39, 3  ;;  %v1019_v53 = vsel %vm3243_vm11, %v1010_v62, %v1011_v12  ;;  %v2648_v3 = vsel %vm2577_vm6, 1.0, %v1925_v54 }
  0x9b   : > { %v2653_v38 = vsel %vm2584_vm7, 1.0, %v1925_v54  ;;  %v2658_v4 = vsel %vm2591_vm8, 1.0, %v1925_v54  ;;  %v1083_v35 = vperm.slane %v2623_v50, 1  ;;  %v1014_v47 = vrot.slane %v998_v60, 2 }
  0x9c   : > { %v1015_v9 = vrot.slane %v999_v18, 1  ;;  %v1022_v0 = vsel %vm3239_vm12, %v1012_v46, %v1013_v59  ;;  %vm2665_vm9 = vcmp.eq.s32.totalorder %v2541_v33, %v1055_v51  ;;  %vm2672_vm4 = vcmp.eq.s32.totalorder %v2541_v33, %v1056_v55  ;;  %v1000_v55 = vld [vmem:[%s2035_s2] sm:$0xff] }
  0x9d   : > { %v1084_v43 = vperm.slane %v2623_v50, 2  ;;  %v1020_v61 = vsel %vm3242_vm3, %v1017_v42, %v1019_v53  ;;  %v2687_v51 = vsel %vm2598_vm13, 1.0, %v1925_v54  ;;  %v1085_v44 = vperm.slane %v2623_v50, 3 }
  0x9e   : > { %v1122_v33 = vand.u32 2147483647, %v2640_v48  ;;  %v1024_v23 = vsel %vm3238_vm15, %v1014_v47, %v1015_v9  ;;  %v1086_v58 = vperm.slane %v2623_v50, 4  ;;  %vm2697_vm14 = vcmp.eq.s32.totalorder %v1082_v34, 1 }
  0x9f   : > { %v1123_v52 = vand.u32 2147483647, %v2643_v36  ;;  %v1026_v5 = vsel %vm3240_vm0, %v1022_v0, %v1024_v23  ;;  %v1087_v49 = vperm.slane %v2623_v50, 5  ;;  %v1088_v45 = vperm.slane %v2623_v50, 6 }
  0xa0   : > { %vm2711_vm15 = vcmp.eq.s32.totalorder %v1083_v35, 1  ;;  %v1028_v62 = vsel %vm3241_vm2, %v1020_v61, %v1026_v5  ;;  %vm2719_vm12 = vcmp.eq.s32.totalorder %v1084_v43, 1  ;;  %v1124_v7 = vand.u32 2147483647, %v2679_v17 }
  0xa1   : > { %v1125_v12 = vand.u32 2147483647, %v2682_v10  ;;  %v1030_v16 = vadd.f32 %v1028_v62, %v1000_v55  ;;  %v1089_v14 = vperm.slane %v2623_v50, 7  ;;  %vm2726_vm0 = vcmp.eq.s32.totalorder %v1085_v44, 1 }
  0xa2   : > { %v1126_v2 = vand.u32 2147483647, %v2694_v27  ;;  %v2738_v39 = vsel %vm2619_vm1, 1.0, %v1925_v54  ;;  %vm2740_vm3 = vcmp.eq.s32.totalorder %v1086_v58, 1  ;;  %v3309_v46 = vmov 0 }
  0xa3   : > { %v3310_v46 = vsel %vm2740_vm3, 4294967295, %v3309_v46  ;;  %v1127_v50 = vand.u32 2147483647, %v2704_v32  ;;  %v1128_v42 = vand.u32 2147483647, %v2707_v11  ;;  %1031 = vst [vmem:[%s2035_s2] sm:$0xff] %v1030_v16  ;;  %vm2751_vm5 = vcmp.eq.s32.totalorder %v1087_v49, 1 }
  0xa4   : > { %v3311_v34 = vmov 0  ;;  %v1129_v60 = vand.u32 2147483647, %v2717_v30  ;;  %v1130_v18 = vsub.f32 0.0, %v1122_v33  ;;  %vm2760_vm10 = vcmp.eq.s32.totalorder %v1088_v45, 1 }
  0xa5   : > { %v3312_v34 = vsel %vm2751_vm5, 4294967295, %v3311_v34  ;;  %v1131_v53 = vsub.f32 0.0, %v1123_v52  ;;  %v1132_v35 = vsub.f32 0.0, %v1124_v7  ;;  %v1133_v47 = vsub.f32 0.0, %v1125_v12  ;;  %vm1104_vm2 = vmand %vm2760_vm10, %vm2665_vm9 }
  0xa6   : > { %vm2768_vm6 = vcmp.eq.s32.totalorder %v1089_v14, 1  ;;  %v1134_v0 = vsub.f32 0.0, %v1126_v2  ;;  %v1135_v43 = vsub.f32 0.0, %v1127_v50  ;;  %v1136_v61 = vsub.f32 0.0, %v1128_v42 }
  0xa7   : > { %v1138_v44 = vmul.f32 1.442695, %v1130_v18  ;;  %v1140_v33 = vmul.f32 1.442695, %v1131_v53  ;;  %v1142_v55 = vmul.f32 1.442695, %v1132_v35  ;;  %vm1105_vm11 = vmand %vm2768_vm6, %vm2672_vm4  ;;  %vm3317_vm1 = vnez %v3286_v57 }
  0xa8   : > { %v2783_v23 = vsel %vm2665_vm9, 1.0, %v1925_v54  ;;  %v2788_v58 = vsel %vm2672_vm4, 1.0, %v1925_v54  ;;  %v1137_v52 = vsub.f32 0.0, %v1129_v60  ;;  %v1144_v5 = vmul.f32 1.442695, %v1133_v47  ;;  %vm3318_vm5 = vmand %vm2697_vm14, %vm3317_vm1 }
  0xa9   : > { %v1928_v49 = vmov 1.0   ;;  %vm3319_vm13 = vnez %v3288_v8  ;;  %1836 = vpow2.f32 %v1138_v44  ;;  %v1146_v62 = vmul.f32 1.442695, %v1134_v0  ;;  %vm3321_vm6 = vmand %vm2719_vm12, %vm2584_vm7 }
  0xaa   : > { %v1106_v54 = vsel %vm3318_vm5, 0.0, %v1928_v49  ;;  %vm3320_vm3 = vmand %vm2711_vm15, %vm3319_vm13  ;;  %v1108_v24 = vsel %vm3321_vm6, 0.0, %v1928_v49  ;;  %1838 = vpow2.f32 %v1140_v33  ;;  %v1148_v41 = vmul.f32 1.442695, %v1135_v43 }
  0xab   : > { %v1107_v45 = vsel %vm3320_vm3, 0.0, %v1928_v49  ;;  %vm3322_vm1 = vmand %vm2726_vm0, %vm2591_vm8  ;;  %vm3323_vm5 = vnez %v3310_v46  ;;  %vm3324_vm3 = vnez %v3294_v13  ;;  %vm3326_vm15 = vnez %v3312_v34 }
  0xac   : > { %v1109_v57 = vsel %vm3322_vm1, 0.0, %v1928_v49  ;;  %vm3325_vm13 = vmand %vm3323_vm5, %vm3324_vm3  ;;  %vm3327_vm4 = vnez %v3296_v28  ;;  %1840 = vpow2.f32 %v1142_v55  ;;  %v1150_v29 = vmul.f32 1.442695, %v1136_v61 }
  0xad   : > { %v1110_v8 = vsel %vm3325_vm13, 0.0, %v1928_v49  ;;  %vm3328_vm7 = vmand %vm3326_vm15, %vm3327_vm4  ;;  %v1112_v1 = vsel %vm1104_vm2, 0.0, %v1928_v49  ;;  %v1113_v22 = vsel %vm1105_vm11, 0.0, %v1928_v49  ;;  %1842 = vpow2.f32 %v1144_v5 }
  0xae   : > { %v1111_v20 = vsel %vm3328_vm7, 0.0, %v1928_v49  ;;  %v1152_v7 = vmul.f32 1.442695, %v1137_v52  ;;  %v2834_v13 = vmul.f32 %v2393_v19, %v1106_v54  ;;  %v2837_v12 = vmul.f32 %v2398_v26, %v1107_v45 }
  0xaf   : > { %v2840_v28 = vmul.f32 %v2507_v6, %v1108_v24  ;;  %1844 = vpow2.f32 %v1146_v62  ;;  %v2843_v16 = vmul.f32 %v2514_v56, %v1109_v57  ;;  %v2846_v25 = vmul.f32 %v2523_v63, %v1110_v8  ;;  %v1837_v40 = vpop.eup %1836 }
  0xb0   : > { %3329 = vst [vmem:[#allocation4_spill] sm:$0xff] %v2834_v13  ;;  %v2849_v14 = vmul.f32 %v2528_v37, %v1111_v20  ;;  %1846 = vpow2.f32 %v1148_v41  ;;  %v2852_v19 = vmul.f32 %v2533_v15, %v1112_v1  ;;  %v2855_v26 = vmul.f32 %v2538_v31, %v1113_v22  ;;  %v1839_v6 = vpop.eup %1838 }
  0xb1   : > { %3330 = vst [vmem:[#allocation5_spill] sm:$0xff] %v2837_v12  ;;  %1848 = vpow2.f32 %v1150_v29  ;;  %vm1162_vm10 = vcmp.ge.f32.partialorder %v2640_v48, 0.0  ;;  %v2858_v56 = vadd.f32 1.0, %v1837_v40  ;;  %vm1163_vm11 = vcmp.ge.f32.partialorder %v2643_v36, 0.0 }
  0xb2   : > { %3331 = vst [vmem:[#allocation6_spill] sm:$0xff] %v2840_v28  ;;  %1850 = vpow2.f32 %v1152_v7  ;;  %vm1164_vm8 = vcmp.ge.f32.partialorder %v2679_v17, 0.0  ;;  %v1841_v63 = vpop.eup %1840  ;;  %v2862_v37 = vadd.f32 1.0, %v1839_v6  ;;  %vm1165_vm12 = vcmp.ge.f32.partialorder %v2682_v10, 0.0 }
  0xb3   : > { %3332 = vst [vmem:[#allocation7_spill] sm:$0xff] %v2843_v16  ;;  %vm1166_vm0 = vcmp.ge.f32.partialorder %v2694_v27, 0.0  ;;  %vm1167_vm2 = vcmp.ge.f32.partialorder %v2704_v32, 0.0  ;;  %v1843_v15 = vpop.eup %1842  ;;  %vm1168_vm9 = vcmp.ge.f32.partialorder %v2707_v11, 0.0  ;;  %vm1169_vm14 = vcmp.ge.f32.partialorder %v2717_v30, 0.0 }
  0xb4   : > { %3333 = vst [vmem:[#allocation8_spill] sm:$0xff] %v2846_v25  ;;  %v2869_v31 = vsel %vm1162_vm10, 1.0, %v1837_v40  ;;  %1852 = vrcp.f32 %v2858_v56  ;;  %v2872_v46 = vadd.f32 1.0, %v1841_v63  ;;  %v2874_v50 = vsel %vm1163_vm11, 1.0, %v1839_v6 }
  0xb5   : > { %3334 = vst [vmem:[#allocation9_spill] sm:$0xff] %v2849_v14  ;;  %v1845_v2 = vpop.eup %1844  ;;  %v1187_v42 = vand.u32 2147483647, %v2858_v56  ;;  %v1189_v34 = vand.u32 2147483648, %v2858_v56  ;;  %v2878_v18 = vadd.f32 1.0, %v1843_v15  ;;  %v2882_v59 = vsel %vm1164_vm8, 1.0, %v1841_v63 }
  0xb6   : > { %3335 = vst [vmem:[#allocation10_spill] sm:$0xff] %v2852_v19  ;;  %v1847_v60 = vpop.eup %1846  ;;  %vm1183_vm6 = vweird.f32 %v2858_v56  ;;  %1854 = vrcp.f32 %v2862_v37  ;;  %v2886_v35 = vadd.f32 1.0, %v1845_v2  ;;  %v2890_v47 = vsel %vm1165_vm12, 1.0, %v1843_v15 }
  0xb7   : > { %3336 = vst [vmem:[#allocation11_spill] sm:$0xff] %v2855_v26  ;;  %v1849_v53 = vpop.eup %1848  ;;  %v2894_v9 = vsel %vm1166_vm0, 1.0, %v1845_v2  ;;  %vm1198_vm1 = vweird.f32 %v2862_v37  ;;  %v2897_v43 = vadd.f32 1.0, %v1847_v60  ;;  %v2901_v61 = vsel %vm1167_vm2, 1.0, %v1847_v60 }
  0xb8   : > { %v1851_v0 = vpop.eup %1850  ;;  %v1202_v44 = vand.u32 2147483647, %v2862_v37  ;;  %v1204_v33 = vand.u32 2147483648, %v2862_v37  ;;  %v2905_v55 = vadd.f32 1.0, %v1849_v53  ;;  %v2909_v52 = vsel %vm1168_vm9, 1.0, %v1849_v53 }
  0xb9   : > { %vm2911_vm5 = vcmp.eq.f32.partialorder %v1187_v42, 8.507059e+37  ;;  %v1190_v49 = vor.u32 1.1754944e-38, %v1189_v34  ;;  %1856 = vrcp.f32 %v2872_v46  ;;  %v2916_v45 = vadd.f32 1.0, %v1851_v0 }
  0xba   : > { %v1853_v54 = vpop.eup %1852  ;;  %v2920_v62 = vsel %vm1169_vm14, 1.0, %v1851_v0  ;;  %v1217_v24 = vand.u32 2147483647, %v2872_v46  ;;  %v1219_v57 = vand.u32 2147483648, %v2872_v46  ;;  %vm2925_vm3 = vcmp.eq.f32.partialorder %v1202_v44, 8.507059e+37 }
  0xbb   : > { %v1179_v41 = vmul.f32 %v1853_v54, %v2858_v56  ;;  %vm1213_vm13 = vweird.f32 %v2872_v46  ;;  %1858 = vrcp.f32 %v2878_v18  ;;  %vm1184_vm15 = vweird.f32 %v1853_v54 }
  0xbc   : > { %v1855_v20 = vpop.eup %1854  ;;  %v1205_v29 = vor.u32 1.1754944e-38, %v1204_v33  ;;  %v1232_v1 = vand.u32 2147483647, %v2878_v18  ;;  %v1234_v22 = vand.u32 2147483648, %v2878_v18  ;;  %vm1228_vm4 = vweird.f32 %v2878_v18  ;;  %vm2946_vm11 = vmor %vm1183_vm6, %vm1184_vm15 }
  0xbd   : > { %v1180_v7 = vsub.f32 1.0, %v1179_v41  ;;  %v1194_v40 = vmul.f32 %v1855_v20, %v2862_v37  ;;  %1860 = vrcp.f32 %v2886_v35  ;;  %vm1199_vm7 = vweird.f32 %v1855_v20 }
  0xbe   : > { %vm2936_vm10 = vcmp.eq.f32.partialorder %v1217_v24, 8.507059e+37  ;;  %v1220_v63 = vor.u32 1.1754944e-38, %v1219_v57  ;;  %v1247_v15 = vand.u32 2147483647, %v2886_v35  ;;  %v1249_v60 = vand.u32 2147483648, %v2886_v35  ;;  %vm2961_vm9 = vmor %vm1198_vm1, %vm1199_vm7 }
  0xbf   : > { %v1857_v2 = vpop.eup %1856  ;;  %v1181_v42 = vmul.f32 %v1853_v54, %v1180_v7  ;;  %v1195_v34 = vsub.f32 1.0, %v1194_v40  ;;  %1862 = vrcp.f32 %v2897_v43  ;;  %vm2951_vm12 = vcmp.eq.f32.partialorder %v1232_v1, 8.507059e+37 }
  0xc0   : > { %v1209_v0 = vmul.f32 %v1857_v2, %v2872_v46  ;;  %vm1214_vm8 = vweird.f32 %v1857_v2  ;;  %v1235_v33 = vor.u32 1.1754944e-38, %v1234_v22  ;;  %vm1243_vm0 = vweird.f32 %v2886_v35 }
  0xc1   : > { %v1859_v24 = vpop.eup %1858  ;;  %v1182_v57 = vadd.f32 %v1853_v54, %v1181_v42  ;;  %v1196_v41 = vmul.f32 %v1855_v20, %v1195_v34  ;;  %vm1258_vm2 = vweird.f32 %v2897_v43  ;;  %v1262_v7 = vand.u32 2147483647, %v2897_v43  ;;  %vm2985_vm1 = vmor %vm1213_vm13, %vm1214_vm8 }
  0xc2   : > { %v1210_v1 = vsub.f32 1.0, %v1209_v0  ;;  %v1224_v26 = vmul.f32 %v1859_v24, %v2878_v18  ;;  %vm2966_vm14 = vcmp.eq.f32.partialorder %v1247_v15, 8.507059e+37  ;;  %v1250_v42 = vor.u32 1.1754944e-38, %v1249_v60 }
  0xc3   : > { %v1264_v34 = vand.u32 2147483648, %v2897_v43  ;;  %v1861_v19 = vpop.eup %1860  ;;  %v1186_v14 = vsel %vm2946_vm11, %v1853_v54, %v1182_v57  ;;  %v1197_v25 = vadd.f32 %v1855_v20, %v1196_v41  ;;  %vm1229_vm6 = vweird.f32 %v1859_v24 }
  0xc4   : > { %1864 = vrcp.f32 %v2905_v55  ;;  %v1191_v0 = vsel %vm2911_vm5, %v1190_v49, %v1186_v14  ;;  %v1211_v16 = vmul.f32 %v1857_v2, %v1210_v1  ;;  %v1225_v28 = vsub.f32 1.0, %v1224_v26  ;;  %vm3001_vm13 = vmor %vm1228_vm4, %vm1229_vm6 }
  0xc5   : > { %v1239_v15 = vmul.f32 %v1861_v19, %v2886_v35  ;;  %v1863_v12 = vpop.eup %1862  ;;  %v2978_v60 = vmul.f32 %v1191_v0, %v2869_v31  ;;  %v1201_v13 = vsel %vm2961_vm9, %v1855_v20, %v1197_v25  ;;  %vm1244_vm15 = vweird.f32 %v1861_v19 }
  0xc6   : > { %vm2989_vm5 = vcmp.eq.f32.partialorder %v1262_v7, 8.507059e+37  ;;  %v1265_v26 = vor.u32 1.1754944e-38, %v1264_v34  ;;  %v1206_v31 = vsel %vm2925_vm3, %v1205_v29, %v1201_v13  ;;  %v1212_v5 = vadd.f32 %v1857_v2, %v1211_v16  ;;  %vm3015_vm3 = vmor %vm1243_vm0, %vm1244_vm15 }
  0xc7   : > { %v1226_v49 = vmul.f32 %v1859_v24, %v1225_v28  ;;  %v1240_v53 = vsub.f32 1.0, %v1239_v15  ;;  %v2996_v25 = vmul.f32 %v1206_v31, %v2874_v50  ;;  %v1254_v57 = vmul.f32 %v1863_v12, %v2897_v43 }
  0xc8   : > { %vm1259_vm7 = vweird.f32 %v1863_v12  ;;  %vm1273_vm11 = vweird.f32 %v2905_v55  ;;  %v1216_v13 = vsel %vm2985_vm1, %v1857_v2, %v1212_v5  ;;  %v1277_v50 = vand.u32 2147483647, %v2905_v55 }
  0xc9   : > { %v1227_v28 = vadd.f32 %v1859_v24, %v1226_v49  ;;  %v1241_v16 = vmul.f32 %v1861_v19, %v1240_v53  ;;  %v1221_v29 = vsel %vm2936_vm10, %v1220_v63, %v1216_v13  ;;  %v1255_v7 = vsub.f32 1.0, %v1254_v57  ;;  %vm3041_vm8 = vmor %vm1258_vm2, %vm1259_vm7 }
  0xca   : > { %v1865_v8 = vpop.eup %1864  ;;  %v1279_v40 = vand.u32 2147483648, %v2905_v55  ;;  %1866 = vrcp.f32 %v2916_v45  ;;  %v3022_v2 = vmul.f32 %v1221_v29, %v2882_v59  ;;  %vm3029_vm10 = vcmp.eq.f32.partialorder %v1277_v50, 8.507059e+37 }
  0xcb   : > { %v1231_v1 = vsel %vm3001_vm13, %v1859_v24, %v1227_v28  ;;  %v1242_v6 = vadd.f32 %v1861_v19, %v1241_v16  ;;  %v1269_v63 = vmul.f32 %v1865_v8, %v2905_v55  ;;  %v1256_v0 = vmul.f32 %v1863_v12, %v1255_v7 }
  0xcc   : > { %v1236_v34 = vsel %vm2951_vm12, %v1235_v33, %v1231_v1  ;;  %vm1274_vm4 = vweird.f32 %v1865_v8  ;;  %v1280_v33 = vor.u32 1.1754944e-38, %v1279_v40  ;;  %vm1288_vm12 = vweird.f32 %v2916_v45 }
  0xcd   : > { %v3034_v54 = vmul.f32 %v1236_v34, %v2890_v47  ;;  %v1246_v59 = vsel %vm3015_vm3, %v1861_v19, %v1242_v6  ;;  %v1270_v44 = vsub.f32 1.0, %v1269_v63  ;;  %v1257_v5 = vadd.f32 %v1863_v12, %v1256_v0  ;;  %vm3059_vm0 = vmor %vm1273_vm11, %vm1274_vm4 }
  0xce   : > { %v1251_v31 = vsel %vm2966_vm14, %v1250_v42, %v1246_v59  ;;  %v1292_v47 = vand.u32 2147483647, %v2916_v45  ;;  %v1294_v53 = vand.u32 2147483648, %v2916_v45  ;;  %v1298_v20 = vmax.f32 %v2640_v48, 0.0 }
  0xcf   : > { %v3050_v49 = vmul.f32 %v1251_v31, %v2894_v9  ;;  %v1271_v19 = vmul.f32 %v1865_v8, %v1270_v44  ;;  %v1261_v13 = vsel %vm3041_vm8, %v1863_v12, %v1257_v5  ;;  %v1299_v9 = vmax.f32 %v2643_v36, 0.0 }
  0xd0   : > { %v1867_v57 = vpop.eup %1866  ;;  %vm3063_vm2 = vcmp.eq.f32.partialorder %v1292_v47, 8.507059e+37  ;;  %v1300_v28 = vmax.f32 %v2679_v17, 0.0  ;;  %v1266_v16 = vsel %vm2989_vm5, %v1265_v26, %v1261_v13  ;;  %v1295_v41 = vor.u32 1.1754944e-38, %v1294_v53 }
  0xd1   : > { %v1272_v50 = vadd.f32 %v1865_v8, %v1271_v19  ;;  %v1284_v12 = vmul.f32 %v1867_v57, %v2916_v45  ;;  %vm1289_vm9 = vweird.f32 %v1867_v57  ;;  %v3073_v29 = vmul.f32 %v1266_v16, %v2901_v61 }
  0xd2   : > { %v1301_v7 = vmax.f32 %v2682_v10, 0.0  ;;  %v1302_v40 = vmax.f32 %v2694_v27, 0.0  ;;  %v1303_v63 = vmax.f32 %v2704_v32, 0.0  ;;  %v1304_v14 = vmax.f32 %v2707_v11, 0.0  ;;  %vm3098_vm14 = vmor %vm1288_vm12, %vm1289_vm9 }
  0xd3   : > { %v1276_v1 = vsel %vm3059_vm0, %v1865_v8, %v1272_v50  ;;  %v1285_v6 = vsub.f32 1.0, %v1284_v12  ;;  %v1305_v34 = vmax.f32 %v2717_v30, 0.0  ;;  %v1306_v61 = vmul.f32 %v2631_v21, %v2640_v48 }
  0xd4   : > { %v1281_v26 = vsel %vm3029_vm10, %v1280_v33, %v1276_v1  ;;  %v1307_v0 = vmul.f32 %v2648_v3, %v2643_v36  ;;  %v1308_v24 = vmul.f32 %v2653_v38, %v2679_v17  ;;  %v1309_v44 = vmul.f32 %v2658_v4, %v2682_v10 }
  0xd5   : > { %v3089_v59 = vmul.f32 %v1281_v26, %v2909_v52  ;;  %v1286_v8 = vmul.f32 %v1867_v57, %v1285_v6  ;;  %v1310_v48 = vmul.f32 %v2687_v51, %v2694_v27  ;;  %v1311_v36 = vmul.f32 %v2738_v39, %v2704_v32 }
  0xd6   : > { %v1312_v52 = vmul.f32 %v2783_v23, %v2707_v11  ;;  %v1313_v17 = vmul.f32 %v2788_v58, %v2717_v30  ;;  %v1314_v33 = vsub.f32 %v1298_v20, %v1306_v61  ;;  %v1315_v31 = vsub.f32 %v1299_v9, %v1307_v0 }
  0xd7   : > { %v1287_v10 = vadd.f32 %v1867_v57, %v1286_v8  ;;  %v1316_v5 = vsub.f32 %v1300_v28, %v1308_v24  ;;  %v1317_v47 = vsub.f32 %v1301_v7, %v1309_v44  ;;  %v3110_v19 = vsub.f32 %v1302_v40, %v1310_v48 }
  0xd8   : > { %v3112_v53 = vsub.f32 %v1303_v63, %v1311_v36  ;;  %v3114_v13 = vsub.f32 %v1304_v14, %v1312_v52  ;;  %v3118_v32 = vsub.f32 %v1305_v34, %v1313_v17  ;;  %1868 = vlog2.f32 %v2858_v56 }
  0xd9   : > { %v1291_v27 = vsel %vm3098_vm14, %v1867_v57, %v1287_v10  ;;  %v3123_v11 = vmul.f32 %v2631_v21, %v2978_v60  ;;  %1870 = vlog2.f32 %v2862_v37  ;;  %v1347_v20 = vmul.f32 %v2648_v3, %v2996_v25 }
  0xda   : > { %v1296_v30 = vsel %vm3063_vm2, %v1295_v41, %v1291_v27  ;;  %v1348_v22 = vmul.f32 %v2653_v38, %v3022_v2  ;;  %1872 = vlog2.f32 %v2872_v46  ;;  %v1349_v56 = vmul.f32 %v2658_v4, %v3034_v54 }
  0xdb   : > { %v1297_v57 = vmul.f32 %v1296_v30, %v2920_v62  ;;  %v1350_v9 = vmul.f32 %v2687_v51, %v3050_v49  ;;  %1874 = vlog2.f32 %v2878_v18  ;;  %v1351_v37 = vmul.f32 %v2738_v39, %v3073_v29 }
  0xdc   : > { %v1352_v42 = vmul.f32 %v2783_v23, %v3089_v59  ;;  %v1354_v28 = vsub.f32 1.0, %v2978_v60  ;;  %1876 = vlog2.f32 %v2886_v35  ;;  %v1355_v62 = vsub.f32 1.0, %v2996_v25 }
  0xdd   : > { %v1353_v46 = vmul.f32 %v2788_v58, %v1297_v57  ;;  %v1356_v16 = vsub.f32 1.0, %v3022_v2  ;;  %1878 = vlog2.f32 %v2897_v43  ;;  %v1357_v18 = vsub.f32 1.0, %v3034_v54 }
  0xde   : > { %v1358_v50 = vsub.f32 1.0, %v3050_v49  ;;  %v1359_v12 = vsub.f32 1.0, %v3073_v29  ;;  %v1869_v41 = vpop.eup %1868  ;;  %1880 = vlog2.f32 %v2905_v55  ;;  %v1360_v60 = vsub.f32 1.0, %v3089_v59 }
  0xdf   : > { %v1361_v35 = vsub.f32 1.0, %v1297_v57  ;;  %v1362_v7 = vsub.f32 1.0, %v2631_v21  ;;  %v1871_v40 = vpop.eup %1870  ;;  %v1323_v25 = vmul.f32 0.6931472, %v1869_v41  ;;  %1882 = vlog2.f32 %v2916_v45 }
  0xe0   : > { %v1363_v43 = vsub.f32 1.0, %v2648_v3  ;;  %v1364_v2 = vsub.f32 1.0, %v2653_v38  ;;  %v1873_v54 = vpop.eup %1872  ;;  %v1325_v49 = vmul.f32 0.6931472, %v1871_v40  ;;  %v1365_v29 = vsub.f32 1.0, %v2658_v4 }
  0xe1   : > { %v1366_v1 = vsub.f32 1.0, %v2687_v51  ;;  %v1367_v55 = vsub.f32 1.0, %v2738_v39  ;;  %v1875_v6 = vpop.eup %1874  ;;  %v1327_v63 = vmul.f32 0.6931472, %v1873_v54  ;;  %v3161_v14 = vadd.f32 %v1323_v25, %v1314_v33 }
  0xe2   : > { %v1368_v26 = vsub.f32 1.0, %v2783_v23  ;;  %v1369_v45 = vsub.f32 1.0, %v2788_v58  ;;  %v1877_v34 = vpop.eup %1876  ;;  %v1329_v61 = vmul.f32 0.6931472, %v1875_v6  ;;  %v3165_v0 = vadd.f32 %v1325_v49, %v1315_v31 }
  0xe3   : > { %v1370_v59 = vmul.f32 %v1362_v7, %v1354_v28  ;;  %v1371_v8 = vmul.f32 %v1363_v43, %v1355_v62  ;;  %v1879_v24 = vpop.eup %1878  ;;  %v1331_v44 = vmul.f32 0.6931472, %v1877_v34  ;;  %v3169_v15 = vadd.f32 %v1327_v63, %v1316_v5 }
  0xe4   : > { %v1372_v48 = vmul.f32 %v1364_v2, %v1356_v16  ;;  %v1373_v36 = vmul.f32 %v1365_v29, %v1357_v18  ;;  %v1881_v52 = vpop.eup %1880  ;;  %v1333_v17 = vmul.f32 0.6931472, %v1879_v24  ;;  %v3171_v10 = vadd.f32 %v1329_v61, %v1317_v47 }
  0xe5   : > { %v1374_v33 = vmul.f32 %v1366_v1, %v1358_v50  ;;  %v1375_v27 = vmul.f32 %v1367_v55, %v1359_v12  ;;  %v1883_v30 = vpop.eup %1882  ;;  %v1335_v57 = vmul.f32 0.6931472, %v1881_v52  ;;  %v3174_v31 = vadd.f32 %v1331_v44, %v3110_v19 }
  0xe6   : > { %v1376_v41 = vmul.f32 %v1368_v26, %v1360_v60  ;;  %v1377_v28 = vmul.f32 %v1369_v45, %v1361_v35  ;;  %v1337_v62 = vmul.f32 0.6931472, %v1883_v30  ;;  %v3177_v40 = vadd.f32 %v1333_v17, %v3112_v53 }
  0xe7   : > { %v1378_v5 = vadd.f32 %v1370_v59, %v3123_v11  ;;  %v1379_v16 = vadd.f32 %v1371_v8, %v1347_v20  ;;  %v1344_v18 = vadd.f32 %v1335_v57, %v3114_v13  ;;  %v1380_v47 = vadd.f32 %v1372_v48, %v1348_v22 }
  0xe8   : > { %v1381_v25 = vadd.f32 %v1373_v36, %v1349_v56  ;;  %v1382_v50 = vadd.f32 %v1374_v33, %v1350_v9  ;;  %v1345_v12 = vadd.f32 %v1337_v62, %v3118_v32  ;;  %v1383_v54 = vadd.f32 %v1375_v27, %v1351_v37 }
  0xe9   : > { %v1384_v49 = vadd.f32 %v1376_v41, %v1352_v42  ;;  %v1385_v19 = vadd.f32 %v1377_v28, %v1353_v46  ;;  %v1386_v6 = vsub.f32 1.0, %v1378_v5  ;;  %v1387_v60 = vsub.f32 1.0, %v1379_v16 }
  0xea   : > { %v1388_v35 = vsub.f32 1.0, %v1380_v47  ;;  %v1389_v63 = vsub.f32 1.0, %v1381_v25  ;;  %v1390_v34 = vsub.f32 1.0, %v1382_v50  ;;  %v1391_v53 = vsub.f32 1.0, %v1383_v54 }
  0xeb   : > { %v1392_v61 = vsub.f32 1.0, %v1384_v49  ;;  %v1393_v24 = vsub.f32 1.0, %v1385_v19  ;;  %v1394_v11 = vmul.f32 0.25, %v2631_v21  ;;  %v1395_v13 = vmul.f32 0.25, %v2648_v3 }
  0xec   : > { %v1396_v20 = vmul.f32 0.25, %v2653_v38  ;;  %v1397_v22 = vmul.f32 0.25, %v2658_v4  ;;  %v1398_v32 = vmul.f32 0.25, %v2687_v51  ;;  %v1399_v56 = vmul.f32 0.25, %v2738_v39 }
  0xed   : > { %v1400_v9 = vmul.f32 0.25, %v2783_v23  ;;  %v1401_v37 = vmul.f32 0.25, %v2788_v58  ;;  %v1402_v42 = vmul.f32 0.75, %v1362_v7  ;;  %v1403_v46 = vmul.f32 0.75, %v1363_v43 }
  0xee   : > { %v1404_v59 = vmul.f32 0.75, %v1364_v2  ;;  %v1405_v8 = vmul.f32 0.75, %v1365_v29  ;;  %v1406_v44 = vmul.f32 0.75, %v1366_v1  ;;  %v1407_v3 = vmul.f32 0.75, %v1367_v55 }
  0xef   : > { %v1408_v48 = vmul.f32 0.75, %v1368_v26  ;;  %v1409_v38 = vmul.f32 0.75, %v1369_v45  ;;  %v1410_v36 = vadd.f32 %v1402_v42, %v1394_v11  ;;  %v1411_v4 = vadd.f32 %v1403_v46, %v1395_v13  ;;  %v3374_v11 = vld [vmem:[#allocation9_spill] sm:$0xff]  ;;  %v3375_v13 = vld [vmem:[#allocation10_spill] sm:$0xff] }
  0xf0   : > { %v1412_v52 = vadd.f32 %v1404_v59, %v1396_v20  ;;  %v1413_v51 = vadd.f32 %v1405_v8, %v1397_v22  ;;  %v1414_v17 = vadd.f32 %v1406_v44, %v1398_v32  ;;  %v1415_v39 = vadd.f32 %v1407_v3, %v1399_v56  ;;  %v3376_v20 = vld [vmem:[#allocation11_spill] sm:$0xff] }
  0xf1   : > { %v1416_v33 = vadd.f32 %v1408_v48, %v1400_v9  ;;  %v1417_v23 = vadd.f32 %v1409_v38, %v1401_v37  ;;  %v1418_v27 = vmul.f32 %v1386_v6, %v1386_v6  ;;  %v1419_v58 = vmul.f32 %v1387_v60, %v1387_v60  ;;  %v3369_v6 = vld [vmem:[#allocation4_spill] sm:$0xff] }
  0xf2   : > { %v1420_v30 = vmul.f32 %v1388_v35, %v1388_v35  ;;  %v1421_v21 = vmul.f32 %v1389_v63, %v1389_v63  ;;  %v1422_v7 = vmul.f32 %v1390_v34, %v1390_v34  ;;  %v1423_v43 = vmul.f32 %v1391_v53, %v1391_v53  ;;  %v3370_v35 = vld [vmem:[#allocation5_spill] sm:$0xff]  ;;  %v3371_v34 = vld [vmem:[#allocation6_spill] sm:$0xff] }
  0xf3   : > { %v1424_v2 = vmul.f32 %v1392_v61, %v1392_v61  ;;  %v1425_v29 = vmul.f32 %v1393_v24, %v1393_v24  ;;  %v1426_v1 = vmul.f32 %v1418_v27, %v1410_v36  ;;  %v1427_v55 = vmul.f32 %v1419_v58, %v1411_v4  ;;  %v3372_v61 = vld [vmem:[#allocation7_spill] sm:$0xff]  ;;  %v3373_v24 = vld [vmem:[#allocation8_spill] sm:$0xff] }
  0xf4   : > { %v1428_v26 = vmul.f32 %v1420_v30, %v1412_v52  ;;  %v1429_v45 = vmul.f32 %v1421_v21, %v1413_v51  ;;  %v1430_v57 = vmul.f32 %v1422_v7, %v1414_v17  ;;  %v1431_v41 = vmul.f32 %v1423_v43, %v1415_v39 }
  0xf5   : > { %v1432_v28 = vmul.f32 %v1424_v2, %v1416_v33  ;;  %v1433_v62 = vmul.f32 %v1425_v29, %v1417_v23  ;;  %v1434_v5 = vmul.f32 %v1426_v1, %v3161_v14  ;;  %v1435_v16 = vmul.f32 %v1427_v55, %v3165_v0 }
  0xf6   : > { %v1436_v47 = vmul.f32 %v1428_v26, %v3169_v15  ;;  %v1437_v25 = vmul.f32 %v1429_v45, %v3171_v10  ;;  %v1438_v50 = vmul.f32 %v1430_v57, %v3174_v31  ;;  %v1439_v54 = vmul.f32 %v1431_v41, %v3177_v40 }
  0xf7   : > { %v1440_v49 = vmul.f32 %v1432_v28, %v1344_v18  ;;  %v1441_v19 = vmul.f32 %v1433_v62, %v1345_v12  ;;  %v1442_v60 = vmul.f32 %v1434_v5, %v3369_v6  ;;  %v1443_v63 = vmul.f32 %v1435_v16, %v3370_v35 }
  0xf8   : > { %v1444_v53 = vmul.f32 %v1436_v47, %v3371_v34  ;;  %v1445_v14 = vmul.f32 %v1437_v25, %v3372_v61  ;;  %v1446_v0 = vmul.f32 %v1438_v50, %v3373_v24  ;;  %v1447_v15 = vmul.f32 %v1439_v54, %v3374_v11 }
  0xf9   : > { %v1448_v10 = vmul.f32 %v1440_v49, %v3375_v13  ;;  %v1449_v31 = vmul.f32 %v1441_v19, %v3376_v20  ;;  %v1451_v22 = vrot.slane %v1442_v60, 4  ;;  %v1457_v40 = vrot.slane %v1443_v63, 4 }
  0xfa   : > { %v1463_v18 = vrot.slane %v1444_v53, 4  ;;  %v1469_v12 = vrot.slane %v1445_v14, 4  ;;  %v1475_v32 = vrot.slane %v1446_v0, 4  ;;  %v1481_v56 = vrot.slane %v1447_v15, 4 }
  0xfb   : > { %v1487_v9 = vrot.slane %v1448_v10, 4  ;;  %v1493_v37 = vrot.slane %v1449_v31, 4  ;;  %v1452_v42 = vadd.f32 %v1451_v22, %v1442_v60  ;;  %v1458_v46 = vadd.f32 %v1457_v40, %v1443_v63 }
  0xfc   : > { %v1464_v59 = vadd.f32 %v1463_v18, %v1444_v53  ;;  %v1470_v8 = vadd.f32 %v1469_v12, %v1445_v14  ;;  %v1476_v44 = vadd.f32 %v1475_v32, %v1446_v0  ;;  %v1482_v3 = vadd.f32 %v1481_v56, %v1447_v15  ;;  %v1450_v0 = vld [vmem:[%s2040_s21] sm:$0xff] }
  0xfd   : > { %v1488_v48 = vadd.f32 %v1487_v9, %v1448_v10  ;;  %v1494_v38 = vadd.f32 %v1493_v37, %v1449_v31  ;;  %v1453_v36 = vrot.slane %v1452_v42, 2  ;;  %v1459_v4 = vrot.slane %v1458_v46, 2 }
  0xfe   : > { %v1465_v52 = vrot.slane %v1464_v59, 2  ;;  %v1471_v51 = vrot.slane %v1470_v8, 2  ;;  %v1477_v17 = vrot.slane %v1476_v44, 2  ;;  %v1483_v39 = vrot.slane %v1482_v3, 2 }
  0xff   : > { %v1489_v33 = vrot.slane %v1488_v48, 2  ;;  %v1495_v23 = vrot.slane %v1494_v38, 2  ;;  %v1454_v27 = vadd.f32 %v1453_v36, %v1452_v42  ;;  %v1460_v58 = vadd.f32 %v1459_v4, %v1458_v46 }
 0x100   : > { %v1466_v30 = vadd.f32 %v1465_v52, %v1464_v59  ;;  %v1472_v21 = vadd.f32 %v1471_v51, %v1470_v8  ;;  %v1478_v7 = vadd.f32 %v1477_v17, %v1476_v44  ;;  %v1484_v43 = vadd.f32 %v1483_v39, %v1482_v3 }
 0x101   : > { %v1490_v2 = vadd.f32 %v1489_v33, %v1488_v48  ;;  %v1496_v29 = vadd.f32 %v1495_v23, %v1494_v38  ;;  %v1455_v1 = vrot.slane %v1454_v27, 1  ;;  %v1461_v55 = vrot.slane %v1460_v58, 1 }
 0x102   : > { %v1467_v26 = vrot.slane %v1466_v30, 1  ;;  %v1473_v45 = vrot.slane %v1472_v21, 1  ;;  %v1479_v57 = vrot.slane %v1478_v7, 1  ;;  %v1485_v41 = vrot.slane %v1484_v43, 1 }
 0x103   : > { %v1491_v28 = vrot.slane %v1490_v2, 1  ;;  %v1497_v62 = vrot.slane %v1496_v29, 1  ;;  %v1456_v5 = vadd.f32 %v1455_v1, %v1454_v27  ;;  %v1462_v16 = vadd.f32 %v1461_v55, %v1460_v58 }
 0x104   : > { %v1468_v47 = vadd.f32 %v1467_v26, %v1466_v30  ;;  %v1474_v25 = vadd.f32 %v1473_v45, %v1472_v21  ;;  %v1480_v50 = vadd.f32 %v1479_v57, %v1478_v7  ;;  %v1486_v54 = vadd.f32 %v1485_v41, %v1484_v43 }
 0x105   : > { %v1492_v49 = vadd.f32 %v1491_v28, %v1490_v2  ;;  %v1498_v19 = vadd.f32 %v1497_v62, %v1496_v29  ;;  %v1507_v6 = vrot.slane %v1462_v16, 7  ;;  %vm3377_vm6 = vcmask 1040384  }
 0x106   : > { %v1508_v60 = vrot.slane %v1468_v47, 6  ;;  %v1509_v35 = vrot.slane %v1474_v25, 5  ;;  %v1510_v63 = vrot.slane %v1480_v50, 4  ;;  %v1511_v34 = vrot.slane %v1486_v54, 3 }
 0x107   : > { %v1512_v53 = vrot.slane %v1492_v49, 2  ;;  %v1513_v61 = vrot.slane %v1498_v19, 1  ;;  %v1514_v14 = vsel %vm3377_vm6, %v1456_v5, %v1507_v6  ;;  %vm3378_vm1 = vcmask 1042434  }
 0x108   : > { %v1515_v24 = vsel %vm3378_vm1, %v1508_v60, %v1509_v35  ;;  %vm3379_vm15 = vcmask 1041408   ;;  %vm3380_vm5 = vcmask 1044484   ;;  %vm3381_vm13 = vcmask 1046534  }
 0x109   : > { %v1516_v11 = vsel %vm3379_vm15, %v1514_v14, %v1515_v24  ;;  %v1517_v15 = vsel %vm3380_vm5, %v1510_v63, %v1511_v34  ;;  %v1518_v13 = vsel %vm3381_vm13, %v1512_v53, %v1513_v61  ;;  %vm3382_vm7 = vcmask 1045508  }
 0x10a   : > { %v1519_v10 = vsel %vm3382_vm7, %v1517_v15, %v1518_v13  ;;  %vm3383_vm11 = vcmask 1043456  }
 0x10b   : > { %v1520_v20 = vsel %vm3383_vm11, %v1516_v11, %v1519_v10 }
 0x10c   : > { %v1522_v31 = vadd.f32 %v1520_v20, %v1450_v0 }
 0x10e   : > { %1523 = vst [vmem:[%s2040_s21] sm:$0xff] %v1522_v31 }
 0x10f PF: > { %s18_s28 = sadd.s32 1, %s1922_s28   ;;  %s3384_s2 = sld [smem:[#allocation2_spill]] }
 0x110   : > { %p15_p8 = scmp.ge.s32.totalorder %s18_s28, 6   ;;  %s3385_s11 = sld [smem:[#allocation3_spill]] }
 0x111   : > { %s3386_s24 = smov %s1914_s26  ;;  %s3387_s25 = smov %s1918_s27 }
 0x112   :  { %17 = sbr.rel (!%p15_p8) target bundleno = 4 (0x4), region = 108 }
 0x115   : > { %s3388_s26 = smov %s3384_s2 }
 0x116   : > { %s3389_s27 = smov %s3385_s11 }

</bundles_post_ra>
